<compile_context>
chip_gen: v7x
topology: tpu7x:2x2x1
jax: 0.10.0
libtpu: 0.0.40
codegen_flags: <defaults>
</compile_context>

<pallas_src>
import numpy as np
import jax
import jax.numpy as jnp
from jax.experimental import pallas as pl
from jax.experimental.pallas import tpu as pltpu

_VMEM = pl.BlockSpec(memory_space=pltpu.MemorySpace.VMEM)
_EPS = 1e-5
_NEG_SLOPE = 0.2


# ------------------------------------------------------------ weight prep ---
def _conv_to_dense(w_oihw, h, w, stride, pad=1):
    """PyTorch Conv2d weight (Cout, Cin, KH, KW) -> dense matrix D of shape
    (Cin*H*W, Cout*OH*OW) so that x_flat(N, Cin*H*W) @ D equals the conv output
    flattened in NCHW order as (N, Cout*OH*OW).  Built once at init time."""
    wt = np.asarray(w_oihw, np.float32)
    cout, cin, ksize_h, ksize_w = wt.shape
    oh = (h + 2 * pad - ksize_h) // stride + 1
    ow = (w + 2 * pad - ksize_w) // stride + 1
    dense = np.zeros((cin * h * w, cout * oh * ow), np.float32)
    ci_rows = np.arange(cin) * (h * w)
    co_cols = np.arange(cout) * (oh * ow)
    for kh in range(ksize_h):
        for kw in range(ksize_w):
            block = wt[:, :, kh, kw].T          # (cin, cout)
            for oy in range(oh):
                hi = stride * oy + kh - pad
                if hi < 0 or hi >= h:
                    continue
                for ox in range(ow):
                    wi = stride * ox + kw - pad
                    if wi < 0 or wi >= w:
                        continue
                    rows = ci_rows + hi * w + wi
                    cols = co_cols + oy * ow + ox
                    dense[np.ix_(rows, cols)] = block
    return jnp.asarray(dense), oh, ow


def _bn_mats(c, hw):
    """0/1 channel-pooling matrices for a flattened-NCHW slab of width c*hw.
    P (c*hw, c): x_flat @ P gives per-channel lane sums per row.
    P^T (c, c*hw): row_vec @ P^T broadcasts a per-channel value over its chunk."""
    pt = np.zeros((c, c * hw), np.float32)
    for ci in range(c):
        pt[ci, ci * hw:(ci + 1) * hw] = 1.0
    return jnp.asarray(pt.T), jnp.asarray(pt)


# ----------------------------------------------------------------- kernel ---
def _make_generator_kernel(counts):
    """counts[i] = N * H_i * W_i = number of samples each BatchNorm reduces over."""

    def kernel(x_ref,
               p0, t0, g0, b0, w0,
               p1, t1, g1, b1, w1,
               p2, t2, g2, b2, w2,
               p3, t3, g3, b3, w3,
               p4, t4, g4, b4,
               wp, bp,
               o_ref):
        def bn(hh, p_ref, t_ref, g_ref, b_ref, cnt):
            # Train-mode BatchNorm2d with biased batch variance (torch default).
            inv = 1.0 / cnt
            s = jnp.dot(hh, p_ref[...], preferred_element_type=jnp.float32)        # (N, C)
            ss = jnp.dot(hh * hh, p_ref[...], preferred_element_type=jnp.float32)  # (N, C)
            mean = jnp.sum(s, axis=0, keepdims=True) * inv                          # (1, C)
            ex2 = jnp.sum(ss, axis=0, keepdims=True) * inv                          # (1, C)
            var = jnp.maximum(ex2 - mean * mean, 0.0)
            scale = g_ref[...] * jax.lax.rsqrt(var + _EPS)                           # (1, C)
            shift = b_ref[...] - mean * scale                                        # (1, C)
            scale_b = jnp.dot(scale, t_ref[...], preferred_element_type=jnp.float32)  # (1, C*HW)
            shift_b = jnp.dot(shift, t_ref[...], preferred_element_type=jnp.float32)
            return hh * scale_b + shift_b

        def lrelu(hh):
            return jnp.where(hh >= 0, hh, _NEG_SLOPE * hh)

        bns = ((p0, t0, g0, b0), (p1, t1, g1, b1), (p2, t2, g2, b2),
               (p3, t3, g3, b3), (p4, t4, g4, b4))
        convs = (w0, w1, w2, w3)

        # leading BatchNorm2d(3)
        h = bn(x_ref[...], *bns[0], counts[0])

        # four Conv + BN + LeakyReLU(0.2) blocks.  Conv bias is dropped: it is
        # cancelled exactly by the mean subtraction of the train-mode BN.
        for i in range(4):
            h = jnp.dot(h, convs[i][...], preferred_element_type=jnp.float32)
            h = lrelu(bn(h, *bns[i + 1], counts[i + 1]))

        # parts block: 4 x (Conv2d(6,3,k3,p1) + Tanh), fused along output
        # channels; output columns are ordered (part, channel, oy, ox) so the
        # wrapper reshape yields (N, 4, 3, OH, OW) with no transpose.
        h = jnp.dot(h, wp[...], preferred_element_type=jnp.float32) + bp[...]
        o_ref[...] = jnp.tanh(h)

    return kernel


# -------------------------------------------------------------- init / fwd ---
def init_params(key, h=16, w=16):
    trunk = ((3, 12, 2), (12, 12, 2), (12, 12, 2), (12, 6, 1))   # (cin, cout, stride)
    keys = jax.random.split(key, len(trunk) + 2)

    args = []
    bn_hw = []

    # leading BatchNorm2d(3)
    cur_h, cur_w = h, w
    p, t = _bn_mats(3, cur_h * cur_w)
    args += [p, t, jnp.ones((1, 3), jnp.float32), jnp.zeros((1, 3), jnp.float32)]
    bn_hw.append(cur_h * cur_w)

    for i, (cin, cout, stride) in enumerate(trunk):
        wt = jax.random.normal(keys[i], (cout, cin, 3, 3), jnp.float32) * 0.1
        dense, cur_h, cur_w = _conv_to_dense(wt, cur_h, cur_w, stride)
        args.append(dense)
        # BatchNorm2d(cout): torch default init gamma=1, beta=0
        p, t = _bn_mats(cout, cur_h * cur_w)
        args += [p, t, jnp.ones((1, cout), jnp.float32), jnp.zeros((1, cout), jnp.float32)]
        bn_hw.append(cur_h * cur_w)

    # parts block: 4 x Conv2d(6, 3, k3, p1) fused along Cout -> (12, 6, 3, 3)
    pw = jax.random.normal(keys[-2], (4 * 3, 6, 3, 3), jnp.float32) * 0.1
    pb = jax.random.normal(keys[-1], (4 * 3,), jnp.float32) * 0.05
    dense, oh, ow = _conv_to_dense(pw, cur_h, cur_w, 1)
    bias_row = jnp.repeat(pb, oh * ow).reshape(1, 4 * 3 * oh * ow)
    args += [dense, bias_row]

    return {
        "kernel_args": args,
        "bn_hw": bn_hw,
        "out_spatial": (oh, ow),
        "out_cols": 4 * 3 * oh * ow,
    }


def generator_forward(x_nchw, params):
    n, c, h, w = x_nchw.shape
    x_flat = x_nchw.reshape(n, c * h * w).astype(jnp.float32)   # flattened NCHW (free reshape)

    counts = tuple(float(n * hw) for hw in params["bn_hw"])
    kernel = _make_generator_kernel(counts)
    args = (x_flat,) + tuple(params["kernel_args"])

    out = pl.pallas_call(
        kernel,
        out_shape=jax.ShapeDtypeStruct((n, params["out_cols"]), jnp.float32),
        in_specs=[_VMEM] * len(args),
        out_specs=_VMEM,
    )(*args)

    oh, ow = params["out_spatial"]
    return out.reshape(n, 4, 3, oh, ow)                          # free reshape, no transpose


if __name__ == "__main__":
    key = jax.random.PRNGKey(0)
    pkey, xkey = jax.random.split(key)
    params = init_params(pkey, h=16, w=16)

    # Small input consistent with the module: NCHW (batch=2, C=3, 16x16)
    x = jax.random.normal(xkey, (2, 3, 16, 16), jnp.float32)

    fwd = jax.jit(lambda xx: generator_forward(xx, params))
    out = jax.block_until_ready(fwd(x))

    assert out.shape == (2, 4, 3, 2, 2), out.shape
    assert out.dtype == jnp.float32
    assert bool(jnp.all(jnp.isfinite(out)))
    assert bool(jnp.all(jnp.abs(out) <= 1.0))   # tanh output range
    print("KERNEL_OK")
</pallas_src>

<mosaic_0001>
module attributes {stable_mosaic.version = 11 : i64} {
  func.func @kernel(%arg0: memref<2x768xf32, #tpu.memory_space<vmem>>, %arg1: memref<768x3xf32, #tpu.memory_space<vmem>>, %arg2: memref<3x768xf32, #tpu.memory_space<vmem>>, %arg3: memref<1x3xf32, #tpu.memory_space<vmem>>, %arg4: memref<1x3xf32, #tpu.memory_space<vmem>>, %arg5: memref<768x768xf32, #tpu.memory_space<vmem>>, %arg6: memref<768x12xf32, #tpu.memory_space<vmem>>, %arg7: memref<12x768xf32, #tpu.memory_space<vmem>>, %arg8: memref<1x12xf32, #tpu.memory_space<vmem>>, %arg9: memref<1x12xf32, #tpu.memory_space<vmem>>, %arg10: memref<768x192xf32, #tpu.memory_space<vmem>>, %arg11: memref<192x12xf32, #tpu.memory_space<vmem>>, %arg12: memref<12x192xf32, #tpu.memory_space<vmem>>, %arg13: memref<1x12xf32, #tpu.memory_space<vmem>>, %arg14: memref<1x12xf32, #tpu.memory_space<vmem>>, %arg15: memref<192x48xf32, #tpu.memory_space<vmem>>, %arg16: memref<48x12xf32, #tpu.memory_space<vmem>>, %arg17: memref<12x48xf32, #tpu.memory_space<vmem>>, %arg18: memref<1x12xf32, #tpu.memory_space<vmem>>, %arg19: memref<1x12xf32, #tpu.memory_space<vmem>>, %arg20: memref<48x24xf32, #tpu.memory_space<vmem>>, %arg21: memref<24x6xf32, #tpu.memory_space<vmem>>, %arg22: memref<6x24xf32, #tpu.memory_space<vmem>>, %arg23: memref<1x6xf32, #tpu.memory_space<vmem>>, %arg24: memref<1x6xf32, #tpu.memory_space<vmem>>, %arg25: memref<24x48xf32, #tpu.memory_space<vmem>>, %arg26: memref<1x48xf32, #tpu.memory_space<vmem>>, %arg27: memref<2x48xf32, #tpu.memory_space<vmem>>) attributes {dimension_semantics = [], scalar_prefetch = 0 : i64, scratch_operands = 0 : i64, tpu.core_type = #tpu.core_type<tc>} {
    %c0 = arith.constant 0 : index
    %c0_0 = arith.constant 0 : index
    %0 = vector.load %arg0[%c0, %c0_0] : memref<2x768xf32, #tpu.memory_space<vmem>>, vector<2x768xf32>
    %c0_1 = arith.constant 0 : index
    %c0_2 = arith.constant 0 : index
    %1 = vector.load %arg1[%c0_1, %c0_2] : memref<768x3xf32, #tpu.memory_space<vmem>>, vector<768x3xf32>
    %cst = arith.constant dense<0.000000e+00> : vector<2x3xf32>
    %2 = tpu.matmul %0, %1, %cst {dimension_numbers = #tpu.dot_dimension_numbers<[1], [0], [0], [1], [0, 0, 1, 1], [], []>} : vector<2x768xf32>, vector<768x3xf32>, vector<2x3xf32> -> vector<2x3xf32>
    %3 = arith.mulf %0, %0 : vector<2x768xf32>
    %c0_3 = arith.constant 0 : index
    %c0_4 = arith.constant 0 : index
    %4 = vector.load %arg1[%c0_3, %c0_4] : memref<768x3xf32, #tpu.memory_space<vmem>>, vector<768x3xf32>
    %cst_5 = arith.constant dense<0.000000e+00> : vector<2x3xf32>
    %5 = tpu.matmul %3, %4, %cst_5 {dimension_numbers = #tpu.dot_dimension_numbers<[1], [0], [0], [1], [0, 0, 1, 1], [], []>} : vector<2x768xf32>, vector<768x3xf32>, vector<2x3xf32> -> vector<2x3xf32>
    %cst_6 = arith.constant dense<0.000000e+00> : vector<3xf32>
    %6 = vector.multi_reduction <add>, %2, %cst_6 [0] : vector<2x3xf32> to vector<3xf32>
    %7 = vector.shape_cast %6 : vector<3xf32> to vector<1x3xf32>
    %cst_7 = arith.constant 0.001953125 : f32
    %8 = vector.broadcast %cst_7 : f32 to vector<1x3xf32>
    %9 = arith.mulf %7, %8 : vector<1x3xf32>
    %cst_8 = arith.constant dense<0.000000e+00> : vector<3xf32>
    %10 = vector.multi_reduction <add>, %5, %cst_8 [0] : vector<2x3xf32> to vector<3xf32>
    %11 = vector.shape_cast %10 : vector<3xf32> to vector<1x3xf32>
    %cst_9 = arith.constant 0.001953125 : f32
    %12 = vector.broadcast %cst_9 : f32 to vector<1x3xf32>
    %13 = arith.mulf %11, %12 : vector<1x3xf32>
    %14 = arith.mulf %9, %9 : vector<1x3xf32>
    %15 = arith.subf %13, %14 : vector<1x3xf32>
    %cst_10 = arith.constant 0.000000e+00 : f32
    %16 = vector.broadcast %cst_10 : f32 to vector<1x3xf32>
    %17 = arith.maximumf %15, %16 : vector<1x3xf32>
    %c0_11 = arith.constant 0 : index
    %c0_12 = arith.constant 0 : index
    %18 = vector.load %arg3[%c0_11, %c0_12] : memref<1x3xf32, #tpu.memory_space<vmem>>, vector<1x3xf32>
    %cst_13 = arith.constant 9.99999974E-6 : f32
    %19 = vector.broadcast %cst_13 : f32 to vector<1x3xf32>
    %20 = arith.addf %17, %19 : vector<1x3xf32>
    %21 = math.rsqrt %20 : vector<1x3xf32>
    %22 = arith.mulf %18, %21 : vector<1x3xf32>
    %c0_14 = arith.constant 0 : index
    %c0_15 = arith.constant 0 : index
    %23 = vector.load %arg4[%c0_14, %c0_15] : memref<1x3xf32, #tpu.memory_space<vmem>>, vector<1x3xf32>
    %24 = arith.mulf %9, %22 : vector<1x3xf32>
    %25 = arith.subf %23, %24 : vector<1x3xf32>
    %c0_16 = arith.constant 0 : index
    %c0_17 = arith.constant 0 : index
    %26 = vector.load %arg2[%c0_16, %c0_17] : memref<3x768xf32, #tpu.memory_space<vmem>>, vector<3x768xf32>
    %cst_18 = arith.constant dense<0.000000e+00> : vector<1x768xf32>
    %27 = tpu.matmul %22, %26, %cst_18 {dimension_numbers = #tpu.dot_dimension_numbers<[1], [0], [0], [1], [0, 0, 1, 1], [], []>} : vector<1x3xf32>, vector<3x768xf32>, vector<1x768xf32> -> vector<1x768xf32>
    %c0_19 = arith.constant 0 : index
    %c0_20 = arith.constant 0 : index
    %28 = vector.load %arg2[%c0_19, %c0_20] : memref<3x768xf32, #tpu.memory_space<vmem>>, vector<3x768xf32>
    %cst_21 = arith.constant dense<0.000000e+00> : vector<1x768xf32>
    %29 = tpu.matmul %25, %28, %cst_21 {dimension_numbers = #tpu.dot_dimension_numbers<[1], [0], [0], [1], [0, 0, 1, 1], [], []>} : vector<1x3xf32>, vector<3x768xf32>, vector<1x768xf32> -> vector<1x768xf32>
    %30 = vector.broadcast %27 : vector<1x768xf32> to vector<2x768xf32>
    %31 = arith.mulf %0, %30 : vector<2x768xf32>
    %32 = vector.broadcast %29 : vector<1x768xf32> to vector<2x768xf32>
    %33 = arith.addf %31, %32 : vector<2x768xf32>
    %c0_22 = arith.constant 0 : index
    %c0_23 = arith.constant 0 : index
    %34 = vector.load %arg5[%c0_22, %c0_23] : memref<768x768xf32, #tpu.memory_space<vmem>>, vector<768x768xf32>
    %cst_24 = arith.constant dense<0.000000e+00> : vector<2x768xf32>
    %35 = tpu.matmul %33, %34, %cst_24 {dimension_numbers = #tpu.dot_dimension_numbers<[1], [0], [0], [1], [0, 0, 1, 1], [], []>} : vector<2x768xf32>, vector<768x768xf32>, vector<2x768xf32> -> vector<2x768xf32>
    %c0_25 = arith.constant 0 : index
    %c0_26 = arith.constant 0 : index
    %36 = vector.load %arg6[%c0_25, %c0_26] : memref<768x12xf32, #tpu.memory_space<vmem>>, vector<768x12xf32>
    %cst_27 = arith.constant dense<0.000000e+00> : vector<2x12xf32>
    %37 = tpu.matmul %35, %36, %cst_27 {dimension_numbers = #tpu.dot_dimension_numbers<[1], [0], [0], [1], [0, 0, 1, 1], [], []>} : vector<2x768xf32>, vector<768x12xf32>, vector<2x12xf32> -> vector<2x12xf32>
    %38 = arith.mulf %35, %35 : vector<2x768xf32>
    %c0_28 = arith.constant 0 : index
    %c0_29 = arith.constant 0 : index
    %39 = vector.load %arg6[%c0_28, %c0_29] : memref<768x12xf32, #tpu.memory_space<vmem>>, vector<768x12xf32>
    %cst_30 = arith.constant dense<0.000000e+00> : vector<2x12xf32>
    %40 = tpu.matmul %38, %39, %cst_30 {dimension_numbers = #tpu.dot_dimension_numbers<[1], [0], [0], [1], [0, 0, 1, 1], [], []>} : vector<2x768xf32>, vector<768x12xf32>, vector<2x12xf32> -> vector<2x12xf32>
    %cst_31 = arith.constant dense<0.000000e+00> : vector<12xf32>
    %41 = vector.multi_reduction <add>, %37, %cst_31 [0] : vector<2x12xf32> to vector<12xf32>
    %42 = vector.shape_cast %41 : vector<12xf32> to vector<1x12xf32>
    %cst_32 = arith.constant 7.812500e-03 : f32
    %43 = vector.broadcast %cst_32 : f32 to vector<1x12xf32>
    %44 = arith.mulf %42, %43 : vector<1x12xf32>
    %cst_33 = arith.constant dense<0.000000e+00> : vector<12xf32>
    %45 = vector.multi_reduction <add>, %40, %cst_33 [0] : vector<2x12xf32> to vector<12xf32>
    %46 = vector.shape_cast %45 : vector<12xf32> to vector<1x12xf32>
    %cst_34 = arith.constant 7.812500e-03 : f32
    %47 = vector.broadcast %cst_34 : f32 to vector<1x12xf32>
    %48 = arith.mulf %46, %47 : vector<1x12xf32>
    %49 = arith.mulf %44, %44 : vector<1x12xf32>
    %50 = arith.subf %48, %49 : vector<1x12xf32>
    %cst_35 = arith.constant 0.000000e+00 : f32
    %51 = vector.broadcast %cst_35 : f32 to vector<1x12xf32>
    %52 = arith.maximumf %50, %51 : vector<1x12xf32>
    %c0_36 = arith.constant 0 : index
    %c0_37 = arith.constant 0 : index
    %53 = vector.load %arg8[%c0_36, %c0_37] : memref<1x12xf32, #tpu.memory_space<vmem>>, vector<1x12xf32>
    %cst_38 = arith.constant 9.99999974E-6 : f32
    %54 = vector.broadcast %cst_38 : f32 to vector<1x12xf32>
    %55 = arith.addf %52, %54 : vector<1x12xf32>
    %56 = math.rsqrt %55 : vector<1x12xf32>
    %57 = arith.mulf %53, %56 : vector<1x12xf32>
    %c0_39 = arith.constant 0 : index
    %c0_40 = arith.constant 0 : index
    %58 = vector.load %arg9[%c0_39, %c0_40] : memref<1x12xf32, #tpu.memory_space<vmem>>, vector<1x12xf32>
    %59 = arith.mulf %44, %57 : vector<1x12xf32>
    %60 = arith.subf %58, %59 : vector<1x12xf32>
    %c0_41 = arith.constant 0 : index
    %c0_42 = arith.constant 0 : index
    %61 = vector.load %arg7[%c0_41, %c0_42] : memref<12x768xf32, #tpu.memory_space<vmem>>, vector<12x768xf32>
    %cst_43 = arith.constant dense<0.000000e+00> : vector<1x768xf32>
    %62 = tpu.matmul %57, %61, %cst_43 {dimension_numbers = #tpu.dot_dimension_numbers<[1], [0], [0], [1], [0, 0, 1, 1], [], []>} : vector<1x12xf32>, vector<12x768xf32>, vector<1x768xf32> -> vector<1x768xf32>
    %c0_44 = arith.constant 0 : index
    %c0_45 = arith.constant 0 : index
    %63 = vector.load %arg7[%c0_44, %c0_45] : memref<12x768xf32, #tpu.memory_space<vmem>>, vector<12x768xf32>
    %cst_46 = arith.constant dense<0.000000e+00> : vector<1x768xf32>
    %64 = tpu.matmul %60, %63, %cst_46 {dimension_numbers = #tpu.dot_dimension_numbers<[1], [0], [0], [1], [0, 0, 1, 1], [], []>} : vector<1x12xf32>, vector<12x768xf32>, vector<1x768xf32> -> vector<1x768xf32>
    %65 = vector.broadcast %62 : vector<1x768xf32> to vector<2x768xf32>
    %66 = arith.mulf %35, %65 : vector<2x768xf32>
    %67 = vector.broadcast %64 : vector<1x768xf32> to vector<2x768xf32>
    %68 = arith.addf %66, %67 : vector<2x768xf32>
    %cst_47 = arith.constant 0.000000e+00 : f32
    %69 = vector.broadcast %cst_47 : f32 to vector<2x768xf32>
    %70 = arith.cmpf oge, %68, %69 : vector<2x768xf32>
    %cst_48 = arith.constant 2.000000e-01 : f32
    %71 = vector.broadcast %cst_48 : f32 to vector<2x768xf32>
    %72 = arith.mulf %71, %68 : vector<2x768xf32>
    %73 = arith.select %70, %68, %72 : vector<2x768xi1>, vector<2x768xf32>
    %c0_49 = arith.constant 0 : index
    %c0_50 = arith.constant 0 : index
    %74 = vector.load %arg10[%c0_49, %c0_50] : memref<768x192xf32, #tpu.memory_space<vmem>>, vector<768x192xf32>
    %cst_51 = arith.constant dense<0.000000e+00> : vector<2x192xf32>
    %75 = tpu.matmul %73, %74, %cst_51 {dimension_numbers = #tpu.dot_dimension_numbers<[1], [0], [0], [1], [0, 0, 1, 1], [], []>} : vector<2x768xf32>, vector<768x192xf32>, vector<2x192xf32> -> vector<2x192xf32>
    %c0_52 = arith.constant 0 : index
    %c0_53 = arith.constant 0 : index
    %76 = vector.load %arg11[%c0_52, %c0_53] : memref<192x12xf32, #tpu.memory_space<vmem>>, vector<192x12xf32>
    %cst_54 = arith.constant dense<0.000000e+00> : vector<2x12xf32>
    %77 = tpu.matmul %75, %76, %cst_54 {dimension_numbers = #tpu.dot_dimension_numbers<[1], [0], [0], [1], [0, 0, 1, 1], [], []>} : vector<2x192xf32>, vector<192x12xf32>, vector<2x12xf32> -> vector<2x12xf32>
    %78 = arith.mulf %75, %75 : vector<2x192xf32>
    %c0_55 = arith.constant 0 : index
    %c0_56 = arith.constant 0 : index
    %79 = vector.load %arg11[%c0_55, %c0_56] : memref<192x12xf32, #tpu.memory_space<vmem>>, vector<192x12xf32>
    %cst_57 = arith.constant dense<0.000000e+00> : vector<2x12xf32>
    %80 = tpu.matmul %78, %79, %cst_57 {dimension_numbers = #tpu.dot_dimension_numbers<[1], [0], [0], [1], [0, 0, 1, 1], [], []>} : vector<2x192xf32>, vector<192x12xf32>, vector<2x12xf32> -> vector<2x12xf32>
    %cst_58 = arith.constant dense<0.000000e+00> : vector<12xf32>
    %81 = vector.multi_reduction <add>, %77, %cst_58 [0] : vector<2x12xf32> to vector<12xf32>
    %82 = vector.shape_cast %81 : vector<12xf32> to vector<1x12xf32>
    %cst_59 = arith.constant 3.125000e-02 : f32
    %83 = vector.broadcast %cst_59 : f32 to vector<1x12xf32>
    %84 = arith.mulf %82, %83 : vector<1x12xf32>
    %cst_60 = arith.constant dense<0.000000e+00> : vector<12xf32>
    %85 = vector.multi_reduction <add>, %80, %cst_60 [0] : vector<2x12xf32> to vector<12xf32>
    %86 = vector.shape_cast %85 : vector<12xf32> to vector<1x12xf32>
    %cst_61 = arith.constant 3.125000e-02 : f32
    %87 = vector.broadcast %cst_61 : f32 to vector<1x12xf32>
    %88 = arith.mulf %86, %87 : vector<1x12xf32>
    %89 = arith.mulf %84, %84 : vector<1x12xf32>
    %90 = arith.subf %88, %89 : vector<1x12xf32>
    %cst_62 = arith.constant 0.000000e+00 : f32
    %91 = vector.broadcast %cst_62 : f32 to vector<1x12xf32>
    %92 = arith.maximumf %90, %91 : vector<1x12xf32>
    %c0_63 = arith.constant 0 : index
    %c0_64 = arith.constant 0 : index
    %93 = vector.load %arg13[%c0_63, %c0_64] : memref<1x12xf32, #tpu.memory_space<vmem>>, vector<1x12xf32>
    %cst_65 = arith.constant 9.99999974E-6 : f32
    %94 = vector.broadcast %cst_65 : f32 to vector<1x12xf32>
    %95 = arith.addf %92, %94 : vector<1x12xf32>
    %96 = math.rsqrt %95 : vector<1x12xf32>
    %97 = arith.mulf %93, %96 : vector<1x12xf32>
    %c0_66 = arith.constant 0 : index
    %c0_67 = arith.constant 0 : index
    %98 = vector.load %arg14[%c0_66, %c0_67] : memref<1x12xf32, #tpu.memory_space<vmem>>, vector<1x12xf32>
    %99 = arith.mulf %84, %97 : vector<1x12xf32>
    %100 = arith.subf %98, %99 : vector<1x12xf32>
    %c0_68 = arith.constant 0 : index
    %c0_69 = arith.constant 0 : index
    %101 = vector.load %arg12[%c0_68, %c0_69] : memref<12x192xf32, #tpu.memory_space<vmem>>, vector<12x192xf32>
    %cst_70 = arith.constant dense<0.000000e+00> : vector<1x192xf32>
    %102 = tpu.matmul %97, %101, %cst_70 {dimension_numbers = #tpu.dot_dimension_numbers<[1], [0], [0], [1], [0, 0, 1, 1], [], []>} : vector<1x12xf32>, vector<12x192xf32>, vector<1x192xf32> -> vector<1x192xf32>
    %c0_71 = arith.constant 0 : index
    %c0_72 = arith.constant 0 : index
    %103 = vector.load %arg12[%c0_71, %c0_72] : memref<12x192xf32, #tpu.memory_space<vmem>>, vector<12x192xf32>
    %cst_73 = arith.constant dense<0.000000e+00> : vector<1x192xf32>
    %104 = tpu.matmul %100, %103, %cst_73 {dimension_numbers = #tpu.dot_dimension_numbers<[1], [0], [0], [1], [0, 0, 1, 1], [], []>} : vector<1x12xf32>, vector<12x192xf32>, vector<1x192xf32> -> vector<1x192xf32>
    %105 = vector.broadcast %102 : vector<1x192xf32> to vector<2x192xf32>
    %106 = arith.mulf %75, %105 : vector<2x192xf32>
    %107 = vector.broadcast %104 : vector<1x192xf32> to vector<2x192xf32>
    %108 = arith.addf %106, %107 : vector<2x192xf32>
    %cst_74 = arith.constant 0.000000e+00 : f32
    %109 = vector.broadcast %cst_74 : f32 to vector<2x192xf32>
    %110 = arith.cmpf oge, %108, %109 : vector<2x192xf32>
    %cst_75 = arith.constant 2.000000e-01 : f32
    %111 = vector.broadcast %cst_75 : f32 to vector<2x192xf32>
    %112 = arith.mulf %111, %108 : vector<2x192xf32>
    %113 = arith.select %110, %108, %112 : vector<2x192xi1>, vector<2x192xf32>
    %c0_76 = arith.constant 0 : index
    %c0_77 = arith.constant 0 : index
    %114 = vector.load %arg15[%c0_76, %c0_77] : memref<192x48xf32, #tpu.memory_space<vmem>>, vector<192x48xf32>
    %cst_78 = arith.constant dense<0.000000e+00> : vector<2x48xf32>
    %115 = tpu.matmul %113, %114, %cst_78 {dimension_numbers = #tpu.dot_dimension_numbers<[1], [0], [0], [1], [0, 0, 1, 1], [], []>} : vector<2x192xf32>, vector<192x48xf32>, vector<2x48xf32> -> vector<2x48xf32>
    %c0_79 = arith.constant 0 : index
    %c0_80 = arith.constant 0 : index
    %116 = vector.load %arg16[%c0_79, %c0_80] : memref<48x12xf32, #tpu.memory_space<vmem>>, vector<48x12xf32>
    %cst_81 = arith.constant dense<0.000000e+00> : vector<2x12xf32>
    %117 = tpu.matmul %115, %116, %cst_81 {dimension_numbers = #tpu.dot_dimension_numbers<[1], [0], [0], [1], [0, 0, 1, 1], [], []>} : vector<2x48xf32>, vector<48x12xf32>, vector<2x12xf32> -> vector<2x12xf32>
    %118 = arith.mulf %115, %115 : vector<2x48xf32>
    %c0_82 = arith.constant 0 : index
    %c0_83 = arith.constant 0 : index
    %119 = vector.load %arg16[%c0_82, %c0_83] : memref<48x12xf32, #tpu.memory_space<vmem>>, vector<48x12xf32>
    %cst_84 = arith.constant dense<0.000000e+00> : vector<2x12xf32>
    %120 = tpu.matmul %118, %119, %cst_84 {dimension_numbers = #tpu.dot_dimension_numbers<[1], [0], [0], [1], [0, 0, 1, 1], [], []>} : vector<2x48xf32>, vector<48x12xf32>, vector<2x12xf32> -> vector<2x12xf32>
    %cst_85 = arith.constant dense<0.000000e+00> : vector<12xf32>
    %121 = vector.multi_reduction <add>, %117, %cst_85 [0] : vector<2x12xf32> to vector<12xf32>
    %122 = vector.shape_cast %121 : vector<12xf32> to vector<1x12xf32>
    %cst_86 = arith.constant 1.250000e-01 : f32
    %123 = vector.broadcast %cst_86 : f32 to vector<1x12xf32>
    %124 = arith.mulf %122, %123 : vector<1x12xf32>
    %cst_87 = arith.constant dense<0.000000e+00> : vector<12xf32>
    %125 = vector.multi_reduction <add>, %120, %cst_87 [0] : vector<2x12xf32> to vector<12xf32>
    %126 = vector.shape_cast %125 : vector<12xf32> to vector<1x12xf32>
    %cst_88 = arith.constant 1.250000e-01 : f32
    %127 = vector.broadcast %cst_88 : f32 to vector<1x12xf32>
    %128 = arith.mulf %126, %127 : vector<1x12xf32>
    %129 = arith.mulf %124, %124 : vector<1x12xf32>
    %130 = arith.subf %128, %129 : vector<1x12xf32>
    %cst_89 = arith.constant 0.000000e+00 : f32
    %131 = vector.broadcast %cst_89 : f32 to vector<1x12xf32>
    %132 = arith.maximumf %130, %131 : vector<1x12xf32>
    %c0_90 = arith.constant 0 : index
    %c0_91 = arith.constant 0 : index
    %133 = vector.load %arg18[%c0_90, %c0_91] : memref<1x12xf32, #tpu.memory_space<vmem>>, vector<1x12xf32>
    %cst_92 = arith.constant 9.99999974E-6 : f32
    %134 = vector.broadcast %cst_92 : f32 to vector<1x12xf32>
    %135 = arith.addf %132, %134 : vector<1x12xf32>
    %136 = math.rsqrt %135 : vector<1x12xf32>
    %137 = arith.mulf %133, %136 : vector<1x12xf32>
    %c0_93 = arith.constant 0 : index
    %c0_94 = arith.constant 0 : index
    %138 = vector.load %arg19[%c0_93, %c0_94] : memref<1x12xf32, #tpu.memory_space<vmem>>, vector<1x12xf32>
    %139 = arith.mulf %124, %137 : vector<1x12xf32>
    %140 = arith.subf %138, %139 : vector<1x12xf32>
    %c0_95 = arith.constant 0 : index
    %c0_96 = arith.constant 0 : index
    %141 = vector.load %arg17[%c0_95, %c0_96] : memref<12x48xf32, #tpu.memory_space<vmem>>, vector<12x48xf32>
    %cst_97 = arith.constant dense<0.000000e+00> : vector<1x48xf32>
    %142 = tpu.matmul %137, %141, %cst_97 {dimension_numbers = #tpu.dot_dimension_numbers<[1], [0], [0], [1], [0, 0, 1, 1], [], []>} : vector<1x12xf32>, vector<12x48xf32>, vector<1x48xf32> -> vector<1x48xf32>
    %c0_98 = arith.constant 0 : index
    %c0_99 = arith.constant 0 : index
    %143 = vector.load %arg17[%c0_98, %c0_99] : memref<12x48xf32, #tpu.memory_space<vmem>>, vector<12x48xf32>
    %cst_100 = arith.constant dense<0.000000e+00> : vector<1x48xf32>
    %144 = tpu.matmul %140, %143, %cst_100 {dimension_numbers = #tpu.dot_dimension_numbers<[1], [0], [0], [1], [0, 0, 1, 1], [], []>} : vector<1x12xf32>, vector<12x48xf32>, vector<1x48xf32> -> vector<1x48xf32>
    %145 = vector.broadcast %142 : vector<1x48xf32> to vector<2x48xf32>
    %146 = arith.mulf %115, %145 : vector<2x48xf32>
    %147 = vector.broadcast %144 : vector<1x48xf32> to vector<2x48xf32>
    %148 = arith.addf %146, %147 : vector<2x48xf32>
    %cst_101 = arith.constant 0.000000e+00 : f32
    %149 = vector.broadcast %cst_101 : f32 to vector<2x48xf32>
    %150 = arith.cmpf oge, %148, %149 : vector<2x48xf32>
    %cst_102 = arith.constant 2.000000e-01 : f32
    %151 = vector.broadcast %cst_102 : f32 to vector<2x48xf32>
    %152 = arith.mulf %151, %148 : vector<2x48xf32>
    %153 = arith.select %150, %148, %152 : vector<2x48xi1>, vector<2x48xf32>
    %c0_103 = arith.constant 0 : index
    %c0_104 = arith.constant 0 : index
    %154 = vector.load %arg20[%c0_103, %c0_104] : memref<48x24xf32, #tpu.memory_space<vmem>>, vector<48x24xf32>
    %cst_105 = arith.constant dense<0.000000e+00> : vector<2x24xf32>
    %155 = tpu.matmul %153, %154, %cst_105 {dimension_numbers = #tpu.dot_dimension_numbers<[1], [0], [0], [1], [0, 0, 1, 1], [], []>} : vector<2x48xf32>, vector<48x24xf32>, vector<2x24xf32> -> vector<2x24xf32>
    %c0_106 = arith.constant 0 : index
    %c0_107 = arith.constant 0 : index
    %156 = vector.load %arg21[%c0_106, %c0_107] : memref<24x6xf32, #tpu.memory_space<vmem>>, vector<24x6xf32>
    %cst_108 = arith.constant dense<0.000000e+00> : vector<2x6xf32>
    %157 = tpu.matmul %155, %156, %cst_108 {dimension_numbers = #tpu.dot_dimension_numbers<[1], [0], [0], [1], [0, 0, 1, 1], [], []>} : vector<2x24xf32>, vector<24x6xf32>, vector<2x6xf32> -> vector<2x6xf32>
    %158 = arith.mulf %155, %155 : vector<2x24xf32>
    %c0_109 = arith.constant 0 : index
    %c0_110 = arith.constant 0 : index
    %159 = vector.load %arg21[%c0_109, %c0_110] : memref<24x6xf32, #tpu.memory_space<vmem>>, vector<24x6xf32>
    %cst_111 = arith.constant dense<0.000000e+00> : vector<2x6xf32>
    %160 = tpu.matmul %158, %159, %cst_111 {dimension_numbers = #tpu.dot_dimension_numbers<[1], [0], [0], [1], [0, 0, 1, 1], [], []>} : vector<2x24xf32>, vector<24x6xf32>, vector<2x6xf32> -> vector<2x6xf32>
    %cst_112 = arith.constant dense<0.000000e+00> : vector<6xf32>
    %161 = vector.multi_reduction <add>, %157, %cst_112 [0] : vector<2x6xf32> to vector<6xf32>
    %162 = vector.shape_cast %161 : vector<6xf32> to vector<1x6xf32>
    %cst_113 = arith.constant 1.250000e-01 : f32
    %163 = vector.broadcast %cst_113 : f32 to vector<1x6xf32>
    %164 = arith.mulf %162, %163 : vector<1x6xf32>
    %cst_114 = arith.constant dense<0.000000e+00> : vector<6xf32>
    %165 = vector.multi_reduction <add>, %160, %cst_114 [0] : vector<2x6xf32> to vector<6xf32>
    %166 = vector.shape_cast %165 : vector<6xf32> to vector<1x6xf32>
    %cst_115 = arith.constant 1.250000e-01 : f32
    %167 = vector.broadcast %cst_115 : f32 to vector<1x6xf32>
    %168 = arith.mulf %166, %167 : vector<1x6xf32>
    %169 = arith.mulf %164, %164 : vector<1x6xf32>
    %170 = arith.subf %168, %169 : vector<1x6xf32>
    %cst_116 = arith.constant 0.000000e+00 : f32
    %171 = vector.broadcast %cst_116 : f32 to vector<1x6xf32>
    %172 = arith.maximumf %170, %171 : vector<1x6xf32>
    %c0_117 = arith.constant 0 : index
    %c0_118 = arith.constant 0 : index
    %173 = vector.load %arg23[%c0_117, %c0_118] : memref<1x6xf32, #tpu.memory_space<vmem>>, vector<1x6xf32>
    %cst_119 = arith.constant 9.99999974E-6 : f32
    %174 = vector.broadcast %cst_119 : f32 to vector<1x6xf32>
    %175 = arith.addf %172, %174 : vector<1x6xf32>
    %176 = math.rsqrt %175 : vector<1x6xf32>
    %177 = arith.mulf %173, %176 : vector<1x6xf32>
    %c0_120 = arith.constant 0 : index
    %c0_121 = arith.constant 0 : index
    %178 = vector.load %arg24[%c0_120, %c0_121] : memref<1x6xf32, #tpu.memory_space<vmem>>, vector<1x6xf32>
    %179 = arith.mulf %164, %177 : vector<1x6xf32>
    %180 = arith.subf %178, %179 : vector<1x6xf32>
    %c0_122 = arith.constant 0 : index
    %c0_123 = arith.constant 0 : index
    %181 = vector.load %arg22[%c0_122, %c0_123] : memref<6x24xf32, #tpu.memory_space<vmem>>, vector<6x24xf32>
    %cst_124 = arith.constant dense<0.000000e+00> : vector<1x24xf32>
    %182 = tpu.matmul %177, %181, %cst_124 {dimension_numbers = #tpu.dot_dimension_numbers<[1], [0], [0], [1], [0, 0, 1, 1], [], []>} : vector<1x6xf32>, vector<6x24xf32>, vector<1x24xf32> -> vector<1x24xf32>
    %c0_125 = arith.constant 0 : index
    %c0_126 = arith.constant 0 : index
    %183 = vector.load %arg22[%c0_125, %c0_126] : memref<6x24xf32, #tpu.memory_space<vmem>>, vector<6x24xf32>
    %cst_127 = arith.constant dense<0.000000e+00> : vector<1x24xf32>
    %184 = tpu.matmul %180, %183, %cst_127 {dimension_numbers = #tpu.dot_dimension_numbers<[1], [0], [0], [1], [0, 0, 1, 1], [], []>} : vector<1x6xf32>, vector<6x24xf32>, vector<1x24xf32> -> vector<1x24xf32>
    %185 = vector.broadcast %182 : vector<1x24xf32> to vector<2x24xf32>
    %186 = arith.mulf %155, %185 : vector<2x24xf32>
    %187 = vector.broadcast %184 : vector<1x24xf32> to vector<2x24xf32>
    %188 = arith.addf %186, %187 : vector<2x24xf32>
    %cst_128 = arith.constant 0.000000e+00 : f32
    %189 = vector.broadcast %cst_128 : f32 to vector<2x24xf32>
    %190 = arith.cmpf oge, %188, %189 : vector<2x24xf32>
    %cst_129 = arith.constant 2.000000e-01 : f32
    %191 = vector.broadcast %cst_129 : f32 to vector<2x24xf32>
    %192 = arith.mulf %191, %188 : vector<2x24xf32>
    %193 = arith.select %190, %188, %192 : vector<2x24xi1>, vector<2x24xf32>
    %c0_130 = arith.constant 0 : index
    %c0_131 = arith.constant 0 : index
    %194 = vector.load %arg25[%c0_130, %c0_131] : memref<24x48xf32, #tpu.memory_space<vmem>>, vector<24x48xf32>
    %cst_132 = arith.constant dense<0.000000e+00> : vector<2x48xf32>
    %195 = tpu.matmul %193, %194, %cst_132 {dimension_numbers = #tpu.dot_dimension_numbers<[1], [0], [0], [1], [0, 0, 1, 1], [], []>} : vector<2x24xf32>, vector<24x48xf32>, vector<2x48xf32> -> vector<2x48xf32>
    %c0_133 = arith.constant 0 : index
    %c0_134 = arith.constant 0 : index
    %196 = vector.load %arg26[%c0_133, %c0_134] : memref<1x48xf32, #tpu.memory_space<vmem>>, vector<1x48xf32>
    %197 = vector.broadcast %196 : vector<1x48xf32> to vector<2x48xf32>
    %198 = arith.addf %195, %197 : vector<2x48xf32>
    %199 = math.tanh %198 : vector<2x48xf32>
    %c0_135 = arith.constant 0 : index
    %c0_136 = arith.constant 0 : index
    %200 = vector.load %arg27[%c0_135, %c0_136] : memref<2x48xf32, #tpu.memory_space<vmem>>, vector<2x48xf32>
    tpu.vector_store %arg27[%c0_135, %c0_136], %199 {strides = array<i32>} : memref<2x48xf32, #tpu.memory_space<vmem>>, vector<2x48xf32>,
    return
  }
}

</mosaic_0001>

<bundles_post_ra>
// kernel: _lambda_.1
= control target key start
LH: loop header
LB: loop body
LE: loop exit
PB: predicated region body
PF: predicated region fallthrough
CT: control target
= control target key end

     0   :  { %s9198_s0 = inlined_call_operand.vmem [shape: f32[2,768], index: 0, kind: input, shape index: {}]   ;;  %s9199_s1 = inlined_call_operand.hbm [shape: f32[768,3], index: 1, kind: input, shape index: {}]   ;;  %s9200_s2 = inlined_call_operand.hbm [shape: f32[3,768], index: 2, kind: input, shape index: {}]   ;;  %s9201_s3 = inlined_call_operand.vmem [shape: f32[1,3], index: 3, kind: input, shape index: {}]   ;;  %s9202_s4 = inlined_call_operand.vmem [shape: f32[1,3], index: 4, kind: input, shape index: {}]   ;;  %s9203_s5 = inlined_call_operand.hbm [shape: f32[768,768], index: 5, kind: input, shape index: {}]   ;;  %s9204_s6 = inlined_call_operand.hbm [shape: f32[768,12], index: 6, kind: input, shape index: {}]   ;;  %s9205_s7 = inlined_call_operand.hbm [shape: f32[12,768], index: 7, kind: input, shape index: {}]   ;;  %s9206_s8 = inlined_call_operand.vmem [shape: f32[1,12], index: 8, kind: input, shape index: {}, may-alias: {8,13,18}]   ;;  %s9207_s9 = inlined_call_operand.vmem [shape: f32[1,12], index: 9, kind: input, shape index: {}, may-alias: {9,14,19}]   ;;  %s9208_s10 = inlined_call_operand.hbm [shape: f32[768,192], index: 10, kind: input, shape index: {}]   ;;  %s9209_s11 = inlined_call_operand.hbm [shape: f32[192,12], index: 11, kind: input, shape index: {}]   ;;  %s9210_s12 = inlined_call_operand.hbm [shape: f32[12,192], index: 12, kind: input, shape index: {}]   ;;  %s9211_s13 = inlined_call_operand.vmem [shape: f32[1,12], index: 13, kind: input, shape index: {}, may-alias: {8,13,18}]   ;;  %s9212_s14 = inlined_call_operand.vmem [shape: f32[1,12], index: 14, kind: input, shape index: {}, may-alias: {9,14,19}]   ;;  %s9213_s15 = inlined_call_operand.hbm [shape: f32[192,48], index: 15, kind: input, shape index: {}]   ;;  %s9214_s16 = inlined_call_operand.hbm [shape: f32[48,12], index: 16, kind: input, shape index: {}]   ;;  %s9215_s17 = inlined_call_operand.hbm [shape: f32[12,48], index: 17, kind: input, shape index: {}]   ;;  %s9216_s18 = inlined_call_operand.vmem [shape: f32[1,12], index: 18, kind: input, shape index: {}, may-alias: {8,13,18}]   ;;  %s9217_s19 = inlined_call_operand.vmem [shape: f32[1,12], index: 19, kind: input, shape index: {}, may-alias: {9,14,19}]   ;;  %s9218_s20 = inlined_call_operand.hbm [shape: f32[48,24], index: 20, kind: input, shape index: {}]   ;;  %s9219_s21 = inlined_call_operand.hbm [shape: f32[24,6], index: 21, kind: input, shape index: {}]   ;;  %s9220_s22 = inlined_call_operand.hbm [shape: f32[6,24], index: 22, kind: input, shape index: {}]   ;;  %s9221_s23 = inlined_call_operand.vmem [shape: f32[1,6], index: 23, kind: input, shape index: {}]   ;;  %s9222_s24 = inlined_call_operand.vmem [shape: f32[1,6], index: 24, kind: input, shape index: {}]   ;;  %s9223_s25 = inlined_call_operand.hbm [shape: f32[24,48], index: 25, kind: input, shape index: {}]   ;;  %s9224_s26 = inlined_call_operand.hbm [shape: f32[1,48], index: 26, kind: input, shape index: {}]   ;;  %s9225_s27 = inlined_call_operand.vmem [shape: f32[2,48], index: 27, kind: output, shape index: {}]  }
   0x1   :  { %9238 = sst [smem:[#allocation36_spill]] %s9198_s0 }
   0x2   :  { %9239 = sst [smem:[#allocation37_spill]] %s9199_s1 }
   0x3   :  { %9240 = sst [smem:[#allocation38_spill]] %s9200_s2 }
   0x4   :  { %9241 = sst [smem:[#allocation39_spill]] %s9201_s3 }
   0x5   :  { %9242 = sst [smem:[#allocation40_spill]] %s9202_s4 }
   0x6   :  { %9243 = sst [smem:[#allocation41_spill]] %s9203_s5 }
   0x7   :  { %9244 = sst [smem:[#allocation42_spill]] %s9204_s6 }
   0x8   :  { %9245 = sst [smem:[#allocation43_spill]] %s9205_s7 }
   0x9   :  { %9246 = sst [smem:[#allocation44_spill]] %s9206_s8 }
   0xa   :  { %9247 = sst [smem:[#allocation45_spill]] %s9207_s9 }
   0xb   :  { %9248 = sst [smem:[#allocation46_spill]] %s9208_s10 }
   0xc   :  { %9249 = sst [smem:[#allocation47_spill]] %s9209_s11 }
   0xd   :  { %9250 = sst [smem:[#allocation48_spill]] %s9222_s24 }
   0xe   :  { %9251 = sst [smem:[#allocation49_spill]] %s9225_s27 }
   0xf   :  { %32 = vsyncpa [#allocation3], 0 }
  0x10   :  { %33 = vsyncpa [#allocation5], 0 }
  0x11   :  { %34 = vsyncpa [#allocation8], 0 }
  0x12   :  { %35 = vsyncpa [#allocation11], 0 }
  0x13   :  { %36 = vsyncpa [#allocation14], 0 }
  0x14   :  { %37 = vsyncpa [#allocation17], 0 }
  0x15   :  { %38 = vsyncpa [#allocation20], 0 }
  0x16   :  { %39 = vsyncpa [#allocation23], 0 }
  0x17   :  { %40 = vsyncpa [#allocation26], 0  ;;  %s7973_s7 = smov [#allocation4]   ;;  %s9252_s9 = sld [smem:[#allocation38_spill]] }
  0x18   :  { %s61_s4 = sshll.u32 %s7973_s7, 4  ;;  %s62_s4 = int_to_ptr.vmem [resolvable:$true] %s61_s4 }
  0x1d   :  { %s7603_s5 = scalar_lea.hbm %s9252_s9, 384 }
  0x1e   :  { %p7604_p0 = scmp.ne.s32.totalorder %s9252_s9, %s7603_s5  ;;  %p7607_p1 = scmp.lt.u32.totalorder %s7603_s5, %s9252_s9 }
  0x20   :  { %p7609_p2 = pnand %p7607_p1, %p7604_p0 }
  0x22   :  { %7612 = shalt.err (!%p7609_p2)
}
  0x23   :  { %s7613_s1 = scalar_lea.vmem %s62_s4, 384  ;;  %p7618_p4 = scmp.lt.s32.totalorder %s62_s4, %s62_s4 }
  0x24   :  { %p7614_p3 = scmp.ne.s32.totalorder %s62_s4, %s7613_s1  ;;  %p7619_p5 = scmp.lt.s32.totalorder %s7613_s1, %s7613_s1 }
  0x26   :  { %p7620_p6 = por %p7619_p5, %p7618_p4 }
  0x28   :  { %p7621_p7 = pnand %p7620_p6, %p7614_p3 }
  0x2a   :  { %7624 = shalt.err (!%p7621_p7)
}
  0x2b   :  { %64 = dma.hbm_to_vmem [thread:$0]  %s9252_s9, 384, %s62_s4, [#allocation5]  }
  0x2c   :  { %s7974_s2 = smov [#allocation7]   ;;  %s7975_s7 = smov [#allocation10]  }
  0x2d   :  { %s86_s3 = sshll.u32 %s7974_s2, 4  ;;  %s114_s8 = sshll.u32 %s7975_s7, 4  ;;  %s87_s3 = int_to_ptr.vmem [resolvable:$true] %s86_s3  ;;  %s115_s8 = int_to_ptr.vmem [resolvable:$true] %s114_s8 }
  0x2e   :  { %s9253_s28 = sld [smem:[#allocation42_spill]] }
  0x34   :  { %s7625_s0 = scalar_lea.hbm %s9253_s28, 12288 }
  0x35   :  { %p7626_p8 = scmp.ne.s32.totalorder %s9253_s28, %s7625_s0  ;;  %p7629_p9 = scmp.lt.u32.totalorder %s7625_s0, %s9253_s28 }
  0x37   :  { %p7631_p10 = pnand %p7629_p9, %p7626_p8 }
  0x39   :  { %7634 = shalt.err (!%p7631_p10)
}
  0x3a   :  { %s7635_s4 = scalar_lea.vmem %s87_s3, 12288  ;;  %p7640_p12 = scmp.lt.s32.totalorder %s87_s3, %s87_s3 }
  0x3b   :  { %p7636_p11 = scmp.ne.s32.totalorder %s87_s3, %s7635_s4  ;;  %p7641_p13 = scmp.lt.s32.totalorder %s7635_s4, %s7635_s4 }
  0x3d   :  { %p7642_p0 = por %p7641_p13, %p7640_p12 }
  0x3f   :  { %p7643_p1 = pnand %p7642_p0, %p7636_p11 }
  0x41   :  { %7646 = shalt.err (!%p7643_p1)
}
  0x42   :  { %s9234_s9 = smov 128   ;;  %s9236_s6 = smov 8  }
  0x43   :  { %92 = dma.hbm_to_vmem [thread:$0]  %s9253_s28, 12288, %s87_s3, [#allocation8], %s9234_s9, %s9234_s9, %s9236_s6  }
  0x44   :  { %s9254_s30 = sld [smem:[#allocation46_spill]] }
  0x4a   :  { %s7647_s5 = scalar_lea.hbm %s9254_s30, 24576 }
  0x4b   :  { %p7648_p2 = scmp.ne.s32.totalorder %s9254_s30, %s7647_s5  ;;  %p7651_p3 = scmp.lt.u32.totalorder %s7647_s5, %s9254_s30 }
  0x4d   :  { %p7653_p4 = pnand %p7651_p3, %p7648_p2 }
  0x4f   :  { %7656 = shalt.err (!%p7653_p4)
}
  0x50   :  { %s7657_s4 = scalar_lea.vmem %s115_s8, 24576  ;;  %p7662_p6 = scmp.lt.s32.totalorder %s115_s8, %s115_s8 }
  0x51   :  { %p7658_p5 = scmp.ne.s32.totalorder %s115_s8, %s7657_s4  ;;  %p7663_p7 = scmp.lt.s32.totalorder %s7657_s4, %s7657_s4 }
  0x53   :  { %p7664_p8 = por %p7663_p7, %p7662_p6 }
  0x55   :  { %p7665_p9 = pnand %p7664_p8, %p7658_p5 }
  0x57   :  { %7668 = shalt.err (!%p7665_p9)
}
  0x58   :  { %s7978_s3 = smov 256   ;;  %s7979_s28 = smov 16  }
  0x59   :  { %120 = dma.hbm_to_vmem [thread:$0]  %s9254_s30, 24576, %s115_s8, [#allocation11], %s7978_s3, %s7978_s3, %s7979_s28  }
  0x5a   :  { %s7980_s27 = smov [#allocation13]   ;;  %s7981_s0 = smov [#allocation16]  }
  0x5b   :  { %s138_s7 = sshll.u32 %s7980_s27, 4  ;;  %s166_s5 = sshll.u32 %s7981_s0, 4  ;;  %s139_s7 = int_to_ptr.vmem [resolvable:$true] %s138_s7  ;;  %s167_s5 = int_to_ptr.vmem [resolvable:$true] %s166_s5 }
  0x5c   :  { %s7669_s1 = scalar_lea.hbm %s9210_s12, 512 }
  0x5d   :  { %p7670_p10 = scmp.ne.s32.totalorder %s9210_s12, %s7669_s1  ;;  %p7673_p11 = scmp.lt.u32.totalorder %s7669_s1, %s9210_s12 }
  0x5f   :  { %p7675_p12 = pnand %p7673_p11, %p7670_p10 }
  0x61   :  { %7678 = shalt.err (!%p7675_p12)
}
  0x62   :  { %s7679_s8 = scalar_lea.vmem %s139_s7, 512  ;;  %p7684_p0 = scmp.lt.s32.totalorder %s139_s7, %s139_s7 }
  0x63   :  { %p7680_p13 = scmp.ne.s32.totalorder %s139_s7, %s7679_s8  ;;  %p7685_p1 = scmp.lt.s32.totalorder %s7679_s8, %s7679_s8 }
  0x65   :  { %p7686_p2 = por %p7685_p1, %p7684_p0 }
  0x67   :  { %p7687_p3 = pnand %p7686_p2, %p7680_p13 }
  0x69   :  { %7690 = shalt.err (!%p7687_p3)
}
  0x6a   :  { %144 = dma.hbm_to_vmem [thread:$0]  %s9210_s12, 512, %s139_s7, [#allocation14], %s7978_s3, %s7978_s3, %s7979_s28  }
  0x6b   :  { %s7691_s27 = scalar_lea.hbm %s9214_s16, 768 }
  0x6c   :  { %p7692_p4 = scmp.ne.s32.totalorder %s9214_s16, %s7691_s27  ;;  %p7695_p5 = scmp.lt.u32.totalorder %s7691_s27, %s9214_s16 }
  0x6e   :  { %p7697_p6 = pnand %p7695_p5, %p7692_p4 }
  0x70   :  { %7700 = shalt.err (!%p7697_p6)
}
  0x71   :  { %s7701_s29 = scalar_lea.vmem %s167_s5, 768  ;;  %p7706_p8 = scmp.lt.s32.totalorder %s167_s5, %s167_s5 }
  0x72   :  { %p7702_p7 = scmp.ne.s32.totalorder %s167_s5, %s7701_s29  ;;  %p7707_p9 = scmp.lt.s32.totalorder %s7701_s29, %s7701_s29 }
  0x74   :  { %p7708_p10 = por %p7707_p9, %p7706_p8 }
  0x76   :  { %p7709_p11 = pnand %p7708_p10, %p7702_p7 }
  0x78   :  { %7712 = shalt.err (!%p7709_p11)
}
  0x79   :  { %s9255_s12 = smov 8   ;;  %s9256_s3 = smov 128  }
  0x7a   :  { %172 = dma.hbm_to_vmem [thread:$0]  %s9214_s16, 768, %s167_s5, [#allocation17], %s9256_s3, %s9256_s3, %s9255_s12  }
  0x7b   :  { %s7982_s1 = smov [#allocation19]   ;;  %s7983_s8 = smov [#allocation22]  }
  0x7c   :  { %s194_s4 = sshll.u32 %s7982_s1, 4  ;;  %s219_s30 = sshll.u32 %s7983_s8, 4  ;;  %s195_s4 = int_to_ptr.vmem [resolvable:$true] %s194_s4  ;;  %s220_s30 = int_to_ptr.vmem [resolvable:$true] %s219_s30 }
  0x7d   :  { %s7713_s2 = scalar_lea.hbm %s9218_s20, 768 }
  0x7e   :  { %p7714_p12 = scmp.ne.s32.totalorder %s9218_s20, %s7713_s2  ;;  %p7717_p13 = scmp.lt.u32.totalorder %s7713_s2, %s9218_s20 }
  0x80   :  { %p7719_p0 = pnand %p7717_p13, %p7714_p12 }
  0x82   :  { %7722 = shalt.err (!%p7719_p0)
}
  0x83   :  { %s7723_s16 = scalar_lea.vmem %s195_s4, 768  ;;  %p7728_p2 = scmp.lt.s32.totalorder %s195_s4, %s195_s4 }
  0x84   :  { %p7724_p1 = scmp.ne.s32.totalorder %s195_s4, %s7723_s16  ;;  %p7729_p3 = scmp.lt.s32.totalorder %s7723_s16, %s7723_s16 }
  0x86   :  { %p7730_p4 = por %p7729_p3, %p7728_p2 }
  0x88   :  { %p7731_p5 = pnand %p7730_p4, %p7724_p1 }
  0x8a   :  { %7734 = shalt.err (!%p7731_p5)
}
  0x8b   :  { %200 = dma.hbm_to_vmem [thread:$0]  %s9218_s20, 768, %s195_s4, [#allocation20], %s9256_s3, %s9256_s3, %s9255_s12  }
  0x8c   :  { %s7735_s7 = scalar_lea.hbm %s9220_s22, 128 }
  0x8d   :  { %p7736_p6 = scmp.ne.s32.totalorder %s9220_s22, %s7735_s7  ;;  %p7739_p7 = scmp.lt.u32.totalorder %s7735_s7, %s9220_s22 }
  0x8f   :  { %p7741_p8 = pnand %p7739_p7, %p7736_p6 }
  0x91   :  { %7744 = shalt.err (!%p7741_p8)
}
  0x92   :  { %s7745_s2 = scalar_lea.vmem %s220_s30, 128  ;;  %p7750_p10 = scmp.lt.s32.totalorder %s220_s30, %s220_s30 }
  0x93   :  { %p7746_p9 = scmp.ne.s32.totalorder %s220_s30, %s7745_s2  ;;  %p7751_p11 = scmp.lt.s32.totalorder %s7745_s2, %s7745_s2 }
  0x95   :  { %p7752_p12 = por %p7751_p11, %p7750_p10 }
  0x97   :  { %p7753_p13 = pnand %p7752_p12, %p7746_p9 }
  0x99   :  { %7756 = shalt.err (!%p7753_p13)
}
  0x9a   :  { %222 = dma.hbm_to_vmem [thread:$0]  %s9220_s22, 128, %s220_s30, [#allocation23]  }
  0x9b   :  { %s7984_s27 = smov [#allocation2]   ;;  %s7985_s6 = smov [#allocation6]  }
  0x9c   :  { %s48_s24 = sshll.u32 %s7984_s27, 4  ;;  %s74_s0 = sshll.u32 %s7985_s6, 4  ;;  %s49_s24 = int_to_ptr.vmem [resolvable:$true] %s48_s24  ;;  %s75_s0 = int_to_ptr.vmem [resolvable:$true] %s74_s0 }
  0x9d   :  { %s9257_s10 = sld [smem:[#allocation37_spill]] }
  0xa3   :  { %s7757_s29 = scalar_lea.hbm %s9257_s10, 12288 }
  0xa4   :  { %p7758_p0 = scmp.ne.s32.totalorder %s9257_s10, %s7757_s29  ;;  %p7761_p1 = scmp.lt.u32.totalorder %s7757_s29, %s9257_s10 }
  0xa6   :  { %p7763_p2 = pnand %p7761_p1, %p7758_p0 }
  0xa8   :  { %7766 = shalt.err (!%p7763_p2)
}
  0xa9   :  { %s7767_s22 = scalar_lea.vmem %s49_s24, 12288  ;;  %p7772_p4 = scmp.lt.s32.totalorder %s49_s24, %s49_s24 }
  0xaa   :  { %p7768_p3 = scmp.ne.s32.totalorder %s49_s24, %s7767_s22  ;;  %p7773_p5 = scmp.lt.s32.totalorder %s7767_s22, %s7767_s22 }
  0xac   :  { %p7774_p6 = por %p7773_p5, %p7772_p4 }
  0xae   :  { %p7775_p7 = pnand %p7774_p6, %p7768_p3 }
  0xb0   :  { %7778 = shalt.err (!%p7775_p7)
}
  0xb1   :  { %54 = dma.hbm_to_vmem [thread:$0]  %s9257_s10, 12288, %s49_s24, [#allocation3], %s9256_s3, %s9256_s3, %s9255_s12  }
  0xb2   :  { %s9258_s20 = sld [smem:[#allocation41_spill]] }
  0xb8   :  { %s7779_s4 = scalar_lea.hbm %s9258_s20, 73728 }
  0xb9   :  { %p7780_p8 = scmp.ne.s32.totalorder %s9258_s20, %s7779_s4  ;;  %p7783_p9 = scmp.lt.u32.totalorder %s7779_s4, %s9258_s20 }
  0xbb   :  { %p7785_p10 = pnand %p7783_p9, %p7780_p8 }
  0xbd   :  { %7788 = shalt.err (!%p7785_p10)
}
  0xbe   :  { %s7789_s29 = scalar_lea.vmem %s75_s0, 73728  ;;  %p7794_p12 = scmp.lt.s32.totalorder %s75_s0, %s75_s0 }
  0xbf   :  { %p7790_p11 = scmp.ne.s32.totalorder %s75_s0, %s7789_s29  ;;  %p7795_p13 = scmp.lt.s32.totalorder %s7789_s29, %s7789_s29 }
  0xc1   :  { %p7796_p0 = por %p7795_p13, %p7794_p12 }
  0xc3   :  { %p7797_p1 = pnand %p7796_p0, %p7790_p11 }
  0xc5   :  { %7800 = shalt.err (!%p7797_p1)
}
  0xc6   :  { %s7986_s24 = smov 768   ;;  %s7987_s10 = smov 48  }
  0xc7   :  { %80 = dma.hbm_to_vmem [thread:$0]  %s9258_s20, 73728, %s75_s0, [#allocation5], %s7986_s24, %s7986_s24, %s7987_s10  }
  0xc8   :  { %s7988_s1 = smov [#allocation9]   ;;  %s7989_s22 = smov [#allocation12]  }
  0xc9   :  { %s98_s8 = sshll.u32 %s7988_s1, 4  ;;  %s126_s30 = sshll.u32 %s7989_s22, 4  ;;  %s99_s8 = int_to_ptr.vmem [resolvable:$true] %s98_s8  ;;  %s127_s30 = int_to_ptr.vmem [resolvable:$true] %s126_s30 }
  0xca   :  { %s9259_s2 = sld [smem:[#allocation43_spill]] }
  0xd0   :  { %s7801_s4 = scalar_lea.hbm %s9259_s2, 1536 }
  0xd1   :  { %p7802_p2 = scmp.ne.s32.totalorder %s9259_s2, %s7801_s4  ;;  %p7805_p3 = scmp.lt.u32.totalorder %s7801_s4, %s9259_s2 }
  0xd3   :  { %p7807_p4 = pnand %p7805_p3, %p7802_p2 }
  0xd5   :  { %7810 = shalt.err (!%p7807_p4)
}
  0xd6   :  { %s7811_s0 = scalar_lea.vmem %s99_s8, 1536  ;;  %p7816_p6 = scmp.lt.s32.totalorder %s99_s8, %s99_s8 }
  0xd7   :  { %p7812_p5 = scmp.ne.s32.totalorder %s99_s8, %s7811_s0  ;;  %p7817_p7 = scmp.lt.s32.totalorder %s7811_s0, %s7811_s0 }
  0xd9   :  { %p7818_p8 = por %p7817_p7, %p7816_p6 }
  0xdb   :  { %p7819_p9 = pnand %p7818_p8, %p7812_p5 }
  0xdd   :  { %7822 = shalt.err (!%p7819_p9)
}
  0xde   :  { %104 = dma.hbm_to_vmem [thread:$0]  %s9259_s2, 1536, %s99_s8, [#allocation8], %s7986_s24, %s7986_s24, %s7987_s10  }
  0xdf   :  { %s9260_s1 = sld [smem:[#allocation47_spill]] }
  0xe5   :  { %s7823_s22 = scalar_lea.hbm %s9260_s1, 3072 }
  0xe6   :  { %p7824_p10 = scmp.ne.s32.totalorder %s9260_s1, %s7823_s22  ;;  %p7827_p11 = scmp.lt.u32.totalorder %s7823_s22, %s9260_s1 }
  0xe8   :  { %p7829_p12 = pnand %p7827_p11, %p7824_p10 }
  0xea   :  { %7832 = shalt.err (!%p7829_p12)
}
  0xeb   :  { %s7833_s6 = scalar_lea.vmem %s127_s30, 3072  ;;  %p7838_p0 = scmp.lt.s32.totalorder %s127_s30, %s127_s30 }
  0xec   :  { %p7834_p13 = scmp.ne.s32.totalorder %s127_s30, %s7833_s6  ;;  %p7839_p1 = scmp.lt.s32.totalorder %s7833_s6, %s7833_s6 }
  0xee   :  { %p7840_p2 = por %p7839_p1, %p7838_p0 }
  0xf0   :  { %p7841_p3 = pnand %p7840_p2, %p7834_p13 }
  0xf2   :  { %7844 = shalt.err (!%p7841_p3)
}
  0xf3   :  { %132 = dma.hbm_to_vmem [thread:$0]  %s9260_s1, 3072, %s127_s30, [#allocation11], %s9256_s3, %s9256_s3, %s9255_s12  }
  0xf4   :  { %s7990_s8 = smov [#allocation15]   ;;  %s7991_s16 = smov [#allocation18]  }
  0xf5   :  { %s154_s2 = sshll.u32 %s7990_s8, 4  ;;  %s178_s5 = sshll.u32 %s7991_s16, 4  ;;  %s155_s2 = int_to_ptr.vmem [resolvable:$true] %s154_s2  ;;  %s179_s5 = int_to_ptr.vmem [resolvable:$true] %s178_s5 }
  0xf6   :  { %s7845_s29 = scalar_lea.hbm %s9213_s15, 3072 }
  0xf7   :  { %p7846_p4 = scmp.ne.s32.totalorder %s9213_s15, %s7845_s29  ;;  %p7849_p5 = scmp.lt.u32.totalorder %s7845_s29, %s9213_s15 }
  0xf9   :  { %p7851_p6 = pnand %p7849_p5, %p7846_p4 }
  0xfb   :  { %7854 = shalt.err (!%p7851_p6)
}
  0xfc   :  { %s7855_s30 = scalar_lea.vmem %s155_s2, 3072  ;;  %p7860_p8 = scmp.lt.s32.totalorder %s155_s2, %s155_s2 }
  0xfd   :  { %p7856_p7 = scmp.ne.s32.totalorder %s155_s2, %s7855_s30  ;;  %p7861_p9 = scmp.lt.s32.totalorder %s7855_s30, %s7855_s30 }
  0xff   :  { %p7862_p10 = por %p7861_p9, %p7860_p8 }
 0x101   :  { %p7863_p11 = pnand %p7862_p10, %p7856_p7 }
 0x103   :  { %7866 = shalt.err (!%p7863_p11)
}
 0x104   :  { %160 = dma.hbm_to_vmem [thread:$0]  %s9213_s15, 3072, %s155_s2, [#allocation14], %s9256_s3, %s9256_s3, %s9255_s12  }
 0x105   :  { %s7867_s6 = scalar_lea.hbm %s9215_s17, 256 }
 0x106   :  { %p7868_p12 = scmp.ne.s32.totalorder %s9215_s17, %s7867_s6  ;;  %p7871_p13 = scmp.lt.u32.totalorder %s7867_s6, %s9215_s17 }
 0x108   :  { %p7873_p0 = pnand %p7871_p13, %p7868_p12 }
 0x10a   :  { %7876 = shalt.err (!%p7873_p0)
}
 0x10b   :  { %s7877_s0 = scalar_lea.vmem %s179_s5, 256  ;;  %p7882_p2 = scmp.lt.s32.totalorder %s179_s5, %s179_s5 }
 0x10c   :  { %p7878_p1 = scmp.ne.s32.totalorder %s179_s5, %s7877_s0  ;;  %p7883_p3 = scmp.lt.s32.totalorder %s7877_s0, %s7877_s0 }
 0x10e   :  { %p7884_p4 = por %p7883_p3, %p7882_p2 }
 0x110   :  { %p7885_p5 = pnand %p7884_p4, %p7878_p1 }
 0x112   :  { %7888 = shalt.err (!%p7885_p5)
}
 0x113   :  { %184 = dma.hbm_to_vmem [thread:$0]  %s9215_s17, 256, %s179_s5, [#allocation17], %s9256_s3, %s9256_s3, %s9255_s12  }
 0x114   :  { %s7992_s20 = smov [#allocation21]   ;;  %s7993_s28 = smov [#allocation24]  }
 0x115   :  { %s206_s29 = sshll.u32 %s7992_s20, 4  ;;  %s232_s7 = sshll.u32 %s7993_s28, 4  ;;  %s207_s29 = int_to_ptr.vmem [resolvable:$true] %s206_s29  ;;  %s233_s7 = int_to_ptr.vmem [resolvable:$true] %s232_s7 }
 0x116   :  { %s7889_s30 = scalar_lea.hbm %s9219_s21, 384 }
 0x117   :  { %p7890_p6 = scmp.ne.s32.totalorder %s9219_s21, %s7889_s30  ;;  %p7893_p7 = scmp.lt.u32.totalorder %s7889_s30, %s9219_s21 }
 0x119   :  { %p7895_p8 = pnand %p7893_p7, %p7890_p6 }
 0x11b   :  { %7898 = shalt.err (!%p7895_p8)
}
 0x11c   :  { %s7899_s17 = scalar_lea.vmem %s207_s29, 384  ;;  %p7904_p10 = scmp.lt.s32.totalorder %s207_s29, %s207_s29 }
 0x11d   :  { %p7900_p9 = scmp.ne.s32.totalorder %s207_s29, %s7899_s17  ;;  %p7905_p11 = scmp.lt.s32.totalorder %s7899_s17, %s7899_s17 }
 0x11f   :  { %p7906_p12 = por %p7905_p11, %p7904_p10 }
 0x121   :  { %p7907_p13 = pnand %p7906_p12, %p7900_p9 }
 0x123   :  { %7910 = shalt.err (!%p7907_p13)
}
 0x124   :  { %212 = dma.hbm_to_vmem [thread:$0]  %s9219_s21, 384, %s207_s29, [#allocation20], %s9256_s3, %s9256_s3, %s9255_s12  }
 0x125   :  { %s7911_s8 = scalar_lea.hbm %s9223_s25, 384 }
 0x126   :  { %p7912_p0 = scmp.ne.s32.totalorder %s9223_s25, %s7911_s8  ;;  %p7915_p1 = scmp.lt.u32.totalorder %s7911_s8, %s9223_s25 }
 0x128   :  { %p7917_p2 = pnand %p7915_p1, %p7912_p0 }
 0x12a   :  { %7920 = shalt.err (!%p7917_p2)
}
 0x12b   :  { %s7921_s20 = scalar_lea.vmem %s233_s7, 384  ;;  %p7926_p4 = scmp.lt.s32.totalorder %s233_s7, %s233_s7 }
 0x12c   :  { %p7922_p3 = scmp.ne.s32.totalorder %s233_s7, %s7921_s20  ;;  %p7927_p5 = scmp.lt.s32.totalorder %s7921_s20, %s7921_s20 }
 0x12e   :  { %p7928_p6 = por %p7927_p5, %p7926_p4 }
 0x130   :  { %p7929_p7 = pnand %p7928_p6, %p7922_p3 }
 0x132   :  { %7932 = shalt.err (!%p7929_p7)
}
 0x133   :  { %238 = dma.hbm_to_vmem [thread:$0]  %s9223_s25, 384, %s233_s7, [#allocation23], %s9256_s3, %s9256_s3, %s9255_s12  }
 0x134   :  { %s7994_s28 = smov [#allocation25]   ;;  %s7933_s1 = scalar_lea.hbm %s9224_s26, 16 }
 0x135   :  { %s245_s22 = sshll.u32 %s7994_s28, 4  ;;  %p7934_p8 = scmp.ne.s32.totalorder %s9224_s26, %s7933_s1  ;;  %s246_s22 = int_to_ptr.vmem [resolvable:$true] %s245_s22 }
 0x136   :  { %p7937_p9 = scmp.lt.u32.totalorder %s7933_s1, %s9224_s26 }
 0x138   :  { %p7939_p10 = pnand %p7937_p9, %p7934_p8 }
 0x13a   :  { %7942 = shalt.err (!%p7939_p10)
}
 0x13b   :  { %s7943_s5 = scalar_lea.vmem %s246_s22, 16  ;;  %s7947_s25 = scalar_lea.vmem %s246_s22, 32 }
 0x13c   :  { %p7944_p11 = scmp.ne.s32.totalorder %s246_s22, %s7943_s5  ;;  %p7948_p12 = scmp.lt.s32.totalorder %s246_s22, %s246_s22 }
 0x13d   :  { %p7949_p13 = scmp.lt.s32.totalorder %s7947_s25, %s7943_s5 }
 0x13f   :  { %p7950_p0 = por %p7949_p13, %p7948_p12 }
 0x141   :  { %p7951_p1 = pnand %p7950_p0, %p7944_p11 }
 0x143   :  { %7954 = shalt.err (!%p7951_p1)
}
 0x144   :  { %248 = dma.hbm_to_vmem [thread:$0]  %s9224_s26, 16, %s246_s22, [#allocation26]  }
 0x145   :  { %7955 = dma.done.wait [#allocation3], 12288  }
 0x146   :  { %7956 = vsyncadd [#allocation3], 4294955008 }
 0x147   :  { %7957 = dma.done.wait [#allocation5], 74112  }
 0x148   :  { %7958 = vsyncadd [#allocation5], 4294893184 }
 0x149   :  { %7959 = dma.done.wait [#allocation8], 13824  }
 0x14a   :  { %7960 = vsyncadd [#allocation8], 4294953472 }
 0x14b   :  { %7961 = dma.done.wait [#allocation11], 27648  }
 0x14c   :  { %7962 = vsyncadd [#allocation11], 4294939648 }
 0x14d   :  { %7963 = dma.done.wait [#allocation14], 3584  }
 0x14e   :  { %7964 = vsyncadd [#allocation14], 4294963712 }
 0x14f   :  { %7965 = dma.done.wait [#allocation17], 1024  }
 0x150   :  { %7966 = vsyncadd [#allocation17], 4294966272 }
 0x151   :  { %7967 = dma.done.wait [#allocation20], 1152  }
 0x152   :  { %7968 = vsyncadd [#allocation20], 4294966144 }
 0x153   :  { %7969 = dma.done.wait [#allocation23], 512  }
 0x154   :  { %7970 = vsyncadd [#allocation23], 4294966784 }
 0x155   :  { %7971 = dma.done.wait [#allocation26], 16  }
 0x156   :  { %7972 = vsyncadd [#allocation26], 4294967280  ;;  %v315_v0 = vld [vmem:[#allocation2 + $0x80] sm:$0xff]  ;;  %v316_v1 = vld [vmem:[#allocation2 + $0x88] sm:$0xff]  ;;  %v7995_v47 = vmov 1983009808   ;;  %v401_v49 = vlaneseq }
 0x157   :  { %v347_v2 = vld [vmem:[#allocation2 + $0x180] sm:$0xff]  ;;  %v8359_v3 = vpack.c.bf16 %v316_v1, %v315_v0  ;;  %v348_v4 = vld [vmem:[#allocation2 + $0x188] sm:$0xff]  ;;  %v317_v11 = vld [vmem:[#allocation2 + $0x90] sm:$0xff]  ;;  %v399_v48 = vunpack.c.l.s4 %v7995_v47  ;;  %s9261_s6 = sld [smem:[#allocation36_spill]]  ;;  %vm923_vm0 = vcmask 1042432   ;;  %vm883_vm1 = vcmask 17408  }
 0x158   :  { %v299_v5 = vld [vmem:[#allocation2] sm:$0xff]  ;;  %v300_v6 = vld [vmem:[#allocation2 + $0x8] sm:$0xff]  ;;  %v8361_v7 = vpack.c.bf16 %v348_v4, %v347_v2  ;;  %v318_v13 = vld [vmem:[#allocation2 + $0x98] sm:$0xff]  ;;  %v8409_v0 = vshrl.u32 %v401_v49, 7  ;;  %s9262_s0 = sld [smem:[#allocation39_spill]]  ;;  %vm919_vm2 = vcmask 23552  }
 0x159   :  { %v8363_v8 = vpack.c.bf16 %v300_v6, %v299_v5  ;;  %v331_v9 = vld [vmem:[#allocation2 + $0x100] sm:$0xff]  ;;  %v332_v10 = vld [vmem:[#allocation2 + $0x108] sm:$0xff]  ;;  %6192 = vmatprep.subr.bf16.mxu0 %v8359_v3  ;;  %v349_v14 = vld [vmem:[#allocation2 + $0x190] sm:$0xff]  ;;  %v8370_v16 = vpack.c.bf16 %v318_v13, %v317_v11  ;;  %v400_v63 = vunpack.c.0.s8 %v399_v48  ;;  %s9263_s20 = sld [smem:[#allocation40_spill]]  ;;  %vm3296_vm3 = vcmask 1043456   ;;  %s9266_s11 = sld [smem:[#allocation44_spill]] }
 0x15a   :  { %v8366_v12 = vpack.c.bf16 %v332_v10, %v331_v9  ;;  %v350_v15 = vld [vmem:[#allocation2 + $0x198] sm:$0xff]  ;;  %6224 = vmatprep.subr.bf16.mxu1 %v8361_v7  ;;  %v301_v18 = vld [vmem:[#allocation2 + $0x10] sm:$0xff]  ;;  %v319_v23 = vld [vmem:[#allocation2 + $0xa0] sm:$0xff]  ;;  %vm7997_vm4 = vmmov 1   ;;  %vm3253_vm6 = vcmask 91136   ;;  %vm3292_vm7 = vcmask 97280  }
 0x15b   :  { %6194 = vmatpush3.bf16.msra.mxu0 %v8363_v8  ;;  %v8372_v17 = vpack.c.bf16 %v350_v15, %v349_v14  ;;  %v302_v19 = vld [vmem:[#allocation2 + $0x18] sm:$0xff]  ;;  %v333_v20 = vld [vmem:[#allocation2 + $0x110] sm:$0xff]  ;;  %v320_v24 = vld [vmem:[#allocation2 + $0xa8] sm:$0xff]  ;;  %s9267_s9 = sld [smem:[#allocation45_spill]]  ;;  %vm4251_vm14 = vcmask 523264   ;;  %s9268_s7 = sld [smem:[#allocation48_spill]] }
 0x15c   :  { %6226 = vmatpush3.bf16.msra.mxu1 %v8366_v12  ;;  %v8375_v21 = vpack.c.bf16 %v302_v19, %v301_v18  ;;  %v334_v22 = vld [vmem:[#allocation2 + $0x118] sm:$0xff]  ;;  %6196 = vmatprep.subr.bf16.mxu0 %v8370_v16  ;;  %v8381_v26 = vpack.c.bf16 %v320_v24, %v319_v23  ;;  %v351_v27 = vld [vmem:[#allocation2 + $0x1a0] sm:$0xff]  ;;  %v352_v28 = vld [vmem:[#allocation2 + $0x1a8] sm:$0xff]  ;;  %v8424_v19 = vsub.s32 %v400_v63, %v8409_v0  ;;  %s9269_s24 = sld [smem:[#allocation49_spill]] }
 0x15d   :  { %6228 = vmatprep.subr.bf16.mxu1 %v8372_v17  ;;  %v8379_v25 = vpack.c.bf16 %v334_v22, %v333_v20  ;;  %v303_v29 = vld [vmem:[#allocation2 + $0x20] sm:$0xff]  ;;  %v8383_v30 = vpack.c.bf16 %v352_v28, %v351_v27  ;;  %v304_v31 = vld [vmem:[#allocation2 + $0x28] sm:$0xff]  ;;  %v321_v35 = vld [vmem:[#allocation2 + $0xb0] sm:$0xff] }
 0x15e   :  { %v335_v32 = vld [vmem:[#allocation2 + $0x120] sm:$0xff]  ;;  %v336_v33 = vld [vmem:[#allocation2 + $0x128] sm:$0xff]  ;;  %v8386_v34 = vpack.c.bf16 %v304_v31, %v303_v29  ;;  %v322_v36 = vld [vmem:[#allocation2 + $0xb8] sm:$0xff] }
 0x15f   :  { %6198 = vmatpush3.bf16.msra.mxu0 %v8375_v21  ;;  %v353_v37 = vld [vmem:[#allocation2 + $0x1b0] sm:$0xff]  ;;  %v8390_v38 = vpack.c.bf16 %v336_v33, %v335_v32  ;;  %v8392_v39 = vpack.c.bf16 %v322_v36, %v321_v35  ;;  %v354_v40 = vld [vmem:[#allocation2 + $0x1b8] sm:$0xff]  ;;  %v323_v46 = vld [vmem:[#allocation2 + $0xc0] sm:$0xff] }
 0x160   :  { %6230 = vmatpush3.bf16.msra.mxu1 %v8379_v25  ;;  %6200 = vmatprep.subr.bf16.mxu0 %v8381_v26  ;;  %v305_v41 = vld [vmem:[#allocation2 + $0x30] sm:$0xff]  ;;  %v306_v42 = vld [vmem:[#allocation2 + $0x38] sm:$0xff]  ;;  %v8395_v43 = vpack.c.bf16 %v354_v40, %v353_v37  ;;  %v324_v50 = vld [vmem:[#allocation2 + $0xc8] sm:$0xff] }
 0x161   :  { %6232 = vmatprep.subr.bf16.mxu1 %v8383_v30  ;;  %v337_v44 = vld [vmem:[#allocation2 + $0x130] sm:$0xff]  ;;  %v338_v45 = vld [vmem:[#allocation2 + $0x138] sm:$0xff]  ;;  %v355_v51 = vld [vmem:[#allocation2 + $0x1c0] sm:$0xff]  ;;  %v8398_v53 = vpack.c.bf16 %v306_v42, %v305_v41  ;;  %v8404_v55 = vpack.c.bf16 %v324_v50, %v323_v46 }
 0x162   :  { %v356_v52 = vld [vmem:[#allocation2 + $0x1c8] sm:$0xff]  ;;  %v8402_v54 = vpack.c.bf16 %v338_v45, %v337_v44  ;;  %v307_v56 = vld [vmem:[#allocation2 + $0x40] sm:$0xff]  ;;  %v325_v61 = vld [vmem:[#allocation2 + $0xd0] sm:$0xff] }
 0x163   :  { %6202 = vmatpush3.bf16.msra.mxu0 %v8386_v34  ;;  %v308_v57 = vld [vmem:[#allocation2 + $0x48] sm:$0xff]  ;;  %v339_v58 = vld [vmem:[#allocation2 + $0x140] sm:$0xff]  ;;  %v8407_v59 = vpack.c.bf16 %v356_v52, %v355_v51  ;;  %v326_v62 = vld [vmem:[#allocation2 + $0xd8] sm:$0xff] }
 0x164   :  { %6234 = vmatpush3.bf16.msra.mxu1 %v8390_v38  ;;  %6204 = vmatprep.subr.bf16.mxu0 %v8392_v39  ;;  %v340_v60 = vld [vmem:[#allocation2 + $0x148] sm:$0xff]  ;;  %v357_v1 = vld [vmem:[#allocation2 + $0x1d0] sm:$0xff]  ;;  %v358_v2 = vld [vmem:[#allocation2 + $0x1d8] sm:$0xff]  ;;  %v8412_v4 = vpack.c.bf16 %v308_v57, %v307_v56  ;;  %v8418_v6 = vpack.c.bf16 %v326_v62, %v325_v61 }
 0x165   :  { %6236 = vmatprep.subr.bf16.mxu1 %v8395_v43  ;;  %v8416_v5 = vpack.c.bf16 %v340_v60, %v339_v58  ;;  %v309_v9 = vld [vmem:[#allocation2 + $0x50] sm:$0xff]  ;;  %v310_v10 = vld [vmem:[#allocation2 + $0x58] sm:$0xff]  ;;  %v8421_v13 = vpack.c.bf16 %v358_v2, %v357_v1  ;;  %v327_v15 = vld [vmem:[#allocation2 + $0xe0] sm:$0xff] }
 0x166   :  { %v341_v11 = vld [vmem:[#allocation2 + $0x150] sm:$0xff]  ;;  %v342_v14 = vld [vmem:[#allocation2 + $0x158] sm:$0xff]  ;;  %v328_v18 = vld [vmem:[#allocation2 + $0xe8] sm:$0xff]  ;;  %v8427_v23 = vpack.c.bf16 %v310_v10, %v309_v9 }
 0x167   :  { %6206 = vmatpush3.bf16.msra.mxu0 %v8398_v53  ;;  %v359_v20 = vld [vmem:[#allocation2 + $0x1e0] sm:$0xff]  ;;  %v360_v22 = vld [vmem:[#allocation2 + $0x1e8] sm:$0xff]  ;;  %v8431_v27 = vpack.c.bf16 %v342_v14, %v341_v11  ;;  %v8433_v28 = vpack.c.bf16 %v328_v18, %v327_v15  ;;  %v329_v36 = vld [vmem:[#allocation2 + $0xf0] sm:$0xff] }
 0x168   :  { %6238 = vmatpush3.bf16.msra.mxu1 %v8402_v54  ;;  %6208 = vmatprep.subr.bf16.mxu0 %v8404_v55  ;;  %v311_v24 = vld [vmem:[#allocation2 + $0x60] sm:$0xff]  ;;  %v312_v29 = vld [vmem:[#allocation2 + $0x68] sm:$0xff]  ;;  %v8439_v33 = vpack.c.bf16 %v360_v22, %v359_v20  ;;  %v330_v37 = vld [vmem:[#allocation2 + $0xf8] sm:$0xff] }
 0x169   :  { %6240 = vmatprep.subr.bf16.mxu1 %v8407_v59  ;;  %v343_v31 = vld [vmem:[#allocation2 + $0x160] sm:$0xff]  ;;  %v344_v35 = vld [vmem:[#allocation2 + $0x168] sm:$0xff]  ;;  %v361_v42 = vld [vmem:[#allocation2 + $0x1f0] sm:$0xff]  ;;  %v8443_v45 = vpack.c.bf16 %v312_v29, %v311_v24  ;;  %v8450_v49 = vpack.c.bf16 %v330_v37, %v329_v36 }
 0x16a   :  { %v297_v32 = vld [vmem:[%s9261_s6] sm:$0xff]  ;;  %v362_v44 = vld [vmem:[#allocation2 + $0x1f8] sm:$0xff]  ;;  %v8448_v48 = vpack.c.bf16 %v344_v35, %v343_v31  ;;  %v313_v50 = vld [vmem:[#allocation2 + $0x70] sm:$0xff] }
 0x16b   :  { %6210 = vmatpush3.bf16.msra.mxu0 %v8412_v4  ;;  %v404_v40 = vrot.slane %v297_v32, %v8424_v19  ;;  %v397_v41 = vcombine.high %v297_v32, %v297_v32  ;;  %v314_v51 = vld [vmem:[#allocation2 + $0x78] sm:$0xff]  ;;  %v345_v52 = vld [vmem:[#allocation2 + $0x170] sm:$0xff]  ;;  %v8453_v56 = vpack.c.bf16 %v362_v44, %v361_v42  ;;  %v379_v60 = vld [vmem:[#allocation2 + $0x280] sm:$0xff]  ;;  %v8455_v62 = vmul.f32 %v297_v32, %v297_v32 }
 0x16c   :  { %6242 = vmatpush3.bf16.msra.mxu1 %v8416_v5  ;;  %6212 = vmatprep.subr.bf16.mxu0 %v8418_v6  ;;  %v346_v57 = vld [vmem:[#allocation2 + $0x178] sm:$0xff]  ;;  %v380_v61 = vld [vmem:[#allocation2 + $0x288] sm:$0xff]  ;;  %v8458_v63 = vpack.c.bf16 %v314_v51, %v313_v50  ;;  %v363_v9 = vld [vmem:[#allocation2 + $0x200] sm:$0xff] }
 0x16d   :  { %6244 = vmatprep.subr.bf16.mxu1 %v8421_v13  ;;  %v412_v46 = vcombine.high %v404_v40, %v404_v40  ;;  %v411_v47 = vrot.slane %v397_v41, %v8424_v19  ;;  %v8462_v1 = vpack.c.bf16 %v346_v57, %v345_v52  ;;  %v8464_v2 = vpack.c.bf16 %v380_v61, %v379_v60  ;;  %v364_v10 = vld [vmem:[#allocation2 + $0x208] sm:$0xff]  ;;  %v381_v11 = vld [vmem:[#allocation2 + $0x290] sm:$0xff]  ;;  %v382_v14 = vld [vmem:[#allocation2 + $0x298] sm:$0xff] }
 0x16e   :  { %v8469_v15 = vrot.slane %v8455_v62, %v8424_v19  ;;  %v8472_v18 = vpack.c.bf16 %v364_v10, %v363_v9  ;;  %v8477_v20 = vld [vmem:[%s9261_s6 + $0x8] sm:$0xf]  ;;  %v8481_v22 = vpack.c.bf16 %v382_v14, %v381_v11  ;;  %v365_v24 = vld [vmem:[#allocation2 + $0x210] sm:$0xff]  ;;  %v366_v29 = vld [vmem:[#allocation2 + $0x218] sm:$0xff] }
 0x16f   :  { %6214 = vmatpush3.bf16.msra.mxu0 %v8427_v23  ;;  %492 = vmatprep.mubr.f32.mxu0 %v412_v46  ;;  %v413_v58 = vcombine.high %v411_v47, %v411_v47  ;;  %v8485_v31 = vrot.slane %v8477_v20, %v8424_v19  ;;  %v383_v32 = vld [vmem:[#allocation2 + $0x2a0] sm:$0xff]  ;;  %v384_v35 = vld [vmem:[#allocation2 + $0x2a8] sm:$0xff]  ;;  %v8493_v41 = vpack.c.bf16 %v366_v29, %v365_v24  ;;  %v386_v46 = vld [vmem:[#allocation2 + $0x2b8] sm:$0xff] }
 0x170   :  { %6246 = vmatpush3.bf16.msra.mxu1 %v8431_v27  ;;  %6216 = vmatprep.subr.bf16.mxu0 %v8433_v28  ;;  %v657_v37 = vcombine.high %v8469_v15, %v8469_v15  ;;  %v8497_v42 = vpack.c.bf16 %v384_v35, %v383_v32  ;;  %v368_v44 = vld [vmem:[#allocation2 + $0x228] sm:$0xff]  ;;  %v369_v50 = vld [vmem:[#allocation2 + $0x230] sm:$0xff]  ;;  %v370_v51 = vld [vmem:[#allocation2 + $0x238] sm:$0xff] }
 0x171   :  { %6248 = vmatprep.subr.bf16.mxu1 %v8439_v33  ;;  %562 = vmatprep.mubr.f32.mxu1 %v413_v58  ;;  %v421_v36 = vcombine.high %v8485_v31, %v8485_v31  ;;  %v387_v52 = vld [vmem:[#allocation2 + $0x2c0] sm:$0xff]  ;;  %v8509_v57 = vpack.c.bf16 %v370_v51, %v369_v50  ;;  %v372_v60 = vld [vmem:[#allocation2 + $0x248] sm:$0xff]  ;;  %v389_v61 = vld [vmem:[#allocation2 + $0x2d0] sm:$0xff] }
 0x172   :  { %v390_v9 = vld [vmem:[#allocation2 + $0x2d8] sm:$0xff]  ;;  %v373_v11 = vld [vmem:[#allocation2 + $0x250] sm:$0xff]  ;;  %v391_v14 = vld [vmem:[#allocation2 + $0x2e0] sm:$0xff] }
 0x173   :  { %6218 = vmatpush3.bf16.msra.mxu0 %v8443_v45  ;;  %v6275_v10 = vpack.c.bf16 %v390_v9, %v389_v61  ;;  %v392_v24 = vld [vmem:[#allocation2 + $0x2e8] sm:$0xff]  ;;  %v375_v32 = vld [vmem:[#allocation2 + $0x260] sm:$0xff]  ;;  %vm8907_vm5 = vmpackc.low %vm3296_vm3, %vm7997_vm4  ;;  %vm5133_vm4 = vcmask 195584  }
 0x174   :  { %6250 = vmatpush3.bf16.msra.mxu1 %v8448_v48  ;;  %6220 = vmatprep.subr.bf16.mxu0 %v8450_v49  ;;  %v376_v35 = vld [vmem:[#allocation2 + $0x268] sm:$0xff] }
 0x175   :  { %6252 = vmatprep.subr.bf16.mxu1 %v8453_v56 }
 0x177   :  { %6222 = vmatpush3.bf16.msra.mxu0 %v8458_v63 }
 0x178   :  { %6254 = vmatpush3.bf16.msra.mxu1 %v8462_v1  ;;  %6256 = vmatprep.subr.bf16.mxu0 %v8464_v2 }
 0x179   :  { %6288 = vmatprep.subr.bf16.mxu1 %v8359_v3  ;;  %v367_v3 = vld [vmem:[#allocation2 + $0x220] sm:$0xff] }
 0x17a   :  { %493 = vmatmul.mubr.f32.vlgmr.msra.gmra.mrb[0].mxu0 %v404_v40  ;;  %v385_v40 = vld [vmem:[#allocation2 + $0x2b0] sm:$0xff] }
 0x17b   :  { %563 = vmatmul.mubr.f32.vlgmr.msra.gmra.mrb[0].mxu1 %v411_v47  ;;  %6258 = vmatpush3.bf16.msra.mxu0 %v8472_v18  ;;  %v8501_v47 = vpack.c.bf16 %v368_v44, %v367_v3  ;;  %v377_v3 = vld [vmem:[#allocation2 + $0x270] sm:$0xff]  ;;  %v378_v44 = vld [vmem:[#allocation2 + $0x278] sm:$0xff] }
 0x17c   :  { %6290 = vmatpush3.bf16.msra.mxu1 %v8363_v8  ;;  %6260 = vmatprep.subr.bf16.mxu0 %v8481_v22  ;;  %v8505_v8 = vpack.c.bf16 %v386_v46, %v385_v40  ;;  %v639_v40 = vmul.f32 %v8477_v20, %v8477_v20 }
 0x17d   :  { %6292 = vmatprep.subr.bf16.mxu1 %v8370_v16  ;;  %632 = vmatprep.mubr.f32.mxu0 %v421_v36  ;;  %v388_v16 = vld [vmem:[#allocation2 + $0x2c8] sm:$0xff]  ;;  %v394_v36 = vld [vmem:[#allocation2 + $0x2f8] sm:$0xff] }
 0x17e   :  { %737 = vmatprep.mubr.f32.mxu1 %v657_v37  ;;  %v8513_v58 = vpack.c.bf16 %v388_v16, %v387_v52  ;;  %v6281_v37 = vpack.c.bf16 %v376_v35, %v375_v32  ;;  %v665_v46 = vrot.slane %v639_v40, %v8424_v19  ;;  %v1490_v40 = vld [vmem:[#allocation6 + $0x38] sm:$0xff] }
 0x17f   :  { %6262 = vmatpush3.bf16.msra.mxu0 %v8493_v41 }
 0x180   :  { %6294 = vmatpush3.bf16.msra.mxu1 %v8375_v21  ;;  %6264 = vmatprep.subr.bf16.mxu0 %v8497_v42  ;;  %v371_v21 = vld [vmem:[#allocation2 + $0x240] sm:$0xff] }
 0x181   :  { %6296 = vmatprep.subr.bf16.mxu1 %v8381_v26  ;;  %v6273_v26 = vpack.c.bf16 %v372_v60, %v371_v21 }
 0x183   :  { %6266 = vmatpush3.bf16.msra.mxu0 %v8501_v47 }
 0x184   :  { %6298 = vmatpush3.bf16.msra.mxu1 %v8386_v34  ;;  %6268 = vmatprep.subr.bf16.mxu0 %v8505_v8  ;;  %v374_v34 = vld [vmem:[#allocation2 + $0x258] sm:$0xff] }
 0x185   :  { %6300 = vmatprep.subr.bf16.mxu1 %v8392_v39  ;;  %v6277_v29 = vpack.c.bf16 %v374_v34, %v373_v11  ;;  %v6279_v39 = vpack.c.bf16 %v392_v24, %v391_v14 }
 0x187   :  { %6270 = vmatpush3.bf16.msra.mxu0 %v8509_v57 }
 0x188   :  { %6302 = vmatpush3.bf16.msra.mxu1 %v8398_v53  ;;  %6272 = vmatprep.subr.bf16.mxu0 %v8513_v58  ;;  %v393_v53 = vld [vmem:[#allocation2 + $0x2f0] sm:$0xff] }
 0x189   :  { %6304 = vmatprep.subr.bf16.mxu1 %v8404_v55  ;;  %v6283_v55 = vpack.c.bf16 %v394_v36, %v393_v53  ;;  %v903_v36 = vld [vmem:[%s9262_s0] sm:$0x1] }
 0x18b   :  { %6274 = vmatpush3.bf16.msra.mxu0 %v6273_v26 }
 0x18c   :  { %6306 = vmatpush3.bf16.msra.mxu1 %v8412_v4  ;;  %6276 = vmatprep.subr.bf16.mxu0 %v6275_v10  ;;  %v642_v4 = vcombine.high %v8455_v62, %v8455_v62  ;;  %v666_v62 = vcombine.high %v665_v46, %v665_v46 }
 0x18d   :  { %6308 = vmatprep.subr.bf16.mxu1 %v8418_v6  ;;  %v6285_v6 = vpack.c.bf16 %v378_v44, %v377_v3  ;;  %v907_v3 = vld [vmem:[%s9263_s20] sm:$0x1] }
 0x18e   :  { %v1484_v44 = vld [vmem:[#allocation6 + $0x8] sm:$0xff] }
 0x18f   :  { %6278 = vmatpush3.bf16.msra.mxu0 %v6277_v29 }
 0x190   :  { %6310 = vmatpush3.bf16.msra.mxu1 %v8427_v23  ;;  %6280 = vmatprep.subr.bf16.mxu0 %v6279_v39  ;;  %v656_v23 = vrot.slane %v642_v4, %v8424_v19 }
 0x191   :  { %6312 = vmatprep.subr.bf16.mxu1 %v8433_v28 }
 0x192   :  { %v658_v28 = vcombine.high %v656_v23, %v656_v23 }
 0x193   :  { %6282 = vmatpush3.bf16.msra.mxu0 %v6281_v37 }
 0x194   :  { %6314 = vmatpush3.bf16.msra.mxu1 %v8443_v45  ;;  %6284 = vmatprep.subr.bf16.mxu0 %v6283_v55 }
 0x195   :  { %6316 = vmatprep.subr.bf16.mxu1 %v8450_v49 }
 0x197   :  { %6286 = vmatpush3.bf16.msra.mxu0 %v6285_v6 }
 0x198   :  { %6318 = vmatpush3.bf16.msra.mxu1 %v8458_v63  ;;  %6320 = vmatprep.subr.bf16.mxu0 %v8361_v7  ;;  %v8560_v7 = vld [vmem:[#allocation4] sm:$0x77] }
 0x199   :  { %6352 = vmatprep.subr.bf16.mxu1 %v8464_v2 }
 0x19a   :  { %633 = vmatmul.mubr.f32.vlgmr.msra.gmra.mrb[2].mxu0 %v8485_v31 }
 0x19b   :  { %6322 = vmatpush3.bf16.msra.mxu0 %v8366_v12  ;;  %738 = vmatmul.mubr.f32.vlgmr.msra.gmra.mrb[2].mxu1 %v8469_v15  ;;  %v8562_v12 = vld [vmem:[#allocation4 + $0x8] sm:$0x77] }
 0x19c   :  { %6354 = vmatpush3.bf16.msra.mxu1 %v8472_v18  ;;  %6324 = vmatprep.subr.bf16.mxu0 %v8372_v17  ;;  %v916_v17 = vcombine.high %v8560_v7, %v8560_v7 }
 0x19d   :  { %6356 = vmatprep.subr.bf16.mxu1 %v8481_v22  ;;  %807 = vmatprep.mubr.f32.mxu0 %v658_v28  ;;  %v1489_v28 = vld [vmem:[#allocation6 + $0x30] sm:$0xff] }
 0x19e   :  { %877 = vmatprep.mubr.f32.mxu1 %v666_v62 }
 0x19f   :  { %6326 = vmatpush3.bf16.msra.mxu0 %v8379_v25  ;;  %v8568_v25 = vcombine.high %v8562_v12, %v8562_v12 }
 0x1a0   :  { %6358 = vmatpush3.bf16.msra.mxu1 %v8493_v41  ;;  %6328 = vmatprep.subr.bf16.mxu0 %v8383_v30  ;;  %v7996_v30 = vmov 0.0  }
 0x1a1   :  { %6360 = vmatprep.subr.bf16.mxu1 %v8497_v42 }
 0x1a3   :  { %6330 = vmatpush3.bf16.msra.mxu0 %v8390_v38  ;;  %v8572_v38 = vld [vmem:[#allocation4 + $0x10] sm:$0x77] }
 0x1a4   :  { %6362 = vmatpush3.bf16.msra.mxu1 %v8501_v47  ;;  %6332 = vmatprep.subr.bf16.mxu0 %v8395_v43  ;;  %v8576_v43 = vcombine.high %v8572_v38, %v8572_v38 }
 0x1a5   :  { %6364 = vmatprep.subr.bf16.mxu1 %v8505_v8 }
 0x1a7   :  { %6334 = vmatpush3.bf16.msra.mxu0 %v8402_v54 }
 0x1a8   :  { %6366 = vmatpush3.bf16.msra.mxu1 %v8509_v57  ;;  %6336 = vmatprep.subr.bf16.mxu0 %v8407_v59 }
 0x1a9   :  { %6368 = vmatprep.subr.bf16.mxu1 %v8513_v58 }
 0x1ab   :  { %6338 = vmatpush3.bf16.msra.mxu0 %v8416_v5 }
 0x1ac   :  { %6370 = vmatpush3.bf16.msra.mxu1 %v6273_v26  ;;  %6340 = vmatprep.subr.bf16.mxu0 %v8421_v13 }
 0x1ad   :  { %6372 = vmatprep.subr.bf16.mxu1 %v6275_v10 }
 0x1af   :  { %6342 = vmatpush3.bf16.msra.mxu0 %v8431_v27 }
 0x1b0   :  { %6374 = vmatpush3.bf16.msra.mxu1 %v6277_v29  ;;  %6344 = vmatprep.subr.bf16.mxu0 %v8439_v33 }
 0x1b1   :  { %6376 = vmatprep.subr.bf16.mxu1 %v6279_v39 }
 0x1b3   :  { %6346 = vmatpush3.bf16.msra.mxu0 %v8448_v48 }
 0x1b4   :  { %6378 = vmatpush3.bf16.msra.mxu1 %v6281_v37  ;;  %6348 = vmatprep.subr.bf16.mxu0 %v8453_v56 }
 0x1b5   :  { %6380 = vmatprep.subr.bf16.mxu1 %v6283_v55 }
 0x1b7   :  { %6350 = vmatpush3.bf16.msra.mxu0 %v8462_v1 }
 0x1b8   :  { %6382 = vmatpush3.bf16.msra.mxu1 %v6285_v6  ;;  %5572 = vmatprep.subr.msk.mxu0 %vm923_vm0, %v916_v17  ;;  %v1486_v6 = vld [vmem:[#allocation6 + $0x18] sm:$0xff] }
 0x1b9   :  { %5575 = vmatprep.subr.msk.mxu1 %vm923_vm0, %v8568_v25 }
 0x1ba   :  { %808 = vmatmul.mubr.f32.vlgmr.msra.gmra.mrb[4].mxu0 %v656_v23  ;;  %v1492_v23 = vld [vmem:[#allocation6 + $0x48] sm:$0xff] }
 0x1bb   :  { %878 = vmatmul.mubr.f32.vlgmr.msra.gmra.mrb[4].mxu1 %v665_v46  ;;  %1000 = vmatprep.mubr.f32.mxu0 %v7996_v30  ;;  %v1483_v46 = vld [vmem:[#allocation6] sm:$0xff] }
 0x1bc   :  { %1071 = vmatprep.mubr.f32.mxu1 %v7996_v30  ;;  %5573 = vmatpush1.msk.msra.mxu0 %vm923_vm0, %v8560_v7 }
 0x1bd   :  { %5576 = vmatpush1.msk.msra.mxu1 %vm923_vm0, %v8562_v12  ;;  %5578 = vmatprep.subr.msk.mxu0 %vm923_vm0, %v8576_v43 }
 0x1be   :  { %5581 = vmatprep.subr.msk.mxu1 %vm923_vm0, %v916_v17  ;;  %v1485_v17 = vld [vmem:[#allocation6 + $0x10] sm:$0xff] }
 0x24d   :  { %v5664_v54 = vpop.f32.mrb[0].mxu0 }
 0x24e   :  { %v5699_v59 = vpop.f32.mrb[0].mxu1  ;;  %v5665_v5 = vpop.f32.mrb[1].mxu0 }
 0x24f   :  { %v5666_v13 = vadd.f32 %v5665_v5, %v5664_v54  ;;  %v5700_v27 = vpop.f32.mrb[1].mxu1  ;;  %v1491_v54 = vld [vmem:[#allocation6 + $0x40] sm:$0xff]  ;;  %v6383_v5 = vpack.c.bf16 %v1490_v40, %v1484_v44  ;;  %v1544_v44 = vld [vmem:[#allocation6 + $0x1e8] sm:$0xff]  ;;  %v1546_v40 = vld [vmem:[#allocation6 + $0x1f8] sm:$0xff] }
 0x250   :  { %v5701_v33 = vadd.f32 %v5700_v27, %v5699_v59  ;;  %v1496_v59 = vld [vmem:[#allocation6 + $0x68] sm:$0xff]  ;;  %v1502_v27 = vld [vmem:[#allocation6 + $0x98] sm:$0xff] }
 0x252   :  { %v565_v45 = vadd.f32 %v5701_v33, %v5666_v13  ;;  %v6575_v13 = vpack.c.bf16 %v1492_v23, %v1486_v6  ;;  %v1498_v33 = vld [vmem:[#allocation6 + $0x78] sm:$0xff]  ;;  %v1552_v6 = vld [vmem:[#allocation6 + $0x228] sm:$0xff] }
 0x26d   :  { %v5734_v48 = vpop.f32.mrb[2].mxu0 }
 0x26e   :  { %v5735_v49 = vpop.f32.mrb[3].mxu0  ;;  %v5769_v56 = vpop.f32.mrb[2].mxu1 }
 0x26f   :  { %v5736_v63 = vadd.f32 %v5735_v49, %v5734_v48  ;;  %v5770_v1 = vpop.f32.mrb[3].mxu1  ;;  %v6577_v48 = vpack.c.bf16 %v1491_v54, %v1485_v17  ;;  %v1501_v49 = vld [vmem:[#allocation6 + $0x90] sm:$0xff]  ;;  %v6595_v54 = vpack.c.bf16 %v1552_v6, %v1546_v40  ;;  %v1604_v40 = vld [vmem:[#allocation6 + $0x3c8] sm:$0xff]  ;;  %v1610_v6 = vld [vmem:[#allocation6 + $0x3f8] sm:$0xff] }
 0x270   :  { %v5771_v2 = vadd.f32 %v5770_v1, %v5769_v56  ;;  %v1503_v1 = vld [vmem:[#allocation6 + $0xa0] sm:$0xff] }
 0x271   :  { %v635_v15 = vadd.f32 %v5736_v63, %v565_v45  ;;  %v1504_v45 = vld [vmem:[#allocation6 + $0xa8] sm:$0xff]  ;;  %v1497_v63 = vld [vmem:[#allocation6 + $0x70] sm:$0xff] }
 0x272   :  { %v6579_v56 = vpack.c.bf16 %v1504_v45, %v1498_v33  ;;  %v1558_v33 = vld [vmem:[#allocation6 + $0x258] sm:$0xff]  ;;  %v1564_v45 = vld [vmem:[#allocation6 + $0x288] sm:$0xff] }
 0x273   :  { %v884_v18 = vsel %vm883_vm1, %v635_v15, 0.0  ;;  %v1514_v15 = vld [vmem:[#allocation6 + $0xf8] sm:$0xff] }
 0x274   :  { %v885_v22 = vrot.slane %v884_v18, 4 }
 0x276   :  { %v886_v31 = vadd.f32 %v885_v22, %v884_v18  ;;  %v1516_v18 = vld [vmem:[#allocation6 + $0x108] sm:$0xff] }
 0x278   :  { %v887_v42 = vrot.slane %v886_v31, 2 }
 0x27a   :  { %v888_v57 = vadd.f32 %v887_v42, %v886_v31  ;;  %v1507_v31 = vld [vmem:[#allocation6 + $0xc0] sm:$0xff] }
 0x27c   :  { %v889_v60 = vrot.slane %v888_v57, 1 }
 0x27e   :  { %v890_v26 = vadd.f32 %v889_v60, %v888_v57  ;;  %v1528_v57 = vld [vmem:[#allocation6 + $0x168] sm:$0xff]  ;;  %v1519_v60 = vld [vmem:[#allocation6 + $0x120] sm:$0xff] }
 0x280   :  { %v891_v34 = vmul.f32 0.001953125, %v890_v26 }
 0x282   :  { %v900_v29 = vmul.f32 %v891_v34, %v891_v34 }
 0x28d   :  { %v5804_v41 = vpop.f32.mrb[4].mxu0 }
 0x28e   :  { %v5805_v47 = vpop.f32.mrb[5].mxu0  ;;  %v5839_v8 = vpop.f32.mrb[4].mxu1 }
 0x28f   :  { %v5806_v50 = vadd.f32 %v5805_v47, %v5804_v41  ;;  %v5840_v51 = vpop.f32.mrb[5].mxu1  ;;  %v1513_v41 = vld [vmem:[#allocation6 + $0xf0] sm:$0xff] }
 0x290   :  { %v5841_v52 = vadd.f32 %v5840_v51, %v5839_v8  ;;  %v1509_v8 = vld [vmem:[#allocation6 + $0xd0] sm:$0xff]  ;;  %v1520_v51 = vld [vmem:[#allocation6 + $0x128] sm:$0xff] }
 0x291   :  { %v810_v16 = vadd.f32 %v5806_v50, %v5771_v2  ;;  %v1508_v2 = vld [vmem:[#allocation6 + $0xc8] sm:$0xff]  ;;  %v1515_v50 = vld [vmem:[#allocation6 + $0x100] sm:$0xff] }
 0x292   :  { %v6391_v42 = vpack.c.bf16 %v1514_v15, %v1508_v2  ;;  %v1568_v2 = vld [vmem:[#allocation6 + $0x2a8] sm:$0xff]  ;;  %v1574_v15 = vld [vmem:[#allocation6 + $0x2d8] sm:$0xff] }
 0x293   :  { %v880_v58 = vadd.f32 %v5841_v52, %v810_v16  ;;  %v1526_v52 = vld [vmem:[#allocation6 + $0x158] sm:$0xff] }
 0x294   :  { %v1522_v16 = vld [vmem:[#allocation6 + $0x138] sm:$0xff] }
 0x295   :  { %v892_v21 = vsel %vm883_vm1, %v880_v58, 0.0  ;;  %v6393_v58 = vpack.c.bf16 %v1513_v41, %v1507_v31  ;;  %v6587_v26 = vpack.c.bf16 %v1528_v57, %v1522_v16  ;;  %v1567_v31 = vld [vmem:[#allocation6 + $0x2a0] sm:$0xff]  ;;  %v1573_v41 = vld [vmem:[#allocation6 + $0x2d0] sm:$0xff]  ;;  %v1582_v16 = vld [vmem:[#allocation6 + $0x318] sm:$0xff]  ;;  %vm7999_vm1 = vmmov 0  }
 0x296   :  { %v893_v61 = vrot.slane %v892_v21, 4  ;;  %v1588_v57 = vld [vmem:[#allocation6 + $0x348] sm:$0xff] }
 0x298   :  { %v894_v9 = vadd.f32 %v893_v61, %v892_v21  ;;  %v6585_v21 = vpack.c.bf16 %v1515_v50, %v1509_v8  ;;  %v1525_v61 = vld [vmem:[#allocation6 + $0x150] sm:$0xff]  ;;  %v1575_v50 = vld [vmem:[#allocation6 + $0x2e0] sm:$0xff] }
 0x299   :  { %v1569_v8 = vld [vmem:[#allocation6 + $0x2b0] sm:$0xff] }
 0x29a   :  { %v895_v10 = vrot.slane %v894_v9, 2 }
 0x29c   :  { %v896_v11 = vadd.f32 %v895_v10, %v894_v9  ;;  %v6395_v9 = vpack.c.bf16 %v1526_v52, %v1520_v51  ;;  %v1521_v10 = vld [vmem:[#allocation6 + $0x130] sm:$0xff]  ;;  %v1580_v51 = vld [vmem:[#allocation6 + $0x308] sm:$0xff]  ;;  %v1586_v52 = vld [vmem:[#allocation6 + $0x338] sm:$0xff] }
 0x29e   :  { %v897_v14 = vrot.slane %v896_v11, 1 }
 0x2a0   :  { %v898_v24 = vadd.f32 %v897_v14, %v896_v11  ;;  %v1527_v11 = vld [vmem:[#allocation6 + $0x160] sm:$0xff]  ;;  %v1538_v14 = vld [vmem:[#allocation6 + $0x1b8] sm:$0xff] }
 0x2a2   :  { %v899_v39 = vmul.f32 0.001953125, %v898_v24  ;;  %v1534_v24 = vld [vmem:[#allocation6 + $0x198] sm:$0xff] }
 0x2a4   :  { %v901_v32 = vsub.f32 %v899_v39, %v900_v29  ;;  %v1540_v29 = vld [vmem:[#allocation6 + $0x1c8] sm:$0xff]  ;;  %v6397_v39 = vpack.c.bf16 %v1525_v61, %v1519_v60  ;;  %v1579_v60 = vld [vmem:[#allocation6 + $0x300] sm:$0xff]  ;;  %v1585_v61 = vld [vmem:[#allocation6 + $0x330] sm:$0xff] }
 0x2a6   :  { %v902_v35 = vmax.f32 %v901_v32, 0.0  ;;  %v6589_v32 = vpack.c.bf16 %v1527_v11, %v1521_v10  ;;  %v1581_v10 = vld [vmem:[#allocation6 + $0x310] sm:$0xff]  ;;  %v1587_v11 = vld [vmem:[#allocation6 + $0x340] sm:$0xff] }
 0x2a8   :  { %v904_v53 = vadd.f32 1e-05, %v902_v35  ;;  %v1531_v35 = vld [vmem:[#allocation6 + $0x180] sm:$0xff] }
 0x2aa   :  { %7590 = vrsqrt.f32 %v904_v53  ;;  %v1537_v53 = vld [vmem:[#allocation6 + $0x1b0] sm:$0xff] }
 0x2ab   :  { %v6401_v23 = vpack.c.bf16 %v1537_v53, %v1531_v35  ;;  %v1591_v35 = vld [vmem:[#allocation6 + $0x360] sm:$0xff] }
 0x2b4   :  { %v7591_v37 = vpop.eup %7590 }
 0x2b5   :  { %v906_v55 = vmul.f32 %v7591_v37, %v903_v36  ;;  %v6591_v37 = vpack.c.bf16 %v1540_v29, %v1534_v24  ;;  %v1594_v24 = vld [vmem:[#allocation6 + $0x378] sm:$0xff]  ;;  %v1600_v29 = vld [vmem:[#allocation6 + $0x3a8] sm:$0xff] }
 0x2b7   :  { %5574 = vmatmul.mubr.msk.f32.vlgmr.msra.gmra.mrb[6].mxu0 %vm919_vm2, %v906_v55  ;;  %5577 = vmatmul.mubr.msk.f32.vlgmr.msra.gmra.mrb[6].mxu1 %vm919_vm2, %v906_v55  ;;  %v908_v4 = vmul.f32 %v906_v55, %v891_v34  ;;  %v1532_v34 = vld [vmem:[#allocation6 + $0x188] sm:$0xff] }
 0x2b8   :  { %5579 = vmatpush1.msk.msra.mxu0 %vm923_vm0, %v8572_v38  ;;  %1142 = vmatprep.mubr.f32.mxu0 %v7996_v30  ;;  %v6399_v36 = vpack.c.bf16 %v1538_v14, %v1532_v34  ;;  %v1592_v34 = vld [vmem:[#allocation6 + $0x368] sm:$0xff]  ;;  %v1598_v14 = vld [vmem:[#allocation6 + $0x398] sm:$0xff] }
 0x2b9   :  { %5582 = vmatpush1.msk.msra.mxu1 %vm923_vm0, %v8560_v7  ;;  %1216 = vmatprep.mubr.f32.mxu1 %v7996_v30  ;;  %v909_v62 = vsub.f32 %v907_v3, %v908_v4  ;;  %v6385_v7 = vpack.c.bf16 %v1489_v28, %v1483_v46  ;;  %v1539_v3 = vld [vmem:[#allocation6 + $0x1c0] sm:$0xff]  ;;  %v1550_v4 = vld [vmem:[#allocation6 + $0x218] sm:$0xff]  ;;  %v6419_v53 = vpack.c.bf16 %v1598_v14, %v1592_v34 }
 0x2ba   :  { %5584 = vmatprep.subr.msk.mxu0 %vm923_vm0, %v8568_v25  ;;  %5587 = vmatprep.subr.msk.mxu1 %vm923_vm0, %v8576_v43  ;;  %v1495_v25 = vld [vmem:[#allocation6 + $0x60] sm:$0xff]  ;;  %v6387_v43 = vpack.c.bf16 %v1502_v27, %v1496_v59  ;;  %v6403_v17 = vpack.c.bf16 %v1550_v4, %v1544_v44  ;;  %v1545_v59 = vld [vmem:[#allocation6 + $0x1f0] sm:$0xff]  ;;  %v1562_v27 = vld [vmem:[#allocation6 + $0x278] sm:$0xff] }
 0x2bb   :  { %5580 = vmatmul.mubr.msk.f32.vlgmr.msra.gmra.mrb[8].mxu0 %vm919_vm2, %v906_v55  ;;  %5583 = vmatmul.mubr.msk.f32.vlgmr.msra.gmra.mrb[8].mxu1 %vm919_vm2, %v909_v62  ;;  %v6389_v22 = vpack.c.bf16 %v1501_v49, %v1495_v25  ;;  %v1533_v55 = vld [vmem:[#allocation6 + $0x190] sm:$0xff]  ;;  %v1543_v28 = vld [vmem:[#allocation6 + $0x1e0] sm:$0xff] }
 0x2bc   :  { %5585 = vmatpush1.msk.msra.mxu0 %vm923_vm0, %v8562_v12  ;;  %1287 = vmatprep.mubr.f32.mxu0 %v7996_v30  ;;  %v1510_v12 = vld [vmem:[#allocation6 + $0xd8] sm:$0xff]  ;;  %v6593_v46 = vpack.c.bf16 %v1539_v3, %v1533_v55  ;;  %v1555_v25 = vld [vmem:[#allocation6 + $0x240] sm:$0xff]  ;;  %v1561_v49 = vld [vmem:[#allocation6 + $0x270] sm:$0xff] }
 0x2bd   :  { %5588 = vmatpush1.msk.msra.mxu1 %vm923_vm0, %v8572_v38  ;;  %1358 = vmatprep.mubr.f32.mxu1 %v7996_v30  ;;  %v6581_v38 = vpack.c.bf16 %v1503_v1, %v1497_v63  ;;  %v6583_v47 = vpack.c.bf16 %v1516_v18, %v1510_v12  ;;  %v1557_v63 = vld [vmem:[#allocation6 + $0x250] sm:$0xff]  ;;  %v1563_v1 = vld [vmem:[#allocation6 + $0x280] sm:$0xff]  ;;  %v1570_v12 = vld [vmem:[#allocation6 + $0x2b8] sm:$0xff] }
 0x2be   :  { %6384 = vmatprep.subr.bf16.mxu0 %v6383_v5  ;;  %6576 = vmatprep.subr.bf16.mxu1 %v6575_v13  ;;  %v1551_v5 = vld [vmem:[#allocation6 + $0x220] sm:$0xff]  ;;  %v1556_v13 = vld [vmem:[#allocation6 + $0x248] sm:$0xff]  ;;  %v1593_v55 = vld [vmem:[#allocation6 + $0x370] sm:$0xff] }
 0x2bf   :  { %5586 = vmatmul.mubr.msk.f32.vlgmr.msra.gmra.mrb[10].mxu0 %vm919_vm2, %v909_v62  ;;  %5589 = vmatmul.mubr.msk.f32.vlgmr.msra.gmra.mrb[10].mxu1 %vm919_vm2, %v909_v62  ;;  %v1549_v62 = vld [vmem:[#allocation6 + $0x210] sm:$0xff]  ;;  %v1576_v18 = vld [vmem:[#allocation6 + $0x2e8] sm:$0xff]  ;;  %v1599_v3 = vld [vmem:[#allocation6 + $0x3a0] sm:$0xff]  ;;  %vm4713_vm2 = vcmask 392192  }
 0x2c0   :  { %6386 = vmatpush1.bf16.msra.mxu0 %v6385_v7  ;;  %6578 = vmatpush1.bf16.msra.mxu1 %v6577_v48  ;;  %v6405_v7 = vpack.c.bf16 %v1549_v62, %v1543_v28  ;;  %v6597_v48 = vpack.c.bf16 %v1551_v5, %v1545_v59  ;;  %v6613_v4 = vpack.c.bf16 %v1599_v3, %v1593_v55  ;;  %v1612_v28 = vld [vmem:[#allocation6 + $0x408] sm:$0xff]  ;;  %v1603_v62 = vld [vmem:[#allocation6 + $0x3c0] sm:$0xff]  ;;  %v1605_v5 = vld [vmem:[#allocation6 + $0x3d0] sm:$0xff] }
 0x2c1   :  { %6388 = vmatprep.subr.bf16.mxu0 %v6387_v43  ;;  %6580 = vmatprep.subr.bf16.mxu1 %v6579_v56  ;;  %v6407_v43 = vpack.c.bf16 %v1562_v27, %v1556_v13  ;;  %v6599_v56 = vpack.c.bf16 %v1564_v45, %v1558_v33  ;;  %v1611_v13 = vld [vmem:[#allocation6 + $0x400] sm:$0xff]  ;;  %v1616_v33 = vld [vmem:[#allocation6 + $0x428] sm:$0xff]  ;;  %v1622_v45 = vld [vmem:[#allocation6 + $0x458] sm:$0xff] }
 0x2c2   :  { %v6617_v27 = vpack.c.bf16 %v1611_v13, %v1605_v5  ;;  %v1647_v34 = vld [vmem:[#allocation6 + $0x520] sm:$0xff]  ;;  %v1653_v3 = vld [vmem:[#allocation6 + $0x550] sm:$0xff] }
 0x2c3   :  { %v1665_v5 = vld [vmem:[#allocation6 + $0x5b0] sm:$0xff]  ;;  %v1671_v13 = vld [vmem:[#allocation6 + $0x5e0] sm:$0xff] }
 0x2c4   :  { %6390 = vmatpush1.bf16.msra.mxu0 %v6389_v22  ;;  %6582 = vmatpush1.bf16.msra.mxu1 %v6581_v38  ;;  %v6409_v22 = vpack.c.bf16 %v1561_v49, %v1555_v25  ;;  %v6601_v38 = vpack.c.bf16 %v1563_v1, %v1557_v63  ;;  %v1624_v25 = vld [vmem:[#allocation6 + $0x468] sm:$0xff]  ;;  %v1615_v49 = vld [vmem:[#allocation6 + $0x420] sm:$0xff]  ;;  %v1617_v1 = vld [vmem:[#allocation6 + $0x430] sm:$0xff] }
 0x2c5   :  { %6392 = vmatprep.subr.bf16.mxu0 %v6391_v42  ;;  %6584 = vmatprep.subr.bf16.mxu1 %v6583_v47  ;;  %v6411_v42 = vpack.c.bf16 %v1574_v15, %v1568_v2  ;;  %v6603_v47 = vpack.c.bf16 %v1576_v18, %v1570_v12  ;;  %v1623_v2 = vld [vmem:[#allocation6 + $0x460] sm:$0xff]  ;;  %v1628_v12 = vld [vmem:[#allocation6 + $0x488] sm:$0xff]  ;;  %v1634_v18 = vld [vmem:[#allocation6 + $0x4b8] sm:$0xff] }
 0x2c6   :  { %v6621_v15 = vpack.c.bf16 %v1623_v2, %v1617_v1 }
 0x2c8   :  { %6394 = vmatpush1.bf16.msra.mxu0 %v6393_v58  ;;  %6586 = vmatpush1.bf16.msra.mxu1 %v6585_v21  ;;  %v6413_v58 = vpack.c.bf16 %v1573_v41, %v1567_v31  ;;  %v6605_v21 = vpack.c.bf16 %v1575_v50, %v1569_v8  ;;  %v1636_v31 = vld [vmem:[#allocation6 + $0x4c8] sm:$0xff]  ;;  %v1627_v41 = vld [vmem:[#allocation6 + $0x480] sm:$0xff]  ;;  %v1629_v50 = vld [vmem:[#allocation6 + $0x490] sm:$0xff] }
 0x2c9   :  { %6396 = vmatprep.subr.bf16.mxu0 %v6395_v9  ;;  %6588 = vmatprep.subr.bf16.mxu1 %v6587_v26  ;;  %v6415_v9 = vpack.c.bf16 %v1586_v52, %v1580_v51  ;;  %v6607_v26 = vpack.c.bf16 %v1588_v57, %v1582_v16  ;;  %v1635_v51 = vld [vmem:[#allocation6 + $0x4c0] sm:$0xff]  ;;  %v1640_v16 = vld [vmem:[#allocation6 + $0x4e8] sm:$0xff]  ;;  %v1646_v57 = vld [vmem:[#allocation6 + $0x518] sm:$0xff] }
 0x2ca   :  { %v6625_v52 = vpack.c.bf16 %v1635_v51, %v1629_v50 }
 0x2cc   :  { %6398 = vmatpush1.bf16.msra.mxu0 %v6397_v39  ;;  %6590 = vmatpush1.bf16.msra.mxu1 %v6589_v32  ;;  %v6417_v39 = vpack.c.bf16 %v1585_v61, %v1579_v60  ;;  %v6609_v32 = vpack.c.bf16 %v1587_v11, %v1581_v10  ;;  %v1648_v60 = vld [vmem:[#allocation6 + $0x528] sm:$0xff]  ;;  %v1639_v61 = vld [vmem:[#allocation6 + $0x4e0] sm:$0xff]  ;;  %v1641_v11 = vld [vmem:[#allocation6 + $0x4f0] sm:$0xff] }
 0x2cd   :  { %6400 = vmatprep.subr.bf16.mxu0 %v6399_v36  ;;  %6592 = vmatprep.subr.bf16.mxu1 %v6591_v37  ;;  %v6611_v36 = vpack.c.bf16 %v1600_v29, %v1594_v24  ;;  %v1597_v37 = vld [vmem:[#allocation6 + $0x390] sm:$0xff]  ;;  %v6629_v14 = vpack.c.bf16 %v1647_v34, %v1641_v11  ;;  %v1652_v24 = vld [vmem:[#allocation6 + $0x548] sm:$0xff]  ;;  %v1658_v29 = vld [vmem:[#allocation6 + $0x578] sm:$0xff] }
 0x2ce   :  { %v6421_v44 = vpack.c.bf16 %v1597_v37, %v1591_v35  ;;  %v1660_v35 = vld [vmem:[#allocation6 + $0x588] sm:$0xff] }
 0x2d0   :  { %6402 = vmatpush1.bf16.msra.mxu0 %v6401_v23  ;;  %6594 = vmatpush1.bf16.msra.mxu1 %v6593_v46  ;;  %v1606_v23 = vld [vmem:[#allocation6 + $0x3d8] sm:$0xff]  ;;  %v6423_v46 = vpack.c.bf16 %v1610_v6, %v1604_v40  ;;  %v1664_v40 = vld [vmem:[#allocation6 + $0x5a8] sm:$0xff] }
 0x2d1   :  { %6404 = vmatprep.subr.bf16.mxu0 %v6403_v17  ;;  %6596 = vmatprep.subr.bf16.mxu1 %v6595_v54  ;;  %v1609_v17 = vld [vmem:[#allocation6 + $0x3f0] sm:$0xff]  ;;  %v6615_v54 = vpack.c.bf16 %v1612_v28, %v1606_v23  ;;  %v1670_v6 = vld [vmem:[#allocation6 + $0x5d8] sm:$0xff]  ;;  %v1672_v28 = vld [vmem:[#allocation6 + $0x5e8] sm:$0xff] }
 0x2d2   :  { %v6425_v59 = vpack.c.bf16 %v1609_v17, %v1603_v62  ;;  %v1666_v23 = vld [vmem:[#allocation6 + $0x5b8] sm:$0xff]  ;;  %v1663_v62 = vld [vmem:[#allocation6 + $0x5a0] sm:$0xff]  ;;  %v1669_v17 = vld [vmem:[#allocation6 + $0x5d0] sm:$0xff] }
 0x2d4   :  { %6406 = vmatpush1.bf16.msra.mxu0 %v6405_v7  ;;  %6598 = vmatpush1.bf16.msra.mxu1 %v6597_v48  ;;  %v1618_v7 = vld [vmem:[#allocation6 + $0x438] sm:$0xff]  ;;  %v6427_v48 = vpack.c.bf16 %v1622_v45, %v1616_v33  ;;  %v1676_v33 = vld [vmem:[#allocation6 + $0x608] sm:$0xff] }
 0x2d5   :  { %6408 = vmatprep.subr.bf16.mxu0 %v6407_v43  ;;  %6600 = vmatprep.subr.bf16.mxu1 %v6599_v56  ;;  %v1621_v43 = vld [vmem:[#allocation6 + $0x450] sm:$0xff]  ;;  %v6619_v56 = vpack.c.bf16 %v1624_v25, %v1618_v7  ;;  %v1682_v45 = vld [vmem:[#allocation6 + $0x638] sm:$0xff]  ;;  %v1684_v25 = vld [vmem:[#allocation6 + $0x648] sm:$0xff] }
 0x2d6   :  { %v6429_v63 = vpack.c.bf16 %v1621_v43, %v1615_v49  ;;  %v1678_v7 = vld [vmem:[#allocation6 + $0x618] sm:$0xff]  ;;  %v8617_v43 = vsub.s32 0, %v8409_v0 }
 0x2d7   :  { %v6639_v49 = vpack.c.bf16 %v1684_v25, %v1678_v7  ;;  %v1687_v7 = vld [vmem:[#allocation6 + $0x660] sm:$0xff]  ;;  %v1689_v25 = vld [vmem:[#allocation6 + $0x670] sm:$0xff] }
 0x2d8   :  { %6410 = vmatpush1.bf16.msra.mxu0 %v6409_v22  ;;  %6602 = vmatpush1.bf16.msra.mxu1 %v6601_v38  ;;  %v1630_v22 = vld [vmem:[#allocation6 + $0x498] sm:$0xff]  ;;  %v6431_v38 = vpack.c.bf16 %v1634_v18, %v1628_v12 }
 0x2d9   :  { %6412 = vmatprep.subr.bf16.mxu0 %v6411_v42  ;;  %6604 = vmatprep.subr.bf16.mxu1 %v6603_v47  ;;  %v1633_v42 = vld [vmem:[#allocation6 + $0x4b0] sm:$0xff]  ;;  %v6623_v47 = vpack.c.bf16 %v1636_v31, %v1630_v22 }
 0x2da   :  { %v6433_v8 = vpack.c.bf16 %v1633_v42, %v1627_v41 }
 0x2dc   :  { %6414 = vmatpush1.bf16.msra.mxu0 %v6413_v58  ;;  %6606 = vmatpush1.bf16.msra.mxu1 %v6605_v21  ;;  %v1642_v58 = vld [vmem:[#allocation6 + $0x4f8] sm:$0xff]  ;;  %v6435_v21 = vpack.c.bf16 %v1646_v57, %v1640_v16 }
 0x2dd   :  { %6416 = vmatprep.subr.bf16.mxu0 %v6415_v9  ;;  %6608 = vmatprep.subr.bf16.mxu1 %v6607_v26  ;;  %v1645_v9 = vld [vmem:[#allocation6 + $0x510] sm:$0xff]  ;;  %v6627_v26 = vpack.c.bf16 %v1648_v60, %v1642_v58 }
 0x2de   :  { %v6437_v10 = vpack.c.bf16 %v1645_v9, %v1639_v61 }
 0x2e0   :  { %6418 = vmatpush1.bf16.msra.mxu0 %v6417_v39  ;;  %6610 = vmatpush1.bf16.msra.mxu1 %v6609_v32  ;;  %v1654_v39 = vld [vmem:[#allocation6 + $0x558] sm:$0xff]  ;;  %v6439_v32 = vpack.c.bf16 %v1658_v29, %v1652_v24 }
 0x2e1   :  { %6420 = vmatprep.subr.bf16.mxu0 %v6419_v53  ;;  %6612 = vmatprep.subr.bf16.mxu1 %v6611_v36  ;;  %v1651_v53 = vld [vmem:[#allocation6 + $0x540] sm:$0xff]  ;;  %v1657_v36 = vld [vmem:[#allocation6 + $0x570] sm:$0xff]  ;;  %v6631_v37 = vpack.c.bf16 %v1660_v35, %v1654_v39 }
 0x2e2   :  { %v6441_v55 = vpack.c.bf16 %v1657_v36, %v1651_v53 }
 0x2e4   :  { %6422 = vmatpush1.bf16.msra.mxu0 %v6421_v44  ;;  %6614 = vmatpush1.bf16.msra.mxu1 %v6613_v4  ;;  %v1659_v44 = vld [vmem:[#allocation6 + $0x580] sm:$0xff] }
 0x2e5   :  { %6424 = vmatprep.subr.bf16.mxu0 %v6423_v46  ;;  %6616 = vmatprep.subr.bf16.mxu1 %v6615_v54  ;;  %v6633_v4 = vpack.c.bf16 %v1659_v44, %v1653_v3  ;;  %v6443_v46 = vpack.c.bf16 %v1670_v6, %v1664_v40  ;;  %v6635_v54 = vpack.c.bf16 %v1672_v28, %v1666_v23  ;;  %v1675_v6 = vld [vmem:[#allocation6 + $0x600] sm:$0xff]  ;;  %v1681_v23 = vld [vmem:[#allocation6 + $0x630] sm:$0xff] }
 0x2e6   :  { %v1683_v28 = vld [vmem:[#allocation6 + $0x640] sm:$0xff] }
 0x2e8   :  { %6426 = vmatpush1.bf16.msra.mxu0 %v6425_v59  ;;  %6618 = vmatpush1.bf16.msra.mxu1 %v6617_v27  ;;  %v6445_v59 = vpack.c.bf16 %v1669_v17, %v1663_v62  ;;  %v6637_v27 = vpack.c.bf16 %v1671_v13, %v1665_v5  ;;  %v1696_v5 = vld [vmem:[#allocation6 + $0x6a8] sm:$0xff] }
 0x2e9   :  { %6428 = vmatprep.subr.bf16.mxu0 %v6427_v48  ;;  %6620 = vmatprep.subr.bf16.mxu1 %v6619_v56  ;;  %v6447_v48 = vpack.c.bf16 %v1682_v45, %v1676_v33 }
 0x2ec   :  { %6430 = vmatpush1.bf16.msra.mxu0 %v6429_v63  ;;  %6622 = vmatpush1.bf16.msra.mxu1 %v6621_v15 }
 0x2ed   :  { %6432 = vmatprep.subr.bf16.mxu0 %v6431_v38  ;;  %6624 = vmatprep.subr.bf16.mxu1 %v6623_v47 }
 0x2f0   :  { %6434 = vmatpush1.bf16.msra.mxu0 %v6433_v8  ;;  %6626 = vmatpush1.bf16.msra.mxu1 %v6625_v52 }
 0x2f1   :  { %6436 = vmatprep.subr.bf16.mxu0 %v6435_v21  ;;  %6628 = vmatprep.subr.bf16.mxu1 %v6627_v26 }
 0x2f4   :  { %6438 = vmatpush1.bf16.msra.mxu0 %v6437_v10  ;;  %6630 = vmatpush1.bf16.msra.mxu1 %v6629_v14 }
 0x2f5   :  { %6440 = vmatprep.subr.bf16.mxu0 %v6439_v32  ;;  %6632 = vmatprep.subr.bf16.mxu1 %v6631_v37 }
 0x2f8   :  { %6442 = vmatpush1.bf16.msra.mxu0 %v6441_v55  ;;  %6634 = vmatpush1.bf16.msra.mxu1 %v6633_v4  ;;  %v7602_v55 = vld [vmem:[%s9261_s6] sm:$0xff] }
 0x2f9   :  { %6444 = vmatprep.subr.bf16.mxu0 %v6443_v46  ;;  %6636 = vmatprep.subr.bf16.mxu1 %v6635_v54  ;;  %v1677_v46 = vld [vmem:[#allocation6 + $0x610] sm:$0xff]  ;;  %v1694_v54 = vld [vmem:[#allocation6 + $0x698] sm:$0xff] }
 0x2fa   :  { %v6641_v33 = vpack.c.bf16 %v1683_v28, %v1677_v46  ;;  %v1735_v28 = vld [vmem:[#allocation6 + $0x7e0] sm:$0xff] }
 0x2fc   :  { %6446 = vmatpush1.bf16.msra.mxu0 %v6445_v59  ;;  %6638 = vmatpush1.bf16.msra.mxu1 %v6637_v27  ;;  %v1690_v59 = vld [vmem:[#allocation6 + $0x678] sm:$0xff]  ;;  %v6449_v27 = vpack.c.bf16 %v1681_v23, %v1675_v6  ;;  %v1744_v6 = vld [vmem:[#allocation6 + $0x828] sm:$0xff] }
 0x2fd   :  { %6448 = vmatprep.subr.bf16.mxu0 %v6447_v48  ;;  %6640 = vmatprep.subr.bf16.mxu1 %v6639_v49  ;;  %v1693_v48 = vld [vmem:[#allocation6 + $0x690] sm:$0xff]  ;;  %v1695_v49 = vld [vmem:[#allocation6 + $0x6a0] sm:$0xff] }
 0x38a   :  { %v1002_v56 = vpop.f32.mrb[6].mxu0  ;;  %v1073_v63 = vpop.f32.mrb[6].mxu1 }
 0x38b   :  { %v1368_v1 = vrot.slane %v1002_v56, %v8617_v43  ;;  %v1376_v2 = vrot.slane %v1073_v63, %v8617_v43  ;;  %v1004_v15 = vpop.f32.mrb[7].mxu0  ;;  %v1075_v12 = vpop.f32.mrb[7].mxu1  ;;  %v1700_v56 = vld [vmem:[#allocation6 + $0x6c8] sm:$0xff] }
 0x38c   :  { %v1372_v18 = vrot.slane %v1004_v15, %v8617_v43  ;;  %v1380_v22 = vrot.slane %v1075_v12, %v8617_v43  ;;  %v1706_v15 = vld [vmem:[#allocation6 + $0x6f8] sm:$0xff] }
 0x38d   :  { %v1702_v12 = vld [vmem:[#allocation6 + $0x6d8] sm:$0xff] }
 0x38e   :  { %v1395_v38 = vcombine.low %v1368_v1, %v1372_v18  ;;  %v1396_v31 = vcombine.low %v1376_v2, %v1380_v22  ;;  %v1144_v41 = vpop.f32.mrb[8].mxu0  ;;  %v1218_v42 = vpop.f32.mrb[8].mxu1  ;;  %v6643_v2 = vpack.c.bf16 %v1696_v5, %v1690_v59  ;;  %v1708_v18 = vld [vmem:[#allocation6 + $0x708] sm:$0xff]  ;;  %v6453_v22 = vpack.c.bf16 %v1693_v48, %v1687_v7  ;;  %v1737_v59 = vld [vmem:[#allocation6 + $0x7f0] sm:$0xff]  ;;  %v1743_v5 = vld [vmem:[#allocation6 + $0x820] sm:$0xff] }
 0x38f   :  { %v1384_v47 = vrot.slane %v1144_v41, %v8617_v43  ;;  %v1427_v0 = vrot.slane %v1218_v42, %v8617_v43  ;;  %v1146_v8 = vpop.f32.mrb[9].mxu0  ;;  %v1220_v50 = vpop.f32.mrb[9].mxu1  ;;  %v1705_v41 = vld [vmem:[#allocation6 + $0x6f0] sm:$0xff]  ;;  %v6455_v42 = vpack.c.bf16 %v1706_v15, %v1700_v56  ;;  %v1750_v7 = vld [vmem:[#allocation6 + $0x858] sm:$0xff]  ;;  %v1756_v48 = vld [vmem:[#allocation6 + $0x888] sm:$0xff] }
 0x390   :  { %v1403_v51 = vrot.slane %v1395_v38, %v8424_v19  ;;  %v1410_v52 = vrot.slane %v1396_v31, %v8424_v19  ;;  %v1388_v16 = vrot.slane %v1146_v8, %v8617_v43  ;;  %v1431_v57 = vrot.slane %v1220_v50, %v8617_v43  ;;  %v1699_v31 = vld [vmem:[#allocation6 + $0x6c0] sm:$0xff]  ;;  %v1712_v50 = vld [vmem:[#allocation6 + $0x728] sm:$0xff] }
 0x391   :  { %v6645_v38 = vpack.c.bf16 %v1695_v49, %v1689_v25  ;;  %v1707_v8 = vld [vmem:[#allocation6 + $0x700] sm:$0xff]  ;;  %v6661_v49 = vpack.c.bf16 %v1743_v5, %v1737_v59  ;;  %v6663_v15 = vpack.c.bf16 %v1756_v48, %v1750_v7  ;;  %v1801_v5 = vld [vmem:[#allocation6 + $0x9f0] sm:$0xff] }
 0x392   :  { %v1411_v58 = vcombine.low %v1403_v51, %v1410_v52  ;;  %v1412_v21 = vcombine.low %v1384_v47, %v1388_v16  ;;  %v1454_v60 = vcombine.low %v1427_v0, %v1431_v57  ;;  %v1289_v61 = vpop.f32.mrb[10].mxu0  ;;  %v1360_v9 = vpop.f32.mrb[10].mxu1  ;;  %v6647_v47 = vpack.c.bf16 %v1708_v18, %v1702_v12  ;;  %v1701_v0 = vld [vmem:[#allocation6 + $0x6d0] sm:$0xff]  ;;  %v1718_v51 = vld [vmem:[#allocation6 + $0x758] sm:$0xff]  ;;  %v1720_v16 = vld [vmem:[#allocation6 + $0x768] sm:$0xff] }
 0x393   :  { %v1435_v26 = vrot.slane %v1289_v61, %v8617_v43  ;;  %v1443_v10 = vrot.slane %v1360_v9, %v8617_v43  ;;  %v1291_v11 = vpop.f32.mrb[11].mxu0  ;;  %v1362_v34 = vpop.f32.mrb[11].mxu1  ;;  %v1714_v52 = vld [vmem:[#allocation6 + $0x738] sm:$0xff]  ;;  %v6457_v57 = vpack.c.bf16 %v1705_v41, %v1699_v31  ;;  %v6459_v61 = vpack.c.bf16 %v1718_v51, %v1712_v50  ;;  %v1747_v56 = vld [vmem:[#allocation6 + $0x840] sm:$0xff]  ;;  %v1749_v12 = vld [vmem:[#allocation6 + $0x850] sm:$0xff] }
 0x394   :  { %v1439_v14 = vrot.slane %v1291_v11, %v8617_v43  ;;  %v1419_v24 = vrot.slane %v1412_v21, %v8424_v19  ;;  %v1447_v29 = vrot.slane %v1362_v34, %v8617_v43  ;;  %v1462_v35 = vrot.slane %v1454_v60, %v8424_v19  ;;  %v1711_v21 = vld [vmem:[#allocation6 + $0x720] sm:$0xff]  ;;  %v1717_v60 = vld [vmem:[#allocation6 + $0x750] sm:$0xff]  ;;  %v1724_v11 = vld [vmem:[#allocation6 + $0x788] sm:$0xff] }
 0x395   :  { %v1422_v3 = vmul.f32 %v7602_v55, %v1411_v58  ;;  %v6649_v58 = vpack.c.bf16 %v1707_v8, %v1701_v0  ;;  %v6651_v9 = vpack.c.bf16 %v1720_v16, %v1714_v52  ;;  %v1730_v34 = vld [vmem:[#allocation6 + $0x7b8] sm:$0xff]  ;;  %v1731_v55 = vld [vmem:[#allocation6 + $0x7c0] sm:$0xff]  ;;  %v1768_v41 = vld [vmem:[#allocation6 + $0x8e8] sm:$0xff] }
 0x396   :  { %v1455_v39 = vcombine.low %v1435_v26, %v1439_v14  ;;  %v1471_v32 = vcombine.low %v1443_v10, %v1447_v29  ;;  %v1423_v36 = vmul.f32 %v1419_v24, %v8477_v20  ;;  %v1688_v20 = vld [vmem:[#allocation6 + $0x668] sm:$0xff]  ;;  %v1713_v26 = vld [vmem:[#allocation6 + $0x730] sm:$0xff]  ;;  %v1719_v10 = vld [vmem:[#allocation6 + $0x760] sm:$0xff]  ;;  %v6461_v29 = vpack.c.bf16 %v1717_v60, %v1711_v21 }
 0x397   :  { %v6451_v1 = vpack.c.bf16 %v1694_v54, %v1688_v20  ;;  %v1726_v14 = vld [vmem:[#allocation6 + $0x798] sm:$0xff]  ;;  %v1732_v24 = vld [vmem:[#allocation6 + $0x7c8] sm:$0xff]  ;;  %v1755_v18 = vld [vmem:[#allocation6 + $0x880] sm:$0xff] }
 0x398   :  { %v1469_v53 = vrot.slane %v1455_v39, %v8424_v19  ;;  %v1478_v37 = vrot.slane %v1471_v32, %v8424_v19  ;;  %v6653_v39 = vpack.c.bf16 %v1719_v10, %v1713_v26  ;;  %v1723_v32 = vld [vmem:[#allocation6 + $0x780] sm:$0xff]  ;;  %v1762_v31 = vld [vmem:[#allocation6 + $0x8b8] sm:$0xff]  ;;  %v1765_v8 = vld [vmem:[#allocation6 + $0x8d0] sm:$0xff] }
 0x399   :  { %v1759_v0 = vld [vmem:[#allocation6 + $0x8a0] sm:$0xff]  ;;  %v6667_v51 = vpack.c.bf16 %v1768_v41, %v1762_v31  ;;  %v1761_v52 = vld [vmem:[#allocation6 + $0x8b0] sm:$0xff]  ;;  %v1774_v21 = vld [vmem:[#allocation6 + $0x918] sm:$0xff] }
 0x39a   :  { %v1470_v44 = vcombine.low %v1462_v35, %v1469_v53  ;;  %v8641_v4 = vadd.f32 %v1478_v37, %v1423_v36  ;;  %v1729_v35 = vld [vmem:[#allocation6 + $0x7b0] sm:$0xff]  ;;  %v6463_v53 = vpack.c.bf16 %v1730_v34, %v1724_v11  ;;  %v6655_v36 = vpack.c.bf16 %v1732_v24, %v1726_v14  ;;  %v1767_v16 = vld [vmem:[#allocation6 + $0x8e0] sm:$0xff]  ;;  %v1780_v60 = vld [vmem:[#allocation6 + $0x948] sm:$0xff] }
 0x39b   :  { %v1725_v37 = vld [vmem:[#allocation6 + $0x790] sm:$0xff]  ;;  %v6465_v23 = vpack.c.bf16 %v1729_v35, %v1723_v32  ;;  %v1771_v26 = vld [vmem:[#allocation6 + $0x900] sm:$0xff]  ;;  %v6671_v34 = vpack.c.bf16 %v1780_v60, %v1774_v21  ;;  %v1786_v32 = vld [vmem:[#allocation6 + $0x978] sm:$0xff] }
 0x39c   :  { %v1481_v40 = vadd.f32 %v1470_v44, %v1422_v3  ;;  %v1736_v3 = vld [vmem:[#allocation6 + $0x7e8] sm:$0xff]  ;;  %v1742_v44 = vld [vmem:[#allocation6 + $0x818] sm:$0xff]  ;;  %v6657_v46 = vpack.c.bf16 %v1731_v55, %v1725_v37  ;;  %v1777_v10 = vld [vmem:[#allocation6 + $0x930] sm:$0xff] }
 0x39d   :  { %v6467_v20 = vpack.c.bf16 %v1742_v44, %v1736_v3  ;;  %v1773_v14 = vld [vmem:[#allocation6 + $0x910] sm:$0xff]  ;;  %v1779_v24 = vld [vmem:[#allocation6 + $0x940] sm:$0xff]  ;;  %v1792_v35 = vld [vmem:[#allocation6 + $0x9a8] sm:$0xff] }
 0x39e   :  { %v2061_v62 = vcombine.high %v1481_v40, %v1481_v40  ;;  %v8644_v17 = vrot.slane %v1481_v40, %v8424_v19  ;;  %v1738_v40 = vld [vmem:[#allocation6 + $0x7f8] sm:$0xff]  ;;  %v1783_v37 = vld [vmem:[#allocation6 + $0x960] sm:$0xff]  ;;  %v1789_v55 = vld [vmem:[#allocation6 + $0x990] sm:$0xff]  ;;  %v6675_v44 = vpack.c.bf16 %v1792_v35, %v1786_v32 }
 0x39f   :  { %v6659_v54 = vpack.c.bf16 %v1744_v6, %v1738_v40  ;;  %v1785_v40 = vld [vmem:[#allocation6 + $0x970] sm:$0xff]  ;;  %v1791_v6 = vld [vmem:[#allocation6 + $0x9a0] sm:$0xff] }
 0x3a0   :  { %v8648_v13 = vcombine.high %v8644_v17, %v8644_v17  ;;  %v8651_v45 = vrot.slane %v2061_v62, %v8424_v19  ;;  %v1741_v62 = vld [vmem:[#allocation6 + $0x810] sm:$0xff]  ;;  %v1795_v59 = vld [vmem:[#allocation6 + $0x9c0] sm:$0xff] }
 0x3a1   :  { %v6469_v25 = vpack.c.bf16 %v1741_v62, %v1735_v28  ;;  %v1798_v28 = vld [vmem:[#allocation6 + $0x9d8] sm:$0xff]  ;;  %v1804_v62 = vld [vmem:[#allocation6 + $0xa08] sm:$0xff]  ;;  %v1797_v7 = vld [vmem:[#allocation6 + $0x9d0] sm:$0xff] }
 0x3a2   :  { %2156 = vmatprep.mubr.f32.mxu0 %v8648_v13  ;;  %2369 = vmatprep.mubr.f32.mxu1 %v8648_v13  ;;  %v8657_v63 = vcombine.high %v8651_v45, %v8651_v45  ;;  %v1803_v48 = vld [vmem:[#allocation6 + $0xa00] sm:$0xff]  ;;  %v1809_v31 = vld [vmem:[#allocation6 + $0xa30] sm:$0xff] }
 0x3a3   :  { %2157 = vmatmul.mubr.f32.vlgmr.msra.gmra.mrb[12].mxu0 %v8644_v17  ;;  %2370 = vmatmul.mubr.f32.vlgmr.msra.gmra.mrb[12].mxu1 %v8644_v17  ;;  %v1815_v41 = vld [vmem:[#allocation6 + $0xa60] sm:$0xff]  ;;  %v1821_v21 = vld [vmem:[#allocation6 + $0xa90] sm:$0xff] }
 0x3a4   :  { %6450 = vmatpush1.bf16.msra.mxu0 %v6449_v27  ;;  %6642 = vmatpush1.bf16.msra.mxu1 %v6641_v33  ;;  %v1748_v27 = vld [vmem:[#allocation6 + $0x848] sm:$0xff]  ;;  %v1754_v33 = vld [vmem:[#allocation6 + $0x878] sm:$0xff]  ;;  %v1827_v60 = vld [vmem:[#allocation6 + $0xac0] sm:$0xff] }
 0x3a5   :  { %2227 = vmatprep.mubr.f32.mxu0 %v8657_v63  ;;  %2440 = vmatprep.mubr.f32.mxu1 %v8657_v63  ;;  %v1833_v32 = vld [vmem:[#allocation6 + $0xaf0] sm:$0xff]  ;;  %v1839_v35 = vld [vmem:[#allocation6 + $0xb20] sm:$0xff] }
 0x3a6   :  { %6452 = vmatprep.subr.bf16.mxu0 %v6451_v1  ;;  %6644 = vmatprep.subr.bf16.mxu1 %v6643_v2  ;;  %v1753_v1 = vld [vmem:[#allocation6 + $0x870] sm:$0xff]  ;;  %v6471_v2 = vpack.c.bf16 %v1754_v33, %v1748_v27  ;;  %v6679_v33 = vpack.c.bf16 %v1804_v62, %v1798_v28  ;;  %v1851_v62 = vld [vmem:[#allocation6 + $0xb80] sm:$0xff] }
 0x3a7   :  { %v1845_v28 = vld [vmem:[#allocation6 + $0xb50] sm:$0xff] }
 0x3a8   :  { %6454 = vmatpush1.bf16.msra.mxu0 %v6453_v22  ;;  %6646 = vmatpush1.bf16.msra.mxu1 %v6645_v38  ;;  %v1760_v22 = vld [vmem:[#allocation6 + $0x8a8] sm:$0xff]  ;;  %v1766_v38 = vld [vmem:[#allocation6 + $0x8d8] sm:$0xff] }
 0x3a9   :  { %6456 = vmatprep.subr.bf16.mxu0 %v6455_v42  ;;  %6648 = vmatprep.subr.bf16.mxu1 %v6647_v47  ;;  %v6473_v42 = vpack.c.bf16 %v1753_v1, %v1747_v56  ;;  %v6665_v47 = vpack.c.bf16 %v1755_v18, %v1749_v12  ;;  %v6475_v50 = vpack.c.bf16 %v1766_v38, %v1760_v22  ;;  %v1810_v56 = vld [vmem:[#allocation6 + $0xa38] sm:$0xff]  ;;  %v1816_v1 = vld [vmem:[#allocation6 + $0xa68] sm:$0xff]  ;;  %v1807_v12 = vld [vmem:[#allocation6 + $0xa20] sm:$0xff] }
 0x3aa   :  { %v1813_v18 = vld [vmem:[#allocation6 + $0xa50] sm:$0xff]  ;;  %v6683_v38 = vpack.c.bf16 %v1816_v1, %v1810_v56  ;;  %v1863_v1 = vld [vmem:[#allocation6 + $0xbe0] sm:$0xff] }
 0x3ab   :  { %v1857_v56 = vld [vmem:[#allocation6 + $0xbb0] sm:$0xff] }
 0x3ac   :  { %6458 = vmatpush1.bf16.msra.mxu0 %v6457_v57  ;;  %6650 = vmatpush1.bf16.msra.mxu1 %v6649_v58  ;;  %v1772_v57 = vld [vmem:[#allocation6 + $0x908] sm:$0xff]  ;;  %v1778_v58 = vld [vmem:[#allocation6 + $0x938] sm:$0xff] }
 0x3ad   :  { %6460 = vmatprep.subr.bf16.mxu0 %v6459_v61  ;;  %6652 = vmatprep.subr.bf16.mxu1 %v6651_v9  ;;  %v6477_v61 = vpack.c.bf16 %v1765_v8, %v1759_v0  ;;  %v6669_v9 = vpack.c.bf16 %v1767_v16, %v1761_v52  ;;  %v6479_v11 = vpack.c.bf16 %v1778_v58, %v1772_v57  ;;  %v1822_v0 = vld [vmem:[#allocation6 + $0xa98] sm:$0xff]  ;;  %v1828_v8 = vld [vmem:[#allocation6 + $0xac8] sm:$0xff]  ;;  %v1819_v52 = vld [vmem:[#allocation6 + $0xa80] sm:$0xff] }
 0x3ae   :  { %v1825_v16 = vld [vmem:[#allocation6 + $0xab0] sm:$0xff]  ;;  %v6687_v58 = vpack.c.bf16 %v1828_v8, %v1822_v0  ;;  %v8665_v0 = vrot.slane %v8641_v4, %v8424_v19 }
 0x3af   :  { %v1869_v8 = vld [vmem:[#allocation6 + $0xc10] sm:$0xff] }
 0x3b0   :  { %6462 = vmatpush1.bf16.msra.mxu0 %v6461_v29  ;;  %6654 = vmatpush1.bf16.msra.mxu1 %v6653_v39  ;;  %v1784_v29 = vld [vmem:[#allocation6 + $0x968] sm:$0xff]  ;;  %v1790_v39 = vld [vmem:[#allocation6 + $0x998] sm:$0xff] }
 0x3b1   :  { %6464 = vmatprep.subr.bf16.mxu0 %v6463_v53  ;;  %6656 = vmatprep.subr.bf16.mxu1 %v6655_v36  ;;  %v6481_v53 = vpack.c.bf16 %v1777_v10, %v1771_v26  ;;  %v6673_v36 = vpack.c.bf16 %v1779_v24, %v1773_v14  ;;  %v6483_v3 = vpack.c.bf16 %v1790_v39, %v1784_v29  ;;  %v1834_v26 = vld [vmem:[#allocation6 + $0xaf8] sm:$0xff]  ;;  %v1840_v10 = vld [vmem:[#allocation6 + $0xb28] sm:$0xff]  ;;  %v1831_v14 = vld [vmem:[#allocation6 + $0xae0] sm:$0xff] }
 0x3b2   :  { %v1837_v24 = vld [vmem:[#allocation6 + $0xb10] sm:$0xff]  ;;  %v6691_v39 = vpack.c.bf16 %v1840_v10, %v1834_v26  ;;  %v8669_v26 = vcombine.high %v8665_v0, %v8665_v0  ;;  %v1887_v10 = vld [vmem:[#allocation6 + $0xca0] sm:$0xff] }
 0x3b4   :  { %6466 = vmatpush1.bf16.msra.mxu0 %v6465_v23  ;;  %6658 = vmatpush1.bf16.msra.mxu1 %v6657_v46  ;;  %v1796_v23 = vld [vmem:[#allocation6 + $0x9c8] sm:$0xff]  ;;  %v1802_v46 = vld [vmem:[#allocation6 + $0x9f8] sm:$0xff] }
 0x3b5   :  { %6468 = vmatprep.subr.bf16.mxu0 %v6467_v20  ;;  %6660 = vmatprep.subr.bf16.mxu1 %v6659_v54  ;;  %v6485_v20 = vpack.c.bf16 %v1789_v55, %v1783_v37  ;;  %v6677_v54 = vpack.c.bf16 %v1791_v6, %v1785_v40  ;;  %v6487_v27 = vpack.c.bf16 %v1802_v46, %v1796_v23  ;;  %v1846_v37 = vld [vmem:[#allocation6 + $0xb58] sm:$0xff]  ;;  %v1852_v55 = vld [vmem:[#allocation6 + $0xb88] sm:$0xff]  ;;  %v1843_v40 = vld [vmem:[#allocation6 + $0xb40] sm:$0xff] }
 0x3b6   :  { %v1849_v6 = vld [vmem:[#allocation6 + $0xb70] sm:$0xff]  ;;  %v6695_v46 = vpack.c.bf16 %v1852_v55, %v1846_v37  ;;  %v1899_v55 = vld [vmem:[#allocation6 + $0xd00] sm:$0xff] }
 0x3b8   :  { %6470 = vmatpush1.bf16.msra.mxu0 %v6469_v25  ;;  %6662 = vmatpush1.bf16.msra.mxu1 %v6661_v49  ;;  %v1808_v25 = vld [vmem:[#allocation6 + $0xa28] sm:$0xff]  ;;  %v1814_v49 = vld [vmem:[#allocation6 + $0xa58] sm:$0xff] }
 0x3b9   :  { %6472 = vmatprep.subr.bf16.mxu0 %v6471_v2  ;;  %6664 = vmatprep.subr.bf16.mxu1 %v6663_v15  ;;  %v6489_v2 = vpack.c.bf16 %v1801_v5, %v1795_v59  ;;  %v6681_v15 = vpack.c.bf16 %v1803_v48, %v1797_v7  ;;  %v6491_v22 = vpack.c.bf16 %v1814_v49, %v1808_v25  ;;  %v1858_v59 = vld [vmem:[#allocation6 + $0xbb8] sm:$0xff]  ;;  %v1864_v5 = vld [vmem:[#allocation6 + $0xbe8] sm:$0xff]  ;;  %v1855_v7 = vld [vmem:[#allocation6 + $0xba0] sm:$0xff] }
 0x3ba   :  { %v1861_v48 = vld [vmem:[#allocation6 + $0xbd0] sm:$0xff]  ;;  %v6699_v49 = vpack.c.bf16 %v1864_v5, %v1858_v59  ;;  %v1911_v5 = vld [vmem:[#allocation6 + $0xd60] sm:$0xff] }
 0x3bc   :  { %6474 = vmatpush1.bf16.msra.mxu0 %v6473_v42  ;;  %6666 = vmatpush1.bf16.msra.mxu1 %v6665_v47  ;;  %v1820_v42 = vld [vmem:[#allocation6 + $0xa88] sm:$0xff]  ;;  %v1826_v47 = vld [vmem:[#allocation6 + $0xab8] sm:$0xff] }
 0x3bd   :  { %6476 = vmatprep.subr.bf16.mxu0 %v6475_v50  ;;  %6668 = vmatprep.subr.bf16.mxu1 %v6667_v51  ;;  %v6493_v50 = vpack.c.bf16 %v1813_v18, %v1807_v12  ;;  %v6685_v51 = vpack.c.bf16 %v1815_v41, %v1809_v31  ;;  %v6495_v57 = vpack.c.bf16 %v1826_v47, %v1820_v42  ;;  %v1870_v12 = vld [vmem:[#allocation6 + $0xc18] sm:$0xff]  ;;  %v1876_v18 = vld [vmem:[#allocation6 + $0xc48] sm:$0xff]  ;;  %v1867_v42 = vld [vmem:[#allocation6 + $0xc00] sm:$0xff] }
 0x3be   :  { %v6703_v41 = vpack.c.bf16 %v1876_v18, %v1870_v12  ;;  %v1873_v47 = vld [vmem:[#allocation6 + $0xc30] sm:$0xff]  ;;  %v1923_v18 = vld [vmem:[#allocation6 + $0xdc0] sm:$0xff] }
 0x3c0   :  { %6478 = vmatpush1.bf16.msra.mxu0 %v6477_v61  ;;  %6670 = vmatpush1.bf16.msra.mxu1 %v6669_v9  ;;  %v1832_v61 = vld [vmem:[#allocation6 + $0xae8] sm:$0xff]  ;;  %v1838_v9 = vld [vmem:[#allocation6 + $0xb18] sm:$0xff] }
 0x3c1   :  { %6480 = vmatprep.subr.bf16.mxu0 %v6479_v11  ;;  %6672 = vmatprep.subr.bf16.mxu1 %v6671_v34  ;;  %v6497_v11 = vpack.c.bf16 %v1825_v16, %v1819_v52  ;;  %v6689_v34 = vpack.c.bf16 %v1827_v60, %v1821_v21  ;;  %v6499_v29 = vpack.c.bf16 %v1838_v9, %v1832_v61  ;;  %v1886_v52 = vld [vmem:[#allocation6 + $0xc98] sm:$0xff]  ;;  %v1879_v60 = vld [vmem:[#allocation6 + $0xc60] sm:$0xff]  ;;  %v1885_v61 = vld [vmem:[#allocation6 + $0xc90] sm:$0xff] }
 0x3c2   :  { %v1882_v16 = vld [vmem:[#allocation6 + $0xc78] sm:$0xff]  ;;  %v1881_v9 = vld [vmem:[#allocation6 + $0xc70] sm:$0xff] }
 0x3c4   :  { %6482 = vmatpush1.bf16.msra.mxu0 %v6481_v53  ;;  %6674 = vmatpush1.bf16.msra.mxu1 %v6673_v36  ;;  %v1844_v53 = vld [vmem:[#allocation6 + $0xb48] sm:$0xff]  ;;  %v1850_v36 = vld [vmem:[#allocation6 + $0xb78] sm:$0xff] }
 0x3c5   :  { %6484 = vmatprep.subr.bf16.mxu0 %v6483_v3  ;;  %6676 = vmatprep.subr.bf16.mxu1 %v6675_v44  ;;  %v6501_v3 = vpack.c.bf16 %v1837_v24, %v1831_v14  ;;  %v6693_v44 = vpack.c.bf16 %v1839_v35, %v1833_v32  ;;  %v6503_v23 = vpack.c.bf16 %v1850_v36, %v1844_v53  ;;  %v1894_v14 = vld [vmem:[#allocation6 + $0xcd8] sm:$0xff]  ;;  %v1900_v24 = vld [vmem:[#allocation6 + $0xd08] sm:$0xff]  ;;  %v1891_v35 = vld [vmem:[#allocation6 + $0xcc0] sm:$0xff] }
 0x3c6   :  { %v1897_v53 = vld [vmem:[#allocation6 + $0xcf0] sm:$0xff]  ;;  %v6711_v37 = vpack.c.bf16 %v1900_v24, %v1894_v14  ;;  %v1947_v24 = vld [vmem:[#allocation6 + $0xe80] sm:$0xff] }
 0x3c7   :  { %v1893_v36 = vld [vmem:[#allocation6 + $0xcd0] sm:$0xff] }
 0x3c8   :  { %6486 = vmatpush1.bf16.msra.mxu0 %v6485_v20  ;;  %6678 = vmatpush1.bf16.msra.mxu1 %v6677_v54  ;;  %v1856_v20 = vld [vmem:[#allocation6 + $0xba8] sm:$0xff]  ;;  %v1862_v54 = vld [vmem:[#allocation6 + $0xbd8] sm:$0xff] }
 0x3c9   :  { %6488 = vmatprep.subr.bf16.mxu0 %v6487_v27  ;;  %6680 = vmatprep.subr.bf16.mxu1 %v6679_v33  ;;  %v6505_v27 = vpack.c.bf16 %v1849_v6, %v1843_v40  ;;  %v6697_v33 = vpack.c.bf16 %v1851_v62, %v1845_v28  ;;  %v6507_v25 = vpack.c.bf16 %v1862_v54, %v1856_v20  ;;  %v1906_v40 = vld [vmem:[#allocation6 + $0xd38] sm:$0xff]  ;;  %v1912_v6 = vld [vmem:[#allocation6 + $0xd68] sm:$0xff]  ;;  %v1903_v62 = vld [vmem:[#allocation6 + $0xd20] sm:$0xff] }
 0x3ca   :  { %v1909_v20 = vld [vmem:[#allocation6 + $0xd50] sm:$0xff]  ;;  %v6715_v59 = vpack.c.bf16 %v1912_v6, %v1906_v40  ;;  %v1959_v6 = vld [vmem:[#allocation6 + $0xee0] sm:$0xff] }
 0x3cb   :  { %v1905_v54 = vld [vmem:[#allocation6 + $0xd30] sm:$0xff] }
 0x3cc   :  { %6490 = vmatpush1.bf16.msra.mxu0 %v6489_v2  ;;  %6682 = vmatpush1.bf16.msra.mxu1 %v6681_v15  ;;  %v1868_v2 = vld [vmem:[#allocation6 + $0xc08] sm:$0xff]  ;;  %v1874_v15 = vld [vmem:[#allocation6 + $0xc38] sm:$0xff] }
 0x3cd   :  { %6492 = vmatprep.subr.bf16.mxu0 %v6491_v22  ;;  %6684 = vmatprep.subr.bf16.mxu1 %v6683_v38  ;;  %v6509_v22 = vpack.c.bf16 %v1861_v48, %v1855_v7  ;;  %v6701_v38 = vpack.c.bf16 %v1863_v1, %v1857_v56  ;;  %v6511_v31 = vpack.c.bf16 %v1874_v15, %v1868_v2  ;;  %v1918_v7 = vld [vmem:[#allocation6 + $0xd98] sm:$0xff]  ;;  %v1924_v48 = vld [vmem:[#allocation6 + $0xdc8] sm:$0xff]  ;;  %v1915_v1 = vld [vmem:[#allocation6 + $0xd80] sm:$0xff] }
 0x3ce   :  { %v1921_v2 = vld [vmem:[#allocation6 + $0xdb0] sm:$0xff]  ;;  %v6719_v12 = vpack.c.bf16 %v1924_v48, %v1918_v7  ;;  %v1971_v48 = vld [vmem:[#allocation6 + $0xf40] sm:$0xff] }
 0x3cf   :  { %v1917_v15 = vld [vmem:[#allocation6 + $0xd90] sm:$0xff] }
 0x3d0   :  { %6494 = vmatpush1.bf16.msra.mxu0 %v6493_v50  ;;  %6686 = vmatpush1.bf16.msra.mxu1 %v6685_v51  ;;  %v1875_v50 = vld [vmem:[#allocation6 + $0xc40] sm:$0xff]  ;;  %v1880_v51 = vld [vmem:[#allocation6 + $0xc68] sm:$0xff] }
 0x3d1   :  { %6496 = vmatprep.subr.bf16.mxu0 %v6495_v57  ;;  %6688 = vmatprep.subr.bf16.mxu1 %v6687_v58  ;;  %v1888_v57 = vld [vmem:[#allocation6 + $0xca8] sm:$0xff]  ;;  %v6513_v58 = vpack.c.bf16 %v1873_v47, %v1867_v42  ;;  %v6705_v21 = vpack.c.bf16 %v1875_v50, %v1869_v8  ;;  %v6515_v19 = vpack.c.bf16 %v1886_v52, %v1880_v51  ;;  %v1927_v50 = vld [vmem:[#allocation6 + $0xde0] sm:$0xff]  ;;  %v1933_v51 = vld [vmem:[#allocation6 + $0xe10] sm:$0xff] }
 0x3d2   :  { %v6707_v4 = vpack.c.bf16 %v1888_v57, %v1882_v16  ;;  %v6529_v42 = vpack.c.bf16 %v1921_v2, %v1915_v1  ;;  %v6721_v47 = vpack.c.bf16 %v1923_v18, %v1917_v15  ;;  %v1929_v52 = vld [vmem:[#allocation6 + $0xdf0] sm:$0xff]  ;;  %v1935_v57 = vld [vmem:[#allocation6 + $0xe20] sm:$0xff]  ;;  %v1984_v1 = vld [vmem:[#allocation6 + $0xfa8] sm:$0xff] }
 0x3d3   :  { %v1975_v18 = vld [vmem:[#allocation6 + $0xf60] sm:$0xff] }
 0x3d4   :  { %6498 = vmatpush1.bf16.msra.mxu0 %v6497_v11  ;;  %6690 = vmatpush1.bf16.msra.mxu1 %v6689_v34  ;;  %v1892_v11 = vld [vmem:[#allocation6 + $0xcc8] sm:$0xff]  ;;  %v1898_v34 = vld [vmem:[#allocation6 + $0xcf8] sm:$0xff] }
 0x3d5   :  { %6500 = vmatprep.subr.bf16.mxu0 %v6499_v29  ;;  %6692 = vmatprep.subr.bf16.mxu1 %v6691_v39  ;;  %v6517_v29 = vpack.c.bf16 %v1885_v61, %v1879_v60  ;;  %v6709_v39 = vpack.c.bf16 %v1887_v10, %v1881_v9  ;;  %v6519_v32 = vpack.c.bf16 %v1898_v34, %v1892_v11  ;;  %v1942_v60 = vld [vmem:[#allocation6 + $0xe58] sm:$0xff]  ;;  %v1948_v61 = vld [vmem:[#allocation6 + $0xe88] sm:$0xff]  ;;  %v1939_v10 = vld [vmem:[#allocation6 + $0xe40] sm:$0xff] }
 0x3d6   :  { %v6533_v9 = vpack.c.bf16 %v1933_v51, %v1927_v50  ;;  %v1945_v11 = vld [vmem:[#allocation6 + $0xe70] sm:$0xff]  ;;  %v6727_v14 = vpack.c.bf16 %v1948_v61, %v1942_v60  ;;  %v1996_v50 = vld [vmem:[#allocation6 + $0x1008] sm:$0xff]  ;;  %v1995_v61 = vld [vmem:[#allocation6 + $0x1000] sm:$0xff] }
 0x3d7   :  { %v1941_v34 = vld [vmem:[#allocation6 + $0xe50] sm:$0xff] }
 0x3d8   :  { %6502 = vmatpush1.bf16.msra.mxu0 %v6501_v3  ;;  %6694 = vmatpush1.bf16.msra.mxu1 %v6693_v44  ;;  %v1904_v3 = vld [vmem:[#allocation6 + $0xd28] sm:$0xff]  ;;  %v1910_v44 = vld [vmem:[#allocation6 + $0xd58] sm:$0xff] }
 0x3d9   :  { %6504 = vmatprep.subr.bf16.mxu0 %v6503_v23  ;;  %6696 = vmatprep.subr.bf16.mxu1 %v6695_v46  ;;  %v6521_v23 = vpack.c.bf16 %v1897_v53, %v1891_v35  ;;  %v6713_v46 = vpack.c.bf16 %v1899_v55, %v1893_v36  ;;  %v6523_v28 = vpack.c.bf16 %v1910_v44, %v1904_v3  ;;  %v1960_v35 = vld [vmem:[#allocation6 + $0xee8] sm:$0xff]  ;;  %v1951_v55 = vld [vmem:[#allocation6 + $0xea0] sm:$0xff]  ;;  %v1957_v3 = vld [vmem:[#allocation6 + $0xed0] sm:$0xff] }
 0x3da   :  { %v6537_v53 = vpack.c.bf16 %v1945_v11, %v1939_v10  ;;  %v6729_v36 = vpack.c.bf16 %v1947_v24, %v1941_v34  ;;  %v1953_v44 = vld [vmem:[#allocation6 + $0xeb0] sm:$0xff]  ;;  %v2008_v10 = vld [vmem:[#allocation6 + $0x1068] sm:$0xff]  ;;  %v1999_v24 = vld [vmem:[#allocation6 + $0x1020] sm:$0xff] }
 0x3dc   :  { %6506 = vmatpush1.bf16.msra.mxu0 %v6505_v27  ;;  %6698 = vmatpush1.bf16.msra.mxu1 %v6697_v33  ;;  %v1916_v27 = vld [vmem:[#allocation6 + $0xd88] sm:$0xff]  ;;  %v1922_v33 = vld [vmem:[#allocation6 + $0xdb8] sm:$0xff] }
 0x3dd   :  { %6508 = vmatprep.subr.bf16.mxu0 %v6507_v25  ;;  %6700 = vmatprep.subr.bf16.mxu1 %v6699_v49  ;;  %v6525_v25 = vpack.c.bf16 %v1909_v20, %v1903_v62  ;;  %v6717_v49 = vpack.c.bf16 %v1911_v5, %v1905_v54  ;;  %v6527_v56 = vpack.c.bf16 %v1922_v33, %v1916_v27  ;;  %v1972_v62 = vld [vmem:[#allocation6 + $0xf48] sm:$0xff]  ;;  %v1963_v5 = vld [vmem:[#allocation6 + $0xf00] sm:$0xff]  ;;  %v1969_v27 = vld [vmem:[#allocation6 + $0xf30] sm:$0xff] }
 0x3de   :  { %v6541_v20 = vpack.c.bf16 %v1957_v3, %v1951_v55  ;;  %v6733_v54 = vpack.c.bf16 %v1959_v6, %v1953_v44  ;;  %v1965_v33 = vld [vmem:[#allocation6 + $0xf10] sm:$0xff]  ;;  %v6545_v2 = vpack.c.bf16 %v1969_v27, %v1963_v5  ;;  %v2020_v55 = vld [vmem:[#allocation6 + $0x10c8] sm:$0xff]  ;;  %v2011_v6 = vld [vmem:[#allocation6 + $0x1080] sm:$0xff] }
 0x3df   :  { %v6737_v15 = vpack.c.bf16 %v1971_v48, %v1965_v33  ;;  %v2032_v5 = vld [vmem:[#allocation6 + $0x1128] sm:$0xff]  ;;  %v2023_v48 = vld [vmem:[#allocation6 + $0x10e0] sm:$0xff] }
 0x3e0   :  { %6510 = vmatpush1.bf16.msra.mxu0 %v6509_v22  ;;  %6702 = vmatpush1.bf16.msra.mxu1 %v6701_v38  ;;  %v1928_v22 = vld [vmem:[#allocation6 + $0xde8] sm:$0xff]  ;;  %v1934_v38 = vld [vmem:[#allocation6 + $0xe18] sm:$0xff] }
 0x3e1   :  { %6512 = vmatprep.subr.bf16.mxu0 %v6511_v31  ;;  %6704 = vmatprep.subr.bf16.mxu1 %v6703_v41  ;;  %v1930_v31 = vld [vmem:[#allocation6 + $0xdf8] sm:$0xff]  ;;  %v1936_v41 = vld [vmem:[#allocation6 + $0xe28] sm:$0xff]  ;;  %v6531_v8 = vpack.c.bf16 %v1934_v38, %v1928_v22  ;;  %v1981_v22 = vld [vmem:[#allocation6 + $0xf90] sm:$0xff] }
 0x3e2   :  { %v6723_v16 = vpack.c.bf16 %v1936_v41, %v1930_v31  ;;  %v1977_v38 = vld [vmem:[#allocation6 + $0xf70] sm:$0xff]  ;;  %v1983_v41 = vld [vmem:[#allocation6 + $0xfa0] sm:$0xff]  ;;  %v6549_v51 = vpack.c.bf16 %v1981_v22, %v1975_v18  ;;  %v2044_v18 = vld [vmem:[#allocation6 + $0x1188] sm:$0xff] }
 0x3e3   :  { %2228 = vmatmul.mubr.f32.vlgmr.msra.gmra.mrb[12].mxu0 %v8651_v45  ;;  %2441 = vmatmul.mubr.f32.vlgmr.msra.gmra.mrb[12].mxu1 %v8651_v45 }
 0x3e4   :  { %6514 = vmatpush1.bf16.msra.mxu0 %v6513_v58  ;;  %2298 = vmatprep.mubr.f32.mxu0 %v8669_v26  ;;  %v1940_v58 = vld [vmem:[#allocation6 + $0xe48] sm:$0xff] }
 0x3e5   :  { %6706 = vmatpush1.bf16.msra.mxu1 %v6705_v21  ;;  %2511 = vmatprep.mubr.f32.mxu1 %v8669_v26  ;;  %v1946_v21 = vld [vmem:[#allocation6 + $0xe78] sm:$0xff] }
 0x3e6   :  { %6516 = vmatprep.subr.bf16.mxu0 %v6515_v19  ;;  %6708 = vmatprep.subr.bf16.mxu1 %v6707_v4  ;;  %v6725_v19 = vpack.c.bf16 %v1935_v57, %v1929_v52  ;;  %v6535_v4 = vpack.c.bf16 %v1946_v21, %v1940_v58  ;;  %v6741_v52 = vpack.c.bf16 %v1983_v41, %v1977_v38  ;;  %v1987_v57 = vld [vmem:[#allocation6 + $0xfc0] sm:$0xff]  ;;  %v1993_v58 = vld [vmem:[#allocation6 + $0xff0] sm:$0xff] }
 0x3e7   :  { %v1989_v21 = vld [vmem:[#allocation6 + $0xfd0] sm:$0xff]  ;;  %v6553_v11 = vpack.c.bf16 %v1993_v58, %v1987_v57  ;;  %v2035_v41 = vld [vmem:[#allocation6 + $0x1140] sm:$0xff]  ;;  %v2056_v57 = vld [vmem:[#allocation6 + $0x11e8] sm:$0xff] }
 0x3e8   :  { %6518 = vmatpush1.bf16.msra.mxu0 %v6517_v29  ;;  %v1952_v29 = vld [vmem:[#allocation6 + $0xea8] sm:$0xff]  ;;  %v6745_v34 = vpack.c.bf16 %v1995_v61, %v1989_v21  ;;  %v2047_v61 = vld [vmem:[#allocation6 + $0x11a0] sm:$0xff] }
 0x3e9   :  { %6710 = vmatpush1.bf16.msra.mxu1 %v6709_v39  ;;  %6520 = vmatprep.subr.bf16.mxu0 %v6519_v32  ;;  %v1958_v39 = vld [vmem:[#allocation6 + $0xed8] sm:$0xff] }
 0x3ea   :  { %6712 = vmatprep.subr.bf16.mxu1 %v6711_v37  ;;  %v1954_v32 = vld [vmem:[#allocation6 + $0xeb8] sm:$0xff]  ;;  %v6539_v37 = vpack.c.bf16 %v1958_v39, %v1952_v29  ;;  %v2005_v29 = vld [vmem:[#allocation6 + $0x1050] sm:$0xff] }
 0x3eb   :  { %v6731_v40 = vpack.c.bf16 %v1960_v35, %v1954_v32  ;;  %v2001_v39 = vld [vmem:[#allocation6 + $0x1030] sm:$0xff]  ;;  %v2007_v35 = vld [vmem:[#allocation6 + $0x1060] sm:$0xff]  ;;  %v6557_v3 = vpack.c.bf16 %v2005_v29, %v1999_v24 }
 0x3ec   :  { %6522 = vmatpush1.bf16.msra.mxu0 %v6521_v23  ;;  %v1964_v23 = vld [vmem:[#allocation6 + $0xf08] sm:$0xff]  ;;  %v6749_v44 = vpack.c.bf16 %v2007_v35, %v2001_v39  ;;  %v1487_v39 = vld [vmem:[#allocation6 + $0x20] sm:$0xff] }
 0x3ed   :  { %6714 = vmatpush1.bf16.msra.mxu1 %v6713_v46  ;;  %6524 = vmatprep.subr.bf16.mxu0 %v6523_v28  ;;  %v1970_v46 = vld [vmem:[#allocation6 + $0xf38] sm:$0xff]  ;;  %v1500_v35 = vld [vmem:[#allocation6 + $0x88] sm:$0xff] }
 0x3ee   :  { %6716 = vmatprep.subr.bf16.mxu1 %v6715_v59  ;;  %v1966_v28 = vld [vmem:[#allocation6 + $0xf18] sm:$0xff]  ;;  %v6543_v59 = vpack.c.bf16 %v1970_v46, %v1964_v23  ;;  %v2017_v23 = vld [vmem:[#allocation6 + $0x10b0] sm:$0xff] }
 0x3ef   :  { %v6735_v7 = vpack.c.bf16 %v1972_v62, %v1966_v28  ;;  %v2013_v46 = vld [vmem:[#allocation6 + $0x1090] sm:$0xff]  ;;  %v2019_v62 = vld [vmem:[#allocation6 + $0x10c0] sm:$0xff]  ;;  %v6561_v27 = vpack.c.bf16 %v2017_v23, %v2011_v6 }
 0x3f0   :  { %6526 = vmatpush1.bf16.msra.mxu0 %v6525_v25  ;;  %v1976_v25 = vld [vmem:[#allocation6 + $0xf68] sm:$0xff]  ;;  %v6753_v33 = vpack.c.bf16 %v2019_v62, %v2013_v46  ;;  %v1511_v46 = vld [vmem:[#allocation6 + $0xe0] sm:$0xff] }
 0x3f1   :  { %6718 = vmatpush1.bf16.msra.mxu1 %v6717_v49  ;;  %6528 = vmatprep.subr.bf16.mxu0 %v6527_v56  ;;  %v1982_v49 = vld [vmem:[#allocation6 + $0xf98] sm:$0xff]  ;;  %v1524_v62 = vld [vmem:[#allocation6 + $0x148] sm:$0xff] }
 0x3f2   :  { %6720 = vmatprep.subr.bf16.mxu1 %v6719_v12  ;;  %v1978_v56 = vld [vmem:[#allocation6 + $0xf78] sm:$0xff]  ;;  %v6547_v12 = vpack.c.bf16 %v1982_v49, %v1976_v25  ;;  %v2029_v25 = vld [vmem:[#allocation6 + $0x1110] sm:$0xff] }
 0x3f3   :  { %v6739_v31 = vpack.c.bf16 %v1984_v1, %v1978_v56  ;;  %v2025_v49 = vld [vmem:[#allocation6 + $0x10f0] sm:$0xff]  ;;  %v2031_v1 = vld [vmem:[#allocation6 + $0x1120] sm:$0xff]  ;;  %v6565_v22 = vpack.c.bf16 %v2029_v25, %v2023_v48 }
 0x3f4   :  { %6530 = vmatpush1.bf16.msra.mxu0 %v6529_v42  ;;  %v1988_v42 = vld [vmem:[#allocation6 + $0xfc8] sm:$0xff]  ;;  %v6757_v38 = vpack.c.bf16 %v2031_v1, %v2025_v49  ;;  %v1535_v49 = vld [vmem:[#allocation6 + $0x1a0] sm:$0xff]  ;;  %v1554_v1 = vld [vmem:[#allocation6 + $0x238] sm:$0xff] }
 0x3f5   :  { %6722 = vmatpush1.bf16.msra.mxu1 %v6721_v47  ;;  %6532 = vmatprep.subr.bf16.mxu0 %v6531_v8  ;;  %v1994_v47 = vld [vmem:[#allocation6 + $0xff8] sm:$0xff] }
 0x3f6   :  { %6724 = vmatprep.subr.bf16.mxu1 %v6723_v16  ;;  %v1990_v8 = vld [vmem:[#allocation6 + $0xfd8] sm:$0xff]  ;;  %v6551_v16 = vpack.c.bf16 %v1994_v47, %v1988_v42  ;;  %v2041_v42 = vld [vmem:[#allocation6 + $0x1170] sm:$0xff] }
 0x3f7   :  { %v6743_v60 = vpack.c.bf16 %v1996_v50, %v1990_v8  ;;  %v2037_v47 = vld [vmem:[#allocation6 + $0x1150] sm:$0xff]  ;;  %v2043_v50 = vld [vmem:[#allocation6 + $0x1180] sm:$0xff]  ;;  %v6569_v58 = vpack.c.bf16 %v2041_v42, %v2035_v41 }
 0x3f8   :  { %6534 = vmatpush1.bf16.msra.mxu0 %v6533_v9  ;;  %v2000_v9 = vld [vmem:[#allocation6 + $0x1028] sm:$0xff]  ;;  %v6761_v21 = vpack.c.bf16 %v2043_v50, %v2037_v47  ;;  %v1559_v42 = vld [vmem:[#allocation6 + $0x260] sm:$0xff]  ;;  %v1565_v47 = vld [vmem:[#allocation6 + $0x290] sm:$0xff] }
 0x3f9   :  { %6726 = vmatpush1.bf16.msra.mxu1 %v6725_v19  ;;  %6536 = vmatprep.subr.bf16.mxu0 %v6535_v4  ;;  %v2006_v19 = vld [vmem:[#allocation6 + $0x1058] sm:$0xff] }
 0x3fa   :  { %6728 = vmatprep.subr.bf16.mxu1 %v6727_v14  ;;  %v2002_v4 = vld [vmem:[#allocation6 + $0x1038] sm:$0xff]  ;;  %v6555_v14 = vpack.c.bf16 %v2006_v19, %v2000_v9  ;;  %v2053_v9 = vld [vmem:[#allocation6 + $0x11d0] sm:$0xff] }
 0x3fb   :  { %v6747_v32 = vpack.c.bf16 %v2008_v10, %v2002_v4  ;;  %v2049_v19 = vld [vmem:[#allocation6 + $0x11b0] sm:$0xff]  ;;  %v2055_v10 = vld [vmem:[#allocation6 + $0x11e0] sm:$0xff]  ;;  %v1578_v50 = vld [vmem:[#allocation6 + $0x2f8] sm:$0xff] }
 0x3fc   :  { %6538 = vmatpush1.bf16.msra.mxu0 %v6537_v53  ;;  %v2012_v53 = vld [vmem:[#allocation6 + $0x1088] sm:$0xff]  ;;  %v6765_v24 = vpack.c.bf16 %v2055_v10, %v2049_v19  ;;  %v1589_v19 = vld [vmem:[#allocation6 + $0x350] sm:$0xff]  ;;  %v1602_v10 = vld [vmem:[#allocation6 + $0x3b8] sm:$0xff] }
 0x3fd   :  { %6730 = vmatpush1.bf16.msra.mxu1 %v6729_v36  ;;  %6540 = vmatprep.subr.bf16.mxu0 %v6539_v37  ;;  %v2018_v36 = vld [vmem:[#allocation6 + $0x10b8] sm:$0xff] }
 0x3fe   :  { %6732 = vmatprep.subr.bf16.mxu1 %v6731_v40  ;;  %v2014_v37 = vld [vmem:[#allocation6 + $0x1098] sm:$0xff]  ;;  %v6559_v40 = vpack.c.bf16 %v2018_v36, %v2012_v53 }
 0x3ff   :  { %v6751_v28 = vpack.c.bf16 %v2020_v55, %v2014_v37  ;;  %v1506_v53 = vld [vmem:[#allocation6 + $0xb8] sm:$0xff]  ;;  %v1499_v55 = vld [vmem:[#allocation6 + $0x80] sm:$0xff] }
 0x400   :  { %6542 = vmatpush1.bf16.msra.mxu0 %v6541_v20  ;;  %v2024_v20 = vld [vmem:[#allocation6 + $0x10e8] sm:$0xff]  ;;  %v6771_v37 = vpack.c.bf16 %v1506_v53, %v1500_v35  ;;  %v1607_v53 = vld [vmem:[#allocation6 + $0x3e0] sm:$0xff] }
 0x401   :  { %6734 = vmatpush1.bf16.msra.mxu1 %v6733_v54  ;;  %6544 = vmatprep.subr.bf16.mxu0 %v6543_v59  ;;  %v2030_v54 = vld [vmem:[#allocation6 + $0x1118] sm:$0xff] }
 0x402   :  { %6736 = vmatprep.subr.bf16.mxu1 %v6735_v7  ;;  %v2026_v59 = vld [vmem:[#allocation6 + $0x10f8] sm:$0xff]  ;;  %v6563_v7 = vpack.c.bf16 %v2030_v54, %v2024_v20 }
 0x403   :  { %v6755_v56 = vpack.c.bf16 %v2032_v5, %v2026_v59  ;;  %v1530_v20 = vld [vmem:[#allocation6 + $0x178] sm:$0xff]  ;;  %v1523_v5 = vld [vmem:[#allocation6 + $0x140] sm:$0xff] }
 0x404   :  { %6546 = vmatpush1.bf16.msra.mxu0 %v6545_v2  ;;  %v2036_v2 = vld [vmem:[#allocation6 + $0x1148] sm:$0xff]  ;;  %v6779_v59 = vpack.c.bf16 %v1530_v20, %v1524_v62  ;;  %v1631_v20 = vld [vmem:[#allocation6 + $0x4a0] sm:$0xff] }
 0x405   :  { %6738 = vmatpush1.bf16.msra.mxu1 %v6737_v15  ;;  %6548 = vmatprep.subr.bf16.mxu0 %v6547_v12  ;;  %v2042_v15 = vld [vmem:[#allocation6 + $0x1178] sm:$0xff] }
 0x406   :  { %6740 = vmatprep.subr.bf16.mxu1 %v6739_v31  ;;  %v2038_v12 = vld [vmem:[#allocation6 + $0x1158] sm:$0xff]  ;;  %v6567_v31 = vpack.c.bf16 %v2042_v15, %v2036_v2 }
 0x407   :  { %v6759_v8 = vpack.c.bf16 %v2044_v18, %v2038_v12  ;;  %v1547_v12 = vld [vmem:[#allocation6 + $0x200] sm:$0xff]  ;;  %v1553_v18 = vld [vmem:[#allocation6 + $0x230] sm:$0xff] }
 0x408   :  { %6550 = vmatpush1.bf16.msra.mxu0 %v6549_v51  ;;  %v2048_v51 = vld [vmem:[#allocation6 + $0x11a8] sm:$0xff] }
 0x409   :  { %6742 = vmatpush1.bf16.msra.mxu1 %v6741_v52  ;;  %6552 = vmatprep.subr.bf16.mxu0 %v6551_v16  ;;  %v2054_v52 = vld [vmem:[#allocation6 + $0x11d8] sm:$0xff] }
 0x40a   :  { %6744 = vmatprep.subr.bf16.mxu1 %v6743_v60  ;;  %v2050_v16 = vld [vmem:[#allocation6 + $0x11b8] sm:$0xff]  ;;  %v6571_v60 = vpack.c.bf16 %v2054_v52, %v2048_v51  ;;  %v6793_v51 = vpack.c.bf16 %v1565_v47, %v1559_v42 }
 0x40b   :  { %v6763_v4 = vpack.c.bf16 %v2056_v57, %v2050_v16  ;;  %v1571_v16 = vld [vmem:[#allocation6 + $0x2c0] sm:$0xff]  ;;  %v1577_v57 = vld [vmem:[#allocation6 + $0x2f0] sm:$0xff] }
 0x40c   :  { %6554 = vmatpush1.bf16.msra.mxu0 %v6553_v11  ;;  %v1488_v11 = vld [vmem:[#allocation6 + $0x28] sm:$0xff] }
 0x40d   :  { %6746 = vmatpush1.bf16.msra.mxu1 %v6745_v34  ;;  %6556 = vmatprep.subr.bf16.mxu0 %v6555_v14  ;;  %v1494_v34 = vld [vmem:[#allocation6 + $0x58] sm:$0xff]  ;;  %v6573_v14 = vpack.c.bf16 %v2053_v9, %v2047_v61  ;;  %v1583_v9 = vld [vmem:[#allocation6 + $0x320] sm:$0xff] }
 0x40e   :  { %6748 = vmatprep.subr.bf16.mxu1 %v6747_v32  ;;  %v6767_v29 = vpack.c.bf16 %v1494_v34, %v1488_v11  ;;  %v1493_v32 = vld [vmem:[#allocation6 + $0x50] sm:$0xff]  ;;  %v6801_v11 = vpack.c.bf16 %v1589_v19, %v1583_v9 }
 0x40f   :  { %v6769_v36 = vpack.c.bf16 %v1493_v32, %v1487_v39  ;;  %v1614_v39 = vld [vmem:[#allocation6 + $0x418] sm:$0xff] }
 0x410   :  { %6558 = vmatpush1.bf16.msra.mxu0 %v6557_v3  ;;  %v1505_v3 = vld [vmem:[#allocation6 + $0xb0] sm:$0xff] }
 0x411   :  { %6750 = vmatpush1.bf16.msra.mxu1 %v6749_v44  ;;  %6560 = vmatprep.subr.bf16.mxu0 %v6559_v40  ;;  %v1512_v44 = vld [vmem:[#allocation6 + $0xe8] sm:$0xff]  ;;  %v1518_v40 = vld [vmem:[#allocation6 + $0x118] sm:$0xff]  ;;  %v6773_v6 = vpack.c.bf16 %v1505_v3, %v1499_v55 }
 0x412   :  { %6752 = vmatprep.subr.bf16.mxu1 %v6751_v28  ;;  %v6775_v23 = vpack.c.bf16 %v1518_v40, %v1512_v44  ;;  %v1517_v28 = vld [vmem:[#allocation6 + $0x110] sm:$0xff]  ;;  %v1626_v55 = vld [vmem:[#allocation6 + $0x478] sm:$0xff]  ;;  %v1619_v40 = vld [vmem:[#allocation6 + $0x440] sm:$0xff] }
 0x413   :  { %v6777_v54 = vpack.c.bf16 %v1517_v28, %v1511_v46  ;;  %v1638_v46 = vld [vmem:[#allocation6 + $0x4d8] sm:$0xff] }
 0x414   :  { %6562 = vmatpush1.bf16.msra.mxu0 %v6561_v27  ;;  %v1529_v27 = vld [vmem:[#allocation6 + $0x170] sm:$0xff] }
 0x415   :  { %6754 = vmatpush1.bf16.msra.mxu1 %v6753_v33  ;;  %6564 = vmatprep.subr.bf16.mxu0 %v6563_v7  ;;  %v1536_v33 = vld [vmem:[#allocation6 + $0x1a8] sm:$0xff]  ;;  %v1542_v7 = vld [vmem:[#allocation6 + $0x1d8] sm:$0xff]  ;;  %v6781_v48 = vpack.c.bf16 %v1529_v27, %v1523_v5 }
 0x416   :  { %6756 = vmatprep.subr.bf16.mxu1 %v6755_v56  ;;  %v6783_v25 = vpack.c.bf16 %v1542_v7, %v1536_v33  ;;  %v1548_v56 = vld [vmem:[#allocation6 + $0x208] sm:$0xff]  ;;  %v1650_v5 = vld [vmem:[#allocation6 + $0x538] sm:$0xff]  ;;  %v1643_v7 = vld [vmem:[#allocation6 + $0x500] sm:$0xff] }
 0x417   :  { %v6787_v15 = vpack.c.bf16 %v1554_v1, %v1548_v56  ;;  %v1655_v1 = vld [vmem:[#allocation6 + $0x560] sm:$0xff] }
 0x418   :  { %6566 = vmatpush1.bf16.msra.mxu0 %v6565_v22  ;;  %v1560_v22 = vld [vmem:[#allocation6 + $0x268] sm:$0xff] }
 0x419   :  { %6758 = vmatpush1.bf16.msra.mxu1 %v6757_v38  ;;  %6568 = vmatprep.subr.bf16.mxu0 %v6567_v31  ;;  %v1566_v38 = vld [vmem:[#allocation6 + $0x298] sm:$0xff]  ;;  %v6789_v31 = vpack.c.bf16 %v1553_v18, %v1547_v12  ;;  %v2747_v18 = vld [vmem:[#allocation7 + $0x80] sm:$0xff] }
 0x41a   :  { %6760 = vmatprep.subr.bf16.mxu1 %v6759_v8  ;;  %v6791_v41 = vpack.c.bf16 %v1566_v38, %v1560_v22  ;;  %v1572_v8 = vld [vmem:[#allocation6 + $0x2c8] sm:$0xff]  ;;  %v1674_v12 = vld [vmem:[#allocation6 + $0x5f8] sm:$0xff] }
 0x41b   :  { %v6795_v52 = vpack.c.bf16 %v1578_v50, %v1572_v8  ;;  %v2748_v22 = vld [vmem:[#allocation7 + $0x88] sm:$0xff]  ;;  %v1667_v50 = vld [vmem:[#allocation6 + $0x5c0] sm:$0xff] }
 0x41c   :  { %6570 = vmatpush1.bf16.msra.mxu0 %v6569_v58  ;;  %v1584_v58 = vld [vmem:[#allocation6 + $0x328] sm:$0xff]  ;;  %v8678_v38 = vpack.c.bf16 %v2748_v22, %v2747_v18  ;;  %v2759_v22 = vld [vmem:[#allocation7 + $0xe0] sm:$0xff] }
 0x41d   :  { %6762 = vmatpush1.bf16.msra.mxu1 %v6761_v21  ;;  %6572 = vmatprep.subr.bf16.mxu0 %v6571_v60  ;;  %v1590_v21 = vld [vmem:[#allocation6 + $0x358] sm:$0xff]  ;;  %v6797_v60 = vpack.c.bf16 %v1577_v57, %v1571_v16  ;;  %v2749_v57 = vld [vmem:[#allocation7 + $0x90] sm:$0xff] }
 0x41e   :  { %6764 = vmatprep.subr.bf16.mxu1 %v6763_v4  ;;  %v6799_v61 = vpack.c.bf16 %v1590_v21, %v1584_v58  ;;  %v1596_v4 = vld [vmem:[#allocation6 + $0x388] sm:$0xff]  ;;  %v1686_v16 = vld [vmem:[#allocation6 + $0x658] sm:$0xff] }
 0x41f   :  { %v6803_v34 = vpack.c.bf16 %v1602_v10, %v1596_v4  ;;  %v2750_v58 = vld [vmem:[#allocation7 + $0x98] sm:$0xff]  ;;  %v1679_v10 = vld [vmem:[#allocation6 + $0x620] sm:$0xff] }
 0x420   :  { %6574 = vmatpush1.bf16.msra.mxu0 %v6573_v14  ;;  %v1595_v14 = vld [vmem:[#allocation6 + $0x380] sm:$0xff]  ;;  %v8684_v21 = vpack.c.bf16 %v2750_v58, %v2749_v57  ;;  %v2744_v58 = vld [vmem:[#allocation7 + $0x68] sm:$0xff] }
 0x421   :  { %6766 = vmatpush1.bf16.msra.mxu1 %v6765_v24  ;;  %6768 = vmatprep.subr.bf16.mxu0 %v6767_v29  ;;  %v1601_v24 = vld [vmem:[#allocation6 + $0x3b0] sm:$0xff]  ;;  %v1608_v29 = vld [vmem:[#allocation6 + $0x3e8] sm:$0xff]  ;;  %v2743_v57 = vld [vmem:[#allocation7 + $0x60] sm:$0xff] }
 0x422   :  { %v6805_v32 = vpack.c.bf16 %v1601_v24, %v1595_v14  ;;  %v6807_v35 = vpack.c.bf16 %v1614_v39, %v1608_v29  ;;  %6960 = vmatprep.subr.bf16.mxu1 %v8678_v38  ;;  %v1698_v14 = vld [vmem:[#allocation6 + $0x6b8] sm:$0xff]  ;;  %v2751_v24 = vld [vmem:[#allocation7 + $0xa0] sm:$0xff]  ;;  %v2752_v29 = vld [vmem:[#allocation7 + $0xa8] sm:$0xff] }
 0x423   :  { %2299 = vmatmul.mubr.f32.vlgmr.msra.gmra.mrb[12].mxu0 %v8665_v0  ;;  %v8690_v39 = vpack.c.bf16 %v2752_v29, %v2751_v24  ;;  %v8718_v24 = vpack.c.bf16 %v2744_v58, %v2743_v57  ;;  %v1800_v57 = vld [vmem:[#allocation6 + $0x9e8] sm:$0xff]  ;;  %v1806_v58 = vld [vmem:[#allocation6 + $0xa18] sm:$0xff] }
 0x424   :  { %2512 = vmatmul.mubr.f32.vlgmr.msra.gmra.mrb[12].mxu1 %v8665_v0  ;;  %6770 = vmatpush1.bf16.msra.mxu0 %v6769_v36  ;;  %v1613_v36 = vld [vmem:[#allocation6 + $0x410] sm:$0xff] }
 0x425   :  { %2582 = vmatprep.mubr.f32.mxu0 %v8648_v13  ;;  %6772 = vmatprep.subr.bf16.mxu0 %v6771_v37  ;;  %v1541_v13 = vld [vmem:[#allocation6 + $0x1d0] sm:$0xff]  ;;  %v1620_v37 = vld [vmem:[#allocation6 + $0x448] sm:$0xff]  ;;  %v6809_v3 = vpack.c.bf16 %v1613_v36, %v1607_v53 }
 0x426   :  { %v6785_v2 = vpack.c.bf16 %v1541_v13, %v1535_v49  ;;  %v6811_v44 = vpack.c.bf16 %v1626_v55, %v1620_v37  ;;  %v1662_v49 = vld [vmem:[#allocation6 + $0x598] sm:$0xff]  ;;  %v1691_v55 = vld [vmem:[#allocation6 + $0x680] sm:$0xff] }
 0x428   :  { %6774 = vmatpush1.bf16.msra.mxu0 %v6773_v6  ;;  %v1625_v6 = vld [vmem:[#allocation6 + $0x470] sm:$0xff] }
 0x429   :  { %6776 = vmatprep.subr.bf16.mxu0 %v6775_v23  ;;  %v1632_v23 = vld [vmem:[#allocation6 + $0x4a8] sm:$0xff]  ;;  %v6813_v28 = vpack.c.bf16 %v1625_v6, %v1619_v40  ;;  %v1710_v40 = vld [vmem:[#allocation6 + $0x718] sm:$0xff]  ;;  %v2753_v6 = vld [vmem:[#allocation7 + $0xb0] sm:$0xff] }
 0x42a   :  { %v6815_v62 = vpack.c.bf16 %v1638_v46, %v1632_v23  ;;  %v2754_v23 = vld [vmem:[#allocation7 + $0xb8] sm:$0xff]  ;;  %v1703_v46 = vld [vmem:[#allocation6 + $0x6e0] sm:$0xff] }
 0x42c   :  { %6778 = vmatpush1.bf16.msra.mxu0 %v6777_v54  ;;  %v1637_v54 = vld [vmem:[#allocation6 + $0x4d0] sm:$0xff] }
 0x42d   :  { %6780 = vmatprep.subr.bf16.mxu0 %v6779_v59  ;;  %v1644_v59 = vld [vmem:[#allocation6 + $0x508] sm:$0xff]  ;;  %v6817_v27 = vpack.c.bf16 %v1637_v54, %v1631_v20  ;;  %v2738_v20 = vld [vmem:[#allocation7 + $0x38] sm:$0xff]  ;;  %v2755_v54 = vld [vmem:[#allocation7 + $0xc0] sm:$0xff] }
 0x42e   :  { %v6819_v33 = vpack.c.bf16 %v1650_v5, %v1644_v59 }
 0x430   :  { %6782 = vmatpush1.bf16.msra.mxu0 %v6781_v48  ;;  %v1649_v48 = vld [vmem:[#allocation6 + $0x530] sm:$0xff] }
 0x431   :  { %6784 = vmatprep.subr.bf16.mxu0 %v6783_v25  ;;  %v1656_v25 = vld [vmem:[#allocation6 + $0x568] sm:$0xff]  ;;  %v6821_v13 = vpack.c.bf16 %v1649_v48, %v1643_v7 }
 0x432   :  { %v6823_v56 = vpack.c.bf16 %v1662_v49, %v1656_v25  ;;  %v2740_v7 = vld [vmem:[#allocation7 + $0x48] sm:$0xff]  ;;  %v1709_v25 = vld [vmem:[#allocation6 + $0x710] sm:$0xff] }
 0x433   :  { %v2757_v49 = vld [vmem:[#allocation7 + $0xd0] sm:$0xff]  ;;  %v6841_v18 = vpack.c.bf16 %v1709_v25, %v1703_v46 }
 0x434   :  { %6786 = vmatpush1.bf16.msra.mxu0 %v6785_v2  ;;  %v1661_v2 = vld [vmem:[#allocation6 + $0x590] sm:$0xff] }
 0x435   :  { %6788 = vmatprep.subr.bf16.mxu0 %v6787_v15  ;;  %v1668_v15 = vld [vmem:[#allocation6 + $0x5c8] sm:$0xff]  ;;  %v6825_v42 = vpack.c.bf16 %v1661_v2, %v1655_v1  ;;  %v1722_v1 = vld [vmem:[#allocation6 + $0x778] sm:$0xff] }
 0x436   :  { %v6827_v8 = vpack.c.bf16 %v1674_v12, %v1668_v15  ;;  %v2741_v15 = vld [vmem:[#allocation7 + $0x50] sm:$0xff]  ;;  %v2742_v12 = vld [vmem:[#allocation7 + $0x58] sm:$0xff] }
 0x438   :  { %6790 = vmatpush1.bf16.msra.mxu0 %v6789_v31  ;;  %v2731_v31 = vld [vmem:[#allocation7] sm:$0xff] }
 0x439   :  { %6792 = vmatprep.subr.bf16.mxu0 %v6791_v41  ;;  %v2732_v41 = vld [vmem:[#allocation7 + $0x8] sm:$0xff] }
 0x43a   :  { %v8680_v47 = vpack.c.bf16 %v2732_v41, %v2731_v31  ;;  %v2760_v31 = vld [vmem:[#allocation7 + $0xe8] sm:$0xff] }
 0x43c   :  { %6794 = vmatpush1.bf16.msra.mxu0 %v6793_v51  ;;  %v1673_v51 = vld [vmem:[#allocation6 + $0x5f0] sm:$0xff]  ;;  %6962 = vmatpush3.bf16.msra.mxu1 %v8680_v47 }
 0x43d   :  { %6796 = vmatprep.subr.bf16.mxu0 %v6795_v52  ;;  %v1680_v52 = vld [vmem:[#allocation6 + $0x628] sm:$0xff]  ;;  %v6829_v9 = vpack.c.bf16 %v1673_v51, %v1667_v50  ;;  %6964 = vmatprep.subr.bf16.mxu1 %v8684_v21  ;;  %v1734_v51 = vld [vmem:[#allocation6 + $0x7d8] sm:$0xff] }
 0x43e   :  { %v6831_v4 = vpack.c.bf16 %v1686_v16, %v1680_v52  ;;  %v1728_v50 = vld [vmem:[#allocation6 + $0x7a8] sm:$0xff]  ;;  %v8712_v52 = vpack.c.bf16 %v2742_v12, %v2741_v15  ;;  %v8715_v16 = vpack.c.bf16 %v2760_v31, %v2759_v22  ;;  %v1781_v22 = vld [vmem:[#allocation6 + $0x950] sm:$0xff] }
 0x43f   :  { %v1788_v31 = vld [vmem:[#allocation6 + $0x988] sm:$0xff] }
 0x440   :  { %6798 = vmatpush1.bf16.msra.mxu0 %v6797_v60  ;;  %v2733_v60 = vld [vmem:[#allocation7 + $0x10] sm:$0xff] }
 0x441   :  { %6800 = vmatprep.subr.bf16.mxu0 %v6799_v61  ;;  %v2734_v61 = vld [vmem:[#allocation7 + $0x18] sm:$0xff] }
 0x442   :  { %v8686_v19 = vpack.c.bf16 %v2734_v61, %v2733_v60  ;;  %v2761_v61 = vld [vmem:[#allocation7 + $0xf0] sm:$0xff] }
 0x444   :  { %6802 = vmatpush1.bf16.msra.mxu0 %v6801_v11  ;;  %v1685_v11 = vld [vmem:[#allocation6 + $0x650] sm:$0xff]  ;;  %6966 = vmatpush3.bf16.msra.mxu1 %v8686_v19 }
 0x445   :  { %6804 = vmatprep.subr.bf16.mxu0 %v6803_v34  ;;  %v1692_v34 = vld [vmem:[#allocation6 + $0x688] sm:$0xff]  ;;  %v6833_v53 = vpack.c.bf16 %v1685_v11, %v1679_v10  ;;  %6968 = vmatprep.subr.bf16.mxu1 %v8690_v39  ;;  %v1727_v10 = vld [vmem:[#allocation6 + $0x7a0] sm:$0xff]  ;;  %v1733_v11 = vld [vmem:[#allocation6 + $0x7d0] sm:$0xff] }
 0x446   :  { %v6835_v37 = vpack.c.bf16 %v1698_v14, %v1692_v34  ;;  %v1740_v34 = vld [vmem:[#allocation6 + $0x808] sm:$0xff]  ;;  %v1746_v14 = vld [vmem:[#allocation6 + $0x838] sm:$0xff] }
 0x448   :  { %6806 = vmatpush1.bf16.msra.mxu0 %v6805_v32  ;;  %v2735_v32 = vld [vmem:[#allocation7 + $0x20] sm:$0xff] }
 0x449   :  { %6808 = vmatprep.subr.bf16.mxu0 %v6807_v35  ;;  %v2736_v35 = vld [vmem:[#allocation7 + $0x28] sm:$0xff] }
 0x44a   :  { %v8692_v36 = vpack.c.bf16 %v2736_v35, %v2735_v32  ;;  %v2745_v32 = vld [vmem:[#allocation7 + $0x70] sm:$0xff]  ;;  %v2746_v35 = vld [vmem:[#allocation7 + $0x78] sm:$0xff] }
 0x44c   :  { %6810 = vmatpush1.bf16.msra.mxu0 %v6809_v3  ;;  %v1697_v3 = vld [vmem:[#allocation6 + $0x6b0] sm:$0xff]  ;;  %6970 = vmatpush3.bf16.msra.mxu1 %v8692_v36 }
 0x44d   :  { %6812 = vmatprep.subr.bf16.mxu0 %v6811_v44  ;;  %v1704_v44 = vld [vmem:[#allocation6 + $0x6e8] sm:$0xff]  ;;  %v6837_v59 = vpack.c.bf16 %v1697_v3, %v1691_v55  ;;  %v1739_v55 = vld [vmem:[#allocation6 + $0x800] sm:$0xff]  ;;  %v1745_v3 = vld [vmem:[#allocation6 + $0x830] sm:$0xff] }
 0x44e   :  { %v6839_v48 = vpack.c.bf16 %v1710_v40, %v1704_v44  ;;  %v1752_v44 = vld [vmem:[#allocation6 + $0x868] sm:$0xff]  ;;  %v1758_v40 = vld [vmem:[#allocation6 + $0x898] sm:$0xff] }
 0x44f   :  { %v6855_v46 = vpack.c.bf16 %v1758_v40, %v1752_v44  ;;  %v1823_v44 = vld [vmem:[#allocation6 + $0xaa0] sm:$0xff]  ;;  %v1829_v40 = vld [vmem:[#allocation6 + $0xad0] sm:$0xff] }
 0x450   :  { %6814 = vmatpush1.bf16.msra.mxu0 %v6813_v28  ;;  %v8697_v28 = vpack.c.bf16 %v2754_v23, %v2753_v6  ;;  %v8724_v6 = vpack.c.bf16 %v2746_v35, %v2745_v32  ;;  %v6853_v23 = vpack.c.bf16 %v1745_v3, %v1739_v55  ;;  %v1811_v32 = vld [vmem:[#allocation6 + $0xa40] sm:$0xff]  ;;  %v1817_v35 = vld [vmem:[#allocation6 + $0xa70] sm:$0xff] }
 0x451   :  { %6816 = vmatprep.subr.bf16.mxu0 %v6815_v62  ;;  %v2737_v62 = vld [vmem:[#allocation7 + $0x30] sm:$0xff]  ;;  %v6877_v55 = vpack.c.bf16 %v1817_v35, %v1811_v32  ;;  %v1895_v32 = vld [vmem:[#allocation6 + $0xce0] sm:$0xff] }
 0x452   :  { %v8700_v5 = vpack.c.bf16 %v2738_v20, %v2737_v62  ;;  %6972 = vmatprep.subr.bf16.mxu1 %v8697_v28  ;;  %v1751_v62 = vld [vmem:[#allocation6 + $0x860] sm:$0xff]  ;;  %v1757_v20 = vld [vmem:[#allocation6 + $0x890] sm:$0xff] }
 0x453   :  { %v1901_v35 = vld [vmem:[#allocation6 + $0xd10] sm:$0xff] }
 0x454   :  { %6818 = vmatpush1.bf16.msra.mxu0 %v6817_v27  ;;  %v2756_v27 = vld [vmem:[#allocation7 + $0xc8] sm:$0xff]  ;;  %6974 = vmatpush3.bf16.msra.mxu1 %v8700_v5 }
 0x455   :  { %6820 = vmatprep.subr.bf16.mxu0 %v6819_v33  ;;  %v2739_v33 = vld [vmem:[#allocation7 + $0x40] sm:$0xff] }
 0x458   :  { %6822 = vmatpush1.bf16.msra.mxu0 %v6821_v13  ;;  %v2758_v13 = vld [vmem:[#allocation7 + $0xd8] sm:$0xff] }
 0x459   :  { %6824 = vmatprep.subr.bf16.mxu0 %v6823_v56  ;;  %v1716_v56 = vld [vmem:[#allocation6 + $0x748] sm:$0xff]  ;;  %v8709_v2 = vpack.c.bf16 %v2758_v13, %v2757_v49  ;;  %v1763_v49 = vld [vmem:[#allocation6 + $0x8c0] sm:$0xff]  ;;  %v1769_v13 = vld [vmem:[#allocation6 + $0x8f0] sm:$0xff] }
 0x45a   :  { %v6843_v41 = vpack.c.bf16 %v1722_v1, %v1716_v56  ;;  %v1776_v56 = vld [vmem:[#allocation6 + $0x928] sm:$0xff]  ;;  %v1782_v1 = vld [vmem:[#allocation6 + $0x958] sm:$0xff]  ;;  %v6861_v15 = vpack.c.bf16 %v1769_v13, %v1763_v49  ;;  %v1847_v49 = vld [vmem:[#allocation6 + $0xb60] sm:$0xff] }
 0x45b   :  { %v6863_v12 = vpack.c.bf16 %v1782_v1, %v1776_v56  ;;  %v1853_v13 = vld [vmem:[#allocation6 + $0xb90] sm:$0xff]  ;;  %v1860_v56 = vld [vmem:[#allocation6 + $0xbc8] sm:$0xff]  ;;  %v1866_v1 = vld [vmem:[#allocation6 + $0xbf8] sm:$0xff] }
 0x45c   :  { %6826 = vmatpush1.bf16.msra.mxu0 %v6825_v42  ;;  %v1715_v42 = vld [vmem:[#allocation6 + $0x740] sm:$0xff] }
 0x45d   :  { %6828 = vmatprep.subr.bf16.mxu0 %v6827_v8  ;;  %v1721_v8 = vld [vmem:[#allocation6 + $0x770] sm:$0xff] }
 0x45e   :  { %v6845_v60 = vpack.c.bf16 %v1721_v8, %v1715_v42 }
 0x460   :  { %6830 = vmatpush1.bf16.msra.mxu0 %v6829_v9  ;;  %v2762_v9 = vld [vmem:[#allocation7 + $0xf8] sm:$0xff] }
 0x461   :  { %6832 = vmatprep.subr.bf16.mxu0 %v6831_v4  ;;  %v6847_v4 = vpack.c.bf16 %v1734_v51, %v1728_v50  ;;  %v8721_v29 = vpack.c.bf16 %v2762_v9, %v2761_v61  ;;  %v1787_v50 = vld [vmem:[#allocation6 + $0x980] sm:$0xff]  ;;  %v1793_v51 = vld [vmem:[#allocation6 + $0x9b0] sm:$0xff]  ;;  %v6871_v61 = vpack.c.bf16 %v1806_v58, %v1800_v57  ;;  %v1884_v57 = vld [vmem:[#allocation6 + $0xc88] sm:$0xff] }
 0x462   :  { %v1799_v9 = vld [vmem:[#allocation6 + $0x9e0] sm:$0xff]  ;;  %v1890_v58 = vld [vmem:[#allocation6 + $0xcb8] sm:$0xff] }
 0x463   :  { %2583 = vmatmul.mubr.f32.vlgmr.msra.gmra.mrb[14].mxu0 %v8644_v17  ;;  %v8703_v17 = vpack.c.bf16 %v2756_v27, %v2755_v54  ;;  %v1764_v54 = vld [vmem:[#allocation6 + $0x8c8] sm:$0xff]  ;;  %v2779_v27 = vld [vmem:[#allocation7 + $0x180] sm:$0xff] }
 0x464   :  { %6834 = vmatpush1.bf16.msra.mxu0 %v6833_v53  ;;  %2653 = vmatprep.mubr.f32.mxu0 %v8657_v63  ;;  %v8706_v63 = vpack.c.bf16 %v2740_v7, %v2739_v33  ;;  %v6849_v53 = vpack.c.bf16 %v1733_v11, %v1727_v10  ;;  %v2780_v33 = vld [vmem:[#allocation7 + $0x188] sm:$0xff]  ;;  %v1818_v11 = vld [vmem:[#allocation6 + $0xa78] sm:$0xff] }
 0x465   :  { %6836 = vmatprep.subr.bf16.mxu0 %v6835_v37  ;;  %6976 = vmatprep.subr.bf16.mxu1 %v8703_v17  ;;  %v6851_v37 = vpack.c.bf16 %v1746_v14, %v1740_v34  ;;  %v8728_v7 = vpack.c.bf16 %v2780_v33, %v2779_v27  ;;  %v1812_v10 = vld [vmem:[#allocation6 + $0xa48] sm:$0xff]  ;;  %v1854_v33 = vld [vmem:[#allocation6 + $0xb98] sm:$0xff] }
 0x466   :  { %6978 = vmatpush3.bf16.msra.mxu1 %v8706_v63  ;;  %v6875_v14 = vpack.c.bf16 %v1818_v11, %v1812_v10  ;;  %v1848_v27 = vld [vmem:[#allocation6 + $0xb68] sm:$0xff]  ;;  %v1902_v11 = vld [vmem:[#allocation6 + $0xd18] sm:$0xff] }
 0x467   :  { %6980 = vmatprep.subr.bf16.mxu1 %v8709_v2  ;;  %v1896_v10 = vld [vmem:[#allocation6 + $0xce8] sm:$0xff] }
 0x468   :  { %6838 = vmatpush1.bf16.msra.mxu0 %v6837_v59  ;;  %v1770_v59 = vld [vmem:[#allocation6 + $0x8f8] sm:$0xff] }
 0x469   :  { %6840 = vmatprep.subr.bf16.mxu0 %v6839_v48  ;;  %v6857_v48 = vpack.c.bf16 %v1757_v20, %v1751_v62  ;;  %v6859_v25 = vpack.c.bf16 %v1770_v59, %v1764_v54  ;;  %v6881_v62 = vpack.c.bf16 %v1829_v40, %v1823_v44  ;;  %v1835_v54 = vld [vmem:[#allocation6 + $0xb00] sm:$0xff]  ;;  %v1841_v59 = vld [vmem:[#allocation6 + $0xb30] sm:$0xff] }
 0x46a   :  { %6982 = vmatpush3.bf16.msra.mxu1 %v8712_v52  ;;  %v1907_v44 = vld [vmem:[#allocation6 + $0xd40] sm:$0xff]  ;;  %v1913_v40 = vld [vmem:[#allocation6 + $0xd70] sm:$0xff] }
 0x46b   :  { %6984 = vmatprep.subr.bf16.mxu1 %v8715_v16 }
 0x46c   :  { %6842 = vmatpush1.bf16.msra.mxu0 %v6841_v18  ;;  %v1775_v18 = vld [vmem:[#allocation6 + $0x920] sm:$0xff] }
 0x46d   :  { %6844 = vmatprep.subr.bf16.mxu0 %v6843_v41  ;;  %v1794_v41 = vld [vmem:[#allocation6 + $0x9b8] sm:$0xff]  ;;  %v6865_v42 = vpack.c.bf16 %v1781_v22, %v1775_v18  ;;  %v1859_v18 = vld [vmem:[#allocation6 + $0xbc0] sm:$0xff]  ;;  %v1865_v22 = vld [vmem:[#allocation6 + $0xbf0] sm:$0xff] }
 0x46e   :  { %6986 = vmatpush3.bf16.msra.mxu1 %v8718_v24  ;;  %v6867_v8 = vpack.c.bf16 %v1794_v41, %v1788_v31  ;;  %v1872_v31 = vld [vmem:[#allocation6 + $0xc28] sm:$0xff]  ;;  %v1878_v41 = vld [vmem:[#allocation6 + $0xc58] sm:$0xff] }
 0x46f   :  { %6988 = vmatprep.subr.bf16.mxu1 %v8721_v29 }
 0x470   :  { %6846 = vmatpush1.bf16.msra.mxu0 %v6845_v60  ;;  %v6869_v60 = vpack.c.bf16 %v1793_v51, %v1787_v50  ;;  %v1871_v50 = vld [vmem:[#allocation6 + $0xc20] sm:$0xff]  ;;  %v1877_v51 = vld [vmem:[#allocation6 + $0xc50] sm:$0xff] }
 0x471   :  { %6848 = vmatprep.subr.bf16.mxu0 %v6847_v4  ;;  %v1805_v4 = vld [vmem:[#allocation6 + $0xa10] sm:$0xff] }
 0x472   :  { %6990 = vmatpush3.bf16.msra.mxu1 %v8724_v6  ;;  %v6873_v34 = vpack.c.bf16 %v1805_v4, %v1799_v9  ;;  %v1883_v9 = vld [vmem:[#allocation6 + $0xc80] sm:$0xff]  ;;  %v1889_v4 = vld [vmem:[#allocation6 + $0xcb0] sm:$0xff] }
 0x473   :  { %6992 = vmatprep.subr.bf16.mxu1 %v8728_v7 }
 0x474   :  { %6850 = vmatpush1.bf16.msra.mxu0 %v6849_v53  ;;  %v1824_v53 = vld [vmem:[#allocation6 + $0xaa8] sm:$0xff] }
 0x475   :  { %6852 = vmatprep.subr.bf16.mxu0 %v6851_v37  ;;  %v1830_v37 = vld [vmem:[#allocation6 + $0xad8] sm:$0xff] }
 0x476   :  { %v6879_v3 = vpack.c.bf16 %v1830_v37, %v1824_v53  ;;  %v1908_v53 = vld [vmem:[#allocation6 + $0xd48] sm:$0xff]  ;;  %v1914_v37 = vld [vmem:[#allocation6 + $0xd78] sm:$0xff] }
 0x478   :  { %6854 = vmatpush1.bf16.msra.mxu0 %v6853_v23  ;;  %v1836_v23 = vld [vmem:[#allocation6 + $0xb08] sm:$0xff] }
 0x479   :  { %6856 = vmatprep.subr.bf16.mxu0 %v6855_v46  ;;  %v1842_v46 = vld [vmem:[#allocation6 + $0xb38] sm:$0xff] }
 0x47a   :  { %v6883_v20 = vpack.c.bf16 %v1842_v46, %v1836_v23  ;;  %v1920_v23 = vld [vmem:[#allocation6 + $0xda8] sm:$0xff]  ;;  %v1926_v46 = vld [vmem:[#allocation6 + $0xdd8] sm:$0xff] }
 0x47c   :  { %6858 = vmatpush1.bf16.msra.mxu0 %v6857_v48  ;;  %v6885_v48 = vpack.c.bf16 %v1841_v59, %v1835_v54  ;;  %v1932_v54 = vld [vmem:[#allocation6 + $0xe08] sm:$0xff]  ;;  %v1938_v59 = vld [vmem:[#allocation6 + $0xe38] sm:$0xff] }
 0x47d   :  { %6860 = vmatprep.subr.bf16.mxu0 %v6859_v25  ;;  %v6887_v25 = vpack.c.bf16 %v1854_v33, %v1848_v27  ;;  %v6915_v33 = vpack.c.bf16 %v1938_v59, %v1932_v54 }
 0x480   :  { %6862 = vmatpush1.bf16.msra.mxu0 %v6861_v15  ;;  %v6889_v15 = vpack.c.bf16 %v1853_v13, %v1847_v49  ;;  %v1944_v49 = vld [vmem:[#allocation6 + $0xe68] sm:$0xff]  ;;  %v1950_v13 = vld [vmem:[#allocation6 + $0xe98] sm:$0xff] }
 0x481   :  { %6864 = vmatprep.subr.bf16.mxu0 %v6863_v12  ;;  %v6891_v12 = vpack.c.bf16 %v1866_v1, %v1860_v56  ;;  %v6919_v1 = vpack.c.bf16 %v1950_v13, %v1944_v49 }
 0x484   :  { %6866 = vmatpush1.bf16.msra.mxu0 %v6865_v42  ;;  %v6893_v42 = vpack.c.bf16 %v1865_v22, %v1859_v18  ;;  %v1956_v18 = vld [vmem:[#allocation6 + $0xec8] sm:$0xff]  ;;  %v1962_v22 = vld [vmem:[#allocation6 + $0xef8] sm:$0xff] }
 0x485   :  { %6868 = vmatprep.subr.bf16.mxu0 %v6867_v8  ;;  %v6895_v8 = vpack.c.bf16 %v1878_v41, %v1872_v31  ;;  %v6923_v41 = vpack.c.bf16 %v1962_v22, %v1956_v18 }
 0x488   :  { %6870 = vmatpush1.bf16.msra.mxu0 %v6869_v60  ;;  %v6897_v60 = vpack.c.bf16 %v1877_v51, %v1871_v50  ;;  %v1968_v50 = vld [vmem:[#allocation6 + $0xf28] sm:$0xff]  ;;  %v1974_v51 = vld [vmem:[#allocation6 + $0xf58] sm:$0xff] }
 0x489   :  { %6872 = vmatprep.subr.bf16.mxu0 %v6871_v61  ;;  %v6899_v61 = vpack.c.bf16 %v1890_v58, %v1884_v57  ;;  %v6927_v58 = vpack.c.bf16 %v1974_v51, %v1968_v50 }
 0x48c   :  { %6874 = vmatpush1.bf16.msra.mxu0 %v6873_v34  ;;  %v6901_v34 = vpack.c.bf16 %v1889_v4, %v1883_v9  ;;  %v1980_v9 = vld [vmem:[#allocation6 + $0xf88] sm:$0xff]  ;;  %v1986_v4 = vld [vmem:[#allocation6 + $0xfb8] sm:$0xff] }
 0x48d   :  { %6876 = vmatprep.subr.bf16.mxu0 %v6875_v14  ;;  %v6903_v14 = vpack.c.bf16 %v1902_v11, %v1896_v10  ;;  %v6931_v11 = vpack.c.bf16 %v1986_v4, %v1980_v9  ;;  %v2764_v9 = vld [vmem:[#allocation7 + $0x108] sm:$0xff]  ;;  %v2781_v4 = vld [vmem:[#allocation7 + $0x190] sm:$0xff] }
 0x490   :  { %6878 = vmatpush1.bf16.msra.mxu0 %v6877_v55  ;;  %v6905_v55 = vpack.c.bf16 %v1901_v35, %v1895_v32  ;;  %v1992_v32 = vld [vmem:[#allocation6 + $0xfe8] sm:$0xff]  ;;  %v1998_v35 = vld [vmem:[#allocation6 + $0x1018] sm:$0xff] }
 0x491   :  { %6880 = vmatprep.subr.bf16.mxu0 %v6879_v3  ;;  %v6907_v3 = vpack.c.bf16 %v1914_v37, %v1908_v53  ;;  %v6935_v37 = vpack.c.bf16 %v1998_v35, %v1992_v32 }
 0x494   :  { %6882 = vmatpush1.bf16.msra.mxu0 %v6881_v62  ;;  %v6911_v62 = vpack.c.bf16 %v1926_v46, %v1920_v23 }
 0x495   :  { %6884 = vmatprep.subr.bf16.mxu0 %v6883_v20  ;;  %v1925_v20 = vld [vmem:[#allocation6 + $0xdd0] sm:$0xff] }
 0x498   :  { %6886 = vmatpush1.bf16.msra.mxu0 %v6885_v48  ;;  %v1931_v48 = vld [vmem:[#allocation6 + $0xe00] sm:$0xff] }
 0x499   :  { %6888 = vmatprep.subr.bf16.mxu0 %v6887_v25  ;;  %v1937_v25 = vld [vmem:[#allocation6 + $0xe30] sm:$0xff] }
 0x49a   :  { %v6917_v56 = vpack.c.bf16 %v1937_v25, %v1931_v48  ;;  %v2028_v48 = vld [vmem:[#allocation6 + $0x1108] sm:$0xff]  ;;  %v2034_v25 = vld [vmem:[#allocation6 + $0x1138] sm:$0xff] }
 0x49b   :  { %v6947_v13 = vpack.c.bf16 %v2034_v25, %v2028_v48 }
 0x49c   :  { %6890 = vmatpush1.bf16.msra.mxu0 %v6889_v15  ;;  %v1943_v15 = vld [vmem:[#allocation6 + $0xe60] sm:$0xff] }
 0x49d   :  { %6892 = vmatprep.subr.bf16.mxu0 %v6891_v12  ;;  %v1949_v12 = vld [vmem:[#allocation6 + $0xe90] sm:$0xff] }
 0x49e   :  { %v6921_v31 = vpack.c.bf16 %v1949_v12, %v1943_v15  ;;  %v2040_v15 = vld [vmem:[#allocation6 + $0x1168] sm:$0xff]  ;;  %v2046_v12 = vld [vmem:[#allocation6 + $0x1198] sm:$0xff] }
 0x49f   :  { %v6951_v22 = vpack.c.bf16 %v2046_v12, %v2040_v15 }
 0x4a0   :  { %6894 = vmatpush1.bf16.msra.mxu0 %v6893_v42  ;;  %v1955_v42 = vld [vmem:[#allocation6 + $0xec0] sm:$0xff] }
 0x4a1   :  { %6896 = vmatprep.subr.bf16.mxu0 %v6895_v8  ;;  %v1961_v8 = vld [vmem:[#allocation6 + $0xef0] sm:$0xff] }
 0x4a2   :  { %v6925_v57 = vpack.c.bf16 %v1961_v8, %v1955_v42  ;;  %v2052_v42 = vld [vmem:[#allocation6 + $0x11c8] sm:$0xff]  ;;  %v2058_v8 = vld [vmem:[#allocation6 + $0x11f8] sm:$0xff] }
 0x4a3   :  { %2654 = vmatmul.mubr.f32.vlgmr.msra.gmra.mrb[14].mxu0 %v8651_v45  ;;  %v6909_v45 = vpack.c.bf16 %v1913_v40, %v1907_v44  ;;  %v2004_v44 = vld [vmem:[#allocation6 + $0x1048] sm:$0xff]  ;;  %v2010_v40 = vld [vmem:[#allocation6 + $0x1078] sm:$0xff]  ;;  %v6955_v51 = vpack.c.bf16 %v2058_v8, %v2052_v42 }
 0x4a4   :  { %6898 = vmatpush1.bf16.msra.mxu0 %v6897_v60  ;;  %2724 = vmatprep.mubr.f32.mxu0 %v8669_v26  ;;  %v1919_v26 = vld [vmem:[#allocation6 + $0xda0] sm:$0xff]  ;;  %v6939_v46 = vpack.c.bf16 %v2010_v40, %v2004_v44 }
 0x4a5   :  { %6900 = vmatprep.subr.bf16.mxu0 %v6899_v61  ;;  %v6913_v27 = vpack.c.bf16 %v1925_v20, %v1919_v26  ;;  %v1967_v60 = vld [vmem:[#allocation6 + $0xf20] sm:$0xff]  ;;  %v1973_v61 = vld [vmem:[#allocation6 + $0xf50] sm:$0xff]  ;;  %v2016_v26 = vld [vmem:[#allocation6 + $0x10a8] sm:$0xff] }
 0x4a6   :  { %v6929_v10 = vpack.c.bf16 %v1973_v61, %v1967_v60  ;;  %v2022_v20 = vld [vmem:[#allocation6 + $0x10d8] sm:$0xff]  ;;  %v2763_v61 = vld [vmem:[#allocation7 + $0x100] sm:$0xff] }
 0x4a7   :  { %v6943_v59 = vpack.c.bf16 %v2022_v20, %v2016_v26 }
 0x4a8   :  { %6902 = vmatpush1.bf16.msra.mxu0 %v6901_v34  ;;  %v1979_v34 = vld [vmem:[#allocation6 + $0xf80] sm:$0xff] }
 0x4a9   :  { %6904 = vmatprep.subr.bf16.mxu0 %v6903_v14  ;;  %v1985_v14 = vld [vmem:[#allocation6 + $0xfb0] sm:$0xff] }
 0x4aa   :  { %v6933_v53 = vpack.c.bf16 %v1985_v14, %v1979_v34  ;;  %v8737_v34 = vpack.c.bf16 %v2764_v9, %v2763_v61  ;;  %v2777_v9 = vld [vmem:[#allocation7 + $0x170] sm:$0xff] }
 0x4ac   :  { %6906 = vmatpush1.bf16.msra.mxu0 %v6905_v55  ;;  %v1991_v55 = vld [vmem:[#allocation6 + $0xfe0] sm:$0xff] }
 0x4ad   :  { %6908 = vmatprep.subr.bf16.mxu0 %v6907_v3  ;;  %v1997_v3 = vld [vmem:[#allocation6 + $0x1010] sm:$0xff] }
 0x4ae   :  { %v6937_v23 = vpack.c.bf16 %v1997_v3, %v1991_v55  ;;  %v2784_v3 = vld [vmem:[#allocation7 + $0x1a8] sm:$0xff] }
 0x4b0   :  { %6910 = vmatpush1.bf16.msra.mxu0 %v6909_v45  ;;  %v2003_v45 = vld [vmem:[#allocation6 + $0x1040] sm:$0xff] }
 0x4b1   :  { %6912 = vmatprep.subr.bf16.mxu0 %v6911_v62  ;;  %v2009_v62 = vld [vmem:[#allocation6 + $0x1070] sm:$0xff] }
 0x4b2   :  { %v6941_v54 = vpack.c.bf16 %v2009_v62, %v2003_v45  ;;  %v2785_v45 = vld [vmem:[#allocation7 + $0x1b0] sm:$0xff]  ;;  %v2786_v62 = vld [vmem:[#allocation7 + $0x1b8] sm:$0xff] }
 0x4b3   :  { %v8760_v20 = vpack.c.bf16 %v2786_v62, %v2785_v45  ;;  %v2814_v45 = vld [vmem:[#allocation7 + $0x298] sm:$0xff] }
 0x4b4   :  { %6914 = vmatpush1.bf16.msra.mxu0 %v6913_v27  ;;  %v2015_v27 = vld [vmem:[#allocation6 + $0x10a0] sm:$0xff] }
 0x4b5   :  { %6916 = vmatprep.subr.bf16.mxu0 %v6915_v33  ;;  %v2021_v33 = vld [vmem:[#allocation6 + $0x10d0] sm:$0xff] }
 0x4b6   :  { %v6945_v49 = vpack.c.bf16 %v2021_v33, %v2015_v27  ;;  %v2787_v27 = vld [vmem:[#allocation7 + $0x1c0] sm:$0xff]  ;;  %v2788_v33 = vld [vmem:[#allocation7 + $0x1c8] sm:$0xff] }
 0x4b7   :  { %v8766_v25 = vpack.c.bf16 %v2788_v33, %v2787_v27  ;;  %v2798_v27 = vld [vmem:[#allocation7 + $0x218] sm:$0xff]  ;;  %v2815_v33 = vld [vmem:[#allocation7 + $0x2a0] sm:$0xff] }
 0x4b8   :  { %6918 = vmatpush1.bf16.msra.mxu0 %v6917_v56  ;;  %v2027_v56 = vld [vmem:[#allocation6 + $0x1100] sm:$0xff] }
 0x4b9   :  { %6920 = vmatprep.subr.bf16.mxu0 %v6919_v1  ;;  %v2033_v1 = vld [vmem:[#allocation6 + $0x1130] sm:$0xff] }
 0x4ba   :  { %v6949_v18 = vpack.c.bf16 %v2033_v1, %v2027_v56  ;;  %v2789_v56 = vld [vmem:[#allocation7 + $0x1d0] sm:$0xff]  ;;  %v2790_v1 = vld [vmem:[#allocation7 + $0x1d8] sm:$0xff] }
 0x4bb   :  { %v8772_v12 = vpack.c.bf16 %v2790_v1, %v2789_v56  ;;  %v2799_v1 = vld [vmem:[#allocation7 + $0x220] sm:$0xff] }
 0x4bc   :  { %6922 = vmatpush1.bf16.msra.mxu0 %v6921_v31  ;;  %v2039_v31 = vld [vmem:[#allocation6 + $0x1160] sm:$0xff] }
 0x4bd   :  { %6924 = vmatprep.subr.bf16.mxu0 %v6923_v41  ;;  %v2045_v41 = vld [vmem:[#allocation6 + $0x1190] sm:$0xff] }
 0x4be   :  { %v6953_v50 = vpack.c.bf16 %v2045_v41, %v2039_v31  ;;  %v2791_v31 = vld [vmem:[#allocation7 + $0x1e0] sm:$0xff]  ;;  %v2792_v41 = vld [vmem:[#allocation7 + $0x1e8] sm:$0xff] }
 0x4bf   :  { %v8778_v8 = vpack.c.bf16 %v2792_v41, %v2791_v31  ;;  %v2818_v31 = vld [vmem:[#allocation7 + $0x2b8] sm:$0xff] }
 0x4c0   :  { %6926 = vmatpush1.bf16.msra.mxu0 %v6925_v57  ;;  %v2051_v57 = vld [vmem:[#allocation6 + $0x11c0] sm:$0xff] }
 0x4c1   :  { %6928 = vmatprep.subr.bf16.mxu0 %v6927_v58  ;;  %v2057_v58 = vld [vmem:[#allocation6 + $0x11f0] sm:$0xff] }
 0x4c2   :  { %v6957_v60 = vpack.c.bf16 %v2057_v58, %v2051_v57  ;;  %v2793_v57 = vld [vmem:[#allocation7 + $0x1f0] sm:$0xff]  ;;  %v2794_v58 = vld [vmem:[#allocation7 + $0x1f8] sm:$0xff] }
 0x4c3   :  { %v8784_v61 = vpack.c.bf16 %v2794_v58, %v2793_v57  ;;  %v2802_v57 = vld [vmem:[#allocation7 + $0x238] sm:$0xff]  ;;  %v2819_v58 = vld [vmem:[#allocation7 + $0x2c0] sm:$0xff] }
 0x4c4   :  { %6930 = vmatpush1.bf16.msra.mxu0 %v6929_v10  ;;  %v2782_v10 = vld [vmem:[#allocation7 + $0x198] sm:$0xff] }
 0x4c5   :  { %6932 = vmatprep.subr.bf16.mxu0 %v6931_v11  ;;  %v8743_v35 = vpack.c.bf16 %v2782_v10, %v2781_v4  ;;  %v2778_v4 = vld [vmem:[#allocation7 + $0x178] sm:$0xff]  ;;  %v2811_v10 = vld [vmem:[#allocation7 + $0x280] sm:$0xff] }
 0x4c8   :  { %6934 = vmatpush1.bf16.msra.mxu0 %v6933_v53  ;;  %v2765_v53 = vld [vmem:[#allocation7 + $0x110] sm:$0xff] }
 0x4c9   :  { %6936 = vmatprep.subr.bf16.mxu0 %v6935_v37  ;;  %v2766_v37 = vld [vmem:[#allocation7 + $0x118] sm:$0xff] }
 0x4ca   :  { %v8751_v44 = vpack.c.bf16 %v2766_v37, %v2765_v53  ;;  %v2812_v53 = vld [vmem:[#allocation7 + $0x288] sm:$0xff]  ;;  %v8787_v37 = vpack.c.bf16 %v2778_v4, %v2777_v9 }
 0x4cb   :  { %v2820_v9 = vld [vmem:[#allocation7 + $0x2c8] sm:$0xff] }
 0x4cc   :  { %6938 = vmatpush1.bf16.msra.mxu0 %v6937_v23  ;;  %v2767_v23 = vld [vmem:[#allocation7 + $0x120] sm:$0xff] }
 0x4cd   :  { %6940 = vmatprep.subr.bf16.mxu0 %v6939_v46  ;;  %v2768_v46 = vld [vmem:[#allocation7 + $0x128] sm:$0xff] }
 0x4ce   :  { %v8757_v26 = vpack.c.bf16 %v2768_v46, %v2767_v23  ;;  %v2796_v23 = vld [vmem:[#allocation7 + $0x208] sm:$0xff]  ;;  %v2813_v46 = vld [vmem:[#allocation7 + $0x290] sm:$0xff] }
 0x4d0   :  { %6942 = vmatpush1.bf16.msra.mxu0 %v6941_v54  ;;  %v2769_v54 = vld [vmem:[#allocation7 + $0x130] sm:$0xff] }
 0x4d1   :  { %6944 = vmatprep.subr.bf16.mxu0 %v6943_v59  ;;  %v2770_v59 = vld [vmem:[#allocation7 + $0x138] sm:$0xff] }
 0x4d2   :  { %v8763_v48 = vpack.c.bf16 %v2770_v59, %v2769_v54  ;;  %v8796_v54 = vpack.c.bf16 %v2814_v45, %v2813_v46  ;;  %v2797_v59 = vld [vmem:[#allocation7 + $0x210] sm:$0xff]  ;;  %v2822_v46 = vld [vmem:[#allocation7 + $0x2d8] sm:$0xff] }
 0x4d4   :  { %6946 = vmatpush1.bf16.msra.mxu0 %v6945_v49  ;;  %v2771_v49 = vld [vmem:[#allocation7 + $0x140] sm:$0xff] }
 0x4d5   :  { %6948 = vmatprep.subr.bf16.mxu0 %v6947_v13  ;;  %v2772_v13 = vld [vmem:[#allocation7 + $0x148] sm:$0xff] }
 0x4d6   :  { %v8769_v15 = vpack.c.bf16 %v2772_v13, %v2771_v49  ;;  %v2816_v49 = vld [vmem:[#allocation7 + $0x2a8] sm:$0xff]  ;;  %v8800_v13 = vpack.c.bf16 %v2798_v27, %v2797_v59  ;;  %v2805_v27 = vld [vmem:[#allocation7 + $0x250] sm:$0xff] }
 0x4d7   :  { %v8803_v56 = vpack.c.bf16 %v2816_v49, %v2815_v33  ;;  %v2806_v33 = vld [vmem:[#allocation7 + $0x258] sm:$0xff]  ;;  %v2823_v49 = vld [vmem:[#allocation7 + $0x2e0] sm:$0xff] }
 0x4d8   :  { %6950 = vmatpush1.bf16.msra.mxu0 %v6949_v18  ;;  %v2773_v18 = vld [vmem:[#allocation7 + $0x150] sm:$0xff] }
 0x4d9   :  { %6952 = vmatprep.subr.bf16.mxu0 %v6951_v22  ;;  %v2774_v22 = vld [vmem:[#allocation7 + $0x158] sm:$0xff] }
 0x4da   :  { %v8775_v42 = vpack.c.bf16 %v2774_v22, %v2773_v18  ;;  %v2800_v18 = vld [vmem:[#allocation7 + $0x228] sm:$0xff]  ;;  %v2817_v22 = vld [vmem:[#allocation7 + $0x2b0] sm:$0xff] }
 0x4db   :  { %v8806_v41 = vpack.c.bf16 %v2800_v18, %v2799_v1  ;;  %v2824_v1 = vld [vmem:[#allocation7 + $0x2e8] sm:$0xff]  ;;  %v8824_v18 = vpack.c.bf16 %v2806_v33, %v2805_v27 }
 0x4dc   :  { %6954 = vmatpush1.bf16.msra.mxu0 %v6953_v50  ;;  %v2775_v50 = vld [vmem:[#allocation7 + $0x160] sm:$0xff] }
 0x4dd   :  { %6956 = vmatprep.subr.bf16.mxu0 %v6955_v51  ;;  %v2776_v51 = vld [vmem:[#allocation7 + $0x168] sm:$0xff] }
 0x4e0   :  { %6958 = vmatpush1.bf16.msra.mxu0 %v6957_v60  ;;  %v8781_v60 = vpack.c.bf16 %v2776_v51, %v2775_v50  ;;  %v8809_v50 = vpack.c.bf16 %v2818_v31, %v2817_v22  ;;  %v2801_v51 = vld [vmem:[#allocation7 + $0x230] sm:$0xff]  ;;  %v8827_v22 = vpack.c.bf16 %v2824_v1, %v2823_v49  ;;  %v2807_v31 = vld [vmem:[#allocation7 + $0x260] sm:$0xff] }
 0x4e1   :  { %v8812_v4 = vpack.c.bf16 %v2802_v57, %v2801_v51  ;;  %v2808_v51 = vld [vmem:[#allocation7 + $0x268] sm:$0xff]  ;;  %v2825_v57 = vld [vmem:[#allocation7 + $0x2f0] sm:$0xff] }
 0x4e3   :  { %2725 = vmatmul.mubr.f32.vlgmr.msra.gmra.mrb[14].mxu0 %v8665_v0  ;;  %v2783_v0 = vld [vmem:[#allocation7 + $0x1a0] sm:$0xff] }
 0x4e4   :  { %3379 = vmatprep.mubr.f32.mxu0 %v7996_v30  ;;  %v8754_v40 = vpack.c.bf16 %v2784_v3, %v2783_v0  ;;  %v8790_v0 = vpack.c.bf16 %v2812_v53, %v2811_v10  ;;  %v2795_v3 = vld [vmem:[#allocation7 + $0x200] sm:$0xff]  ;;  %v8815_v10 = vpack.c.bf16 %v2820_v9, %v2819_v58  ;;  %v2826_v58 = vld [vmem:[#allocation7 + $0x2f8] sm:$0xff]  ;;  %v8830_v9 = vpack.c.bf16 %v2808_v51, %v2807_v31 }
 0x4e5   :  { %v8793_v62 = vpack.c.bf16 %v2796_v23, %v2795_v3  ;;  %v2803_v53 = vld [vmem:[#allocation7 + $0x240] sm:$0xff]  ;;  %v2804_v3 = vld [vmem:[#allocation7 + $0x248] sm:$0xff]  ;;  %v2821_v23 = vld [vmem:[#allocation7 + $0x2d0] sm:$0xff] }
 0x4e6   :  { %v8818_v45 = vpack.c.bf16 %v2804_v3, %v2803_v53  ;;  %v8821_v59 = vpack.c.bf16 %v2822_v46, %v2821_v23  ;;  %v8833_v53 = vpack.c.bf16 %v2826_v58, %v2825_v57  ;;  %v2809_v3 = vld [vmem:[#allocation7 + $0x270] sm:$0xff]  ;;  %v2810_v23 = vld [vmem:[#allocation7 + $0x278] sm:$0xff] }
 0x4e7   :  { %v8836_v46 = vpack.c.bf16 %v2810_v23, %v2809_v3 }
 0x4f6   :  { %v8735_v11 = vpop.f32.mrb[12].mxu0 }
 0x4f7   :  { %v8739_v14 = vpop.f32.mrb[12].mxu1  ;;  %v8741_v32 = vpop.f32.mrb[13].mxu0 }
 0x4f8   :  { %v8745_v55 = vpop.f32.mrb[13].mxu1  ;;  %2891 = vmatprep.mubr.f32.mxu1 %v8741_v32  ;;  %v3038_v49 = vmul.f32 %v8741_v32, %v8741_v32 }
 0x4f9   :  { %2892 = vmatmul.mubr.f32.vlgmr.msra.gmra.mrb[14].mxu1 %v8735_v11 }
 0x4fa   :  { %6994 = vmatpush3.bf16.msra.mxu1 %v8737_v34  ;;  %2961 = vmatprep.mubr.f32.mxu1 %v8745_v55 }
 0x4fb   :  { %6996 = vmatprep.subr.bf16.mxu1 %v8743_v35 }
 0x4fe   :  { %6998 = vmatpush3.bf16.msra.mxu1 %v8751_v44 }
 0x4ff   :  { %7000 = vmatprep.subr.bf16.mxu1 %v8754_v40 }
 0x502   :  { %7002 = vmatpush3.bf16.msra.mxu1 %v8757_v26 }
 0x503   :  { %7004 = vmatprep.subr.bf16.mxu1 %v8760_v20 }
 0x506   :  { %7006 = vmatpush3.bf16.msra.mxu1 %v8763_v48 }
 0x507   :  { %7008 = vmatprep.subr.bf16.mxu1 %v8766_v25 }
 0x50a   :  { %7010 = vmatpush3.bf16.msra.mxu1 %v8769_v15 }
 0x50b   :  { %7012 = vmatprep.subr.bf16.mxu1 %v8772_v12 }
 0x50e   :  { %7014 = vmatpush3.bf16.msra.mxu1 %v8775_v42 }
 0x50f   :  { %7016 = vmatprep.subr.bf16.mxu1 %v8778_v8 }
 0x512   :  { %7018 = vmatpush3.bf16.msra.mxu1 %v8781_v60 }
 0x513   :  { %7020 = vmatprep.subr.bf16.mxu1 %v8784_v61 }
 0x516   :  { %7022 = vmatpush3.bf16.msra.mxu1 %v8787_v37 }
 0x517   :  { %7024 = vmatprep.subr.bf16.mxu1 %v8790_v0 }
 0x519   :  { %2962 = vmatmul.mubr.f32.vlgmr.msra.gmra.mrb[16].mxu1 %v8739_v14 }
 0x51a   :  { %7026 = vmatpush3.bf16.msra.mxu1 %v8793_v62 }
 0x51b   :  { %7028 = vmatprep.subr.bf16.mxu1 %v8796_v54 }
 0x51e   :  { %7030 = vmatpush3.bf16.msra.mxu1 %v8800_v13 }
 0x51f   :  { %7032 = vmatprep.subr.bf16.mxu1 %v8803_v56 }
 0x522   :  { %7034 = vmatpush3.bf16.msra.mxu1 %v8806_v41 }
 0x523   :  { %7036 = vmatprep.subr.bf16.mxu1 %v8809_v50 }
 0x526   :  { %7038 = vmatpush3.bf16.msra.mxu1 %v8812_v4 }
 0x527   :  { %7040 = vmatprep.subr.bf16.mxu1 %v8815_v10 }
 0x52a   :  { %7042 = vmatpush3.bf16.msra.mxu1 %v8818_v45 }
 0x52b   :  { %7044 = vmatprep.subr.bf16.mxu1 %v8821_v59 }
 0x52e   :  { %7046 = vmatpush3.bf16.msra.mxu1 %v8824_v18 }
 0x52f   :  { %7048 = vmatprep.subr.bf16.mxu1 %v8827_v22 }
 0x532   :  { %7050 = vmatpush3.bf16.msra.mxu1 %v8830_v9 }
 0x533   :  { %7052 = vmatprep.subr.bf16.mxu1 %v8833_v53 }
 0x536   :  { %7054 = vmatpush3.bf16.msra.mxu1 %v8836_v46 }
 0x537   :  { %7056 = vmatprep.subr.bf16.mxu1 %v8678_v38 }
 0x5b6   :  { %v8841_v27 = vpop.f32.mrb[14].mxu0 }
 0x5b7   :  { %v8843_v33 = vpop.f32.mrb[15].mxu0 }
 0x5b8   :  { %3031 = vmatprep.mubr.f32.mxu1 %v8843_v33 }
 0x5b9   :  { %3032 = vmatmul.mubr.f32.vlgmr.msra.gmra.mrb[18].mxu1 %v8841_v27 }
 0x5ba   :  { %7058 = vmatpush3.bf16.msra.mxu1 %v8680_v47  ;;  %3107 = vmatprep.mubr.f32.mxu1 %v3038_v49 }
 0x5bb   :  { %7060 = vmatprep.subr.bf16.mxu1 %v8684_v21  ;;  %v3037_v21 = vmul.f32 %v8735_v11, %v8735_v11 }
 0x5be   :  { %7062 = vmatpush3.bf16.msra.mxu1 %v8686_v19  ;;  %v3040_v19 = vmul.f32 %v8745_v55, %v8745_v55 }
 0x5bf   :  { %7064 = vmatprep.subr.bf16.mxu1 %v8690_v39 }
 0x5c2   :  { %7066 = vmatpush3.bf16.msra.mxu1 %v8692_v36 }
 0x5c3   :  { %7068 = vmatprep.subr.bf16.mxu1 %v8697_v28 }
 0x5c6   :  { %7070 = vmatpush3.bf16.msra.mxu1 %v8700_v5 }
 0x5c7   :  { %7072 = vmatprep.subr.bf16.mxu1 %v8703_v17  ;;  %v3039_v17 = vmul.f32 %v8739_v14, %v8739_v14 }
 0x5ca   :  { %7074 = vmatpush3.bf16.msra.mxu1 %v8706_v63  ;;  %v3042_v63 = vmul.f32 %v8843_v33, %v8843_v33 }
 0x5cb   :  { %7076 = vmatprep.subr.bf16.mxu1 %v8709_v2  ;;  %v3041_v2 = vmul.f32 %v8841_v27, %v8841_v27 }
 0x5cc   :  { %v5874_v38 = vpop.f32.mrb[14].mxu1 }
 0x5cd   :  { %v5875_v47 = vpop.f32.mrb[15].mxu1 }
 0x5ce   :  { %v5876_v1 = vadd.f32 %v5875_v47, %v5874_v38  ;;  %7078 = vmatpush3.bf16.msra.mxu1 %v8712_v52  ;;  %v3283_v52 = vld [vmem:[#allocation9 + $0x18] sm:$0xff] }
 0x5cf   :  { %7080 = vmatprep.subr.bf16.mxu1 %v8715_v16  ;;  %v3289_v16 = vld [vmem:[#allocation9 + $0x48] sm:$0xf] }
 0x5d2   :  { %7082 = vmatpush3.bf16.msra.mxu1 %v8718_v24  ;;  %v3281_v24 = vld [vmem:[#allocation9 + $0x8] sm:$0xff] }
 0x5d3   :  { %7084 = vmatprep.subr.bf16.mxu1 %v8721_v29  ;;  %v5054_v29 = vld [vmem:[#allocation19 + $0x18] sm:$0xff] }
 0x5d6   :  { %7086 = vmatpush3.bf16.msra.mxu1 %v8724_v6  ;;  %v8911_v6 = vpack.c.bf16 %v3289_v16, %v3283_v52  ;;  %v3277_v16 = vld [vmem:[%s9267_s9] sm:$0x1] }
 0x5d7   :  { %7088 = vmatprep.subr.bf16.mxu1 %v8728_v7  ;;  %v3287_v7 = vld [vmem:[#allocation9 + $0x38] sm:$0xf] }
 0x5d9   :  { %3108 = vmatmul.mubr.f32.vlgmr.msra.gmra.mrb[20].mxu1 %v3037_v21 }
 0x5da   :  { %7090 = vmatpush3.bf16.msra.mxu1 %v8737_v34  ;;  %3177 = vmatprep.mubr.f32.mxu1 %v3040_v19  ;;  %v3282_v34 = vld [vmem:[#allocation9 + $0x10] sm:$0xff] }
 0x5db   :  { %7092 = vmatprep.subr.bf16.mxu1 %v8743_v35  ;;  %v7151_v35 = vpack.c.bf16 %v3287_v7, %v3281_v24  ;;  %v3823_v7 = vld [vmem:[#allocation10 + $0x8] sm:$0xff] }
 0x5dd   :  { %7153 = vmatprep.subr.msk.bf16.mxu0 %vm8907_vm5, %v7151_v35 }
 0x5de   :  { %7094 = vmatpush3.bf16.msra.mxu1 %v8751_v44  ;;  %v3288_v44 = vld [vmem:[#allocation9 + $0x40] sm:$0xf] }
 0x5df   :  { %7096 = vmatprep.subr.bf16.mxu1 %v8754_v40  ;;  %v3280_v40 = vld [vmem:[#allocation9] sm:$0xff] }
 0x5e2   :  { %7098 = vmatpush3.bf16.msra.mxu1 %v8757_v26  ;;  %v3286_v26 = vld [vmem:[#allocation9 + $0x30] sm:$0xf] }
 0x5e3   :  { %7100 = vmatprep.subr.bf16.mxu1 %v8760_v20  ;;  %v8916_v20 = vpack.c.bf16 %v3288_v44, %v3282_v34  ;;  %v3825_v34 = vld [vmem:[#allocation10 + $0x18] sm:$0xff]  ;;  %v3822_v44 = vld [vmem:[#allocation10] sm:$0xff] }
 0x5e6   :  { %7102 = vmatpush3.bf16.msra.mxu1 %v8763_v48  ;;  %v7154_v48 = vpack.c.bf16 %v3286_v26, %v3280_v40  ;;  %v3824_v40 = vld [vmem:[#allocation10 + $0x10] sm:$0xff]  ;;  %v7187_v26 = vpack.c.bf16 %v3825_v34, %v3823_v7  ;;  %v3861_v7 = vld [vmem:[#allocation10 + $0x138] sm:$0xff] }
 0x5e7   :  { %7104 = vmatprep.subr.bf16.mxu1 %v8766_v25 }
 0x5e8   :  { %7156 = vmatpush1.bf16.msk.msra.mxu0 %vm8907_vm5, %v7154_v48 }
 0x5ea   :  { %7106 = vmatpush3.bf16.msra.mxu1 %v8769_v15 }
 0x5eb   :  { %7108 = vmatprep.subr.bf16.mxu1 %v8772_v12 }
 0x5ec   :  { %v5909_v39 = vpop.f32.mrb[16].mxu1 }
 0x5ed   :  { %v5910_v36 = vpop.f32.mrb[17].mxu1 }
 0x5ee   :  { %v5911_v28 = vadd.f32 %v5910_v36, %v5909_v39  ;;  %7110 = vmatpush3.bf16.msra.mxu1 %v8775_v42 }
 0x5ef   :  { %7112 = vmatprep.subr.bf16.mxu1 %v8778_v8  ;;  %v3285_v8 = vld [vmem:[#allocation9 + $0x28] sm:$0xff] }
 0x5f0   :  { %v2964_v5 = vadd.f32 %v5911_v28, %v5876_v1  ;;  %v3284_v28 = vld [vmem:[#allocation9 + $0x20] sm:$0xff] }
 0x5f2   :  { %7114 = vmatpush3.bf16.msra.mxu1 %v8781_v60  ;;  %v3291_v60 = vld [vmem:[#allocation9 + $0x58] sm:$0xf] }
 0x5f3   :  { %7116 = vmatprep.subr.bf16.mxu1 %v8784_v61  ;;  %v7163_v61 = vpack.c.bf16 %v3291_v60, %v3285_v8  ;;  %v3831_v8 = vld [vmem:[#allocation10 + $0x48] sm:$0xff]  ;;  %v3833_v60 = vld [vmem:[#allocation10 + $0x58] sm:$0xff] }
 0x5f5   :  { %7165 = vmatprep.subr.msk.bf16.mxu0 %vm8907_vm5, %v7163_v61 }
 0x5f6   :  { %7118 = vmatpush3.bf16.msra.mxu1 %v8787_v37 }
 0x5f7   :  { %7120 = vmatprep.subr.bf16.mxu1 %v8790_v0 }
 0x5f9   :  { %3178 = vmatmul.mubr.f32.vlgmr.msra.gmra.mrb[22].mxu1 %v3039_v17  ;;  %v3273_v17 = vld [vmem:[%s9266_s11] sm:$0x1] }
 0x5fa   :  { %7122 = vmatpush3.bf16.msra.mxu1 %v8793_v62  ;;  %3247 = vmatprep.mubr.f32.mxu1 %v3042_v63 }
 0x5fb   :  { %7124 = vmatprep.subr.bf16.mxu1 %v8796_v54 }
 0x5fe   :  { %7126 = vmatpush3.bf16.msra.mxu1 %v8800_v13 }
 0x5ff   :  { %7128 = vmatprep.subr.bf16.mxu1 %v8803_v56 }
 0x602   :  { %7130 = vmatpush3.bf16.msra.mxu1 %v8806_v41 }
 0x603   :  { %7132 = vmatprep.subr.bf16.mxu1 %v8809_v50 }
 0x606   :  { %7134 = vmatpush3.bf16.msra.mxu1 %v8812_v4 }
 0x607   :  { %7136 = vmatprep.subr.bf16.mxu1 %v8815_v10 }
 0x60a   :  { %7138 = vmatpush3.bf16.msra.mxu1 %v8818_v45 }
 0x60b   :  { %7140 = vmatprep.subr.bf16.mxu1 %v8821_v59 }
 0x60e   :  { %7142 = vmatpush3.bf16.msra.mxu1 %v8824_v18 }
 0x60f   :  { %7144 = vmatprep.subr.bf16.mxu1 %v8827_v22 }
 0x612   :  { %7146 = vmatpush3.bf16.msra.mxu1 %v8830_v9 }
 0x613   :  { %7148 = vmatprep.subr.bf16.mxu1 %v8833_v53 }
 0x616   :  { %7150 = vmatpush3.bf16.msra.mxu1 %v8836_v46 }
 0x617   :  { %7159 = vmatprep.subr.msk.bf16.mxu1 %vm8907_vm5, %v8911_v6 }
 0x619   :  { %3248 = vmatmul.mubr.f32.vlgmr.msra.gmra.mrb[24].mxu1 %v3041_v2 }
 0x61a   :  { %3450 = vmatprep.mubr.f32.mxu1 %v7996_v30  ;;  %7162 = vmatpush1.bf16.msk.msra.mxu1 %vm8907_vm5, %v8916_v20 }
 0x61b   :  { %7171 = vmatprep.subr.msk.bf16.mxu1 %vm8907_vm5, %v7151_v35 }
 0x68c   :  { %v5944_v25 = vpop.f32.mrb[18].mxu1 }
 0x68d   :  { %v5945_v15 = vpop.f32.mrb[19].mxu1 }
 0x68e   :  { %v5946_v12 = vadd.f32 %v5945_v15, %v5944_v25  ;;  %v3827_v25 = vld [vmem:[#allocation10 + $0x28] sm:$0xff]  ;;  %v7189_v15 = vpack.c.bf16 %v3824_v40, %v3822_v44  ;;  %v3858_v44 = vld [vmem:[#allocation10 + $0x120] sm:$0xff]  ;;  %v3860_v40 = vld [vmem:[#allocation10 + $0x130] sm:$0xff] }
 0x690   :  { %v3034_v42 = vadd.f32 %v5946_v12, %v2964_v5  ;;  %v3290_v5 = vld [vmem:[#allocation9 + $0x50] sm:$0xf]  ;;  %v3826_v12 = vld [vmem:[#allocation10 + $0x20] sm:$0xff] }
 0x691   :  { %v7166_v2 = vpack.c.bf16 %v3290_v5, %v3284_v28  ;;  %v3852_v28 = vld [vmem:[#allocation10 + $0xf0] sm:$0xff]  ;;  %v3855_v5 = vld [vmem:[#allocation10 + $0x108] sm:$0xff] }
 0x692   :  { %v3254_v50 = vsel %vm3253_vm6, %v3034_v42, 0.0  ;;  %v3828_v42 = vld [vmem:[#allocation10 + $0x30] sm:$0xff] }
 0x693   :  { %v3255_v4 = vrot.slane %v3254_v50, 4 }
 0x695   :  { %v3256_v10 = vadd.f32 %v3255_v4, %v3254_v50  ;;  %v3836_v50 = vld [vmem:[#allocation10 + $0x70] sm:$0xff]  ;;  %v3839_v4 = vld [vmem:[#allocation10 + $0x88] sm:$0xff] }
 0x697   :  { %v3257_v45 = vrot.slane %v3256_v10, 2 }
 0x699   :  { %v3258_v31 = vadd.f32 %v3257_v45, %v3256_v10  ;;  %v3841_v10 = vld [vmem:[#allocation10 + $0x98] sm:$0xff] }
 0x69b   :  { %v3259_v58 = vrot.slane %v3258_v31, 1 }
 0x69d   :  { %v3260_v3 = vadd.f32 %v3259_v58, %v3258_v31  ;;  %v3843_v31 = vld [vmem:[#allocation10 + $0xa8] sm:$0xff] }
 0x69f   :  { %v3261_v49 = vmul.f32 0.0078125, %v3260_v3  ;;  %v3847_v3 = vld [vmem:[#allocation10 + $0xc8] sm:$0xff] }
 0x6a1   :  { %v3270_v1 = vmul.f32 %v3261_v49, %v3261_v49 }
 0x6ac   :  { %v5979_v37 = vpop.f32.mrb[20].mxu1 }
 0x6ad   :  { %v5980_v0 = vpop.f32.mrb[21].mxu1 }
 0x6ae   :  { %v5981_v62 = vadd.f32 %v5980_v0, %v5979_v37  ;;  %v3830_v37 = vld [vmem:[#allocation10 + $0x40] sm:$0xff]  ;;  %v3832_v0 = vld [vmem:[#allocation10 + $0x50] sm:$0xff] }
 0x6cc   :  { %v6014_v54 = vpop.f32.mrb[22].mxu1 }
 0x6cd   :  { %v6015_v13 = vpop.f32.mrb[23].mxu1 }
 0x6ce   :  { %v6016_v56 = vadd.f32 %v6015_v13, %v6014_v54  ;;  %v3837_v54 = vld [vmem:[#allocation10 + $0x78] sm:$0xff]  ;;  %v7197_v13 = vpack.c.bf16 %v3832_v0, %v3830_v37  ;;  %v3868_v37 = vld [vmem:[#allocation10 + $0x170] sm:$0xff]  ;;  %v3871_v0 = vld [vmem:[#allocation10 + $0x188] sm:$0xff] }
 0x6d0   :  { %v3180_v41 = vadd.f32 %v6016_v56, %v5981_v62  ;;  %v3835_v62 = vld [vmem:[#allocation10 + $0x68] sm:$0xff] }
 0x6d1   :  { %v7199_v56 = vpack.c.bf16 %v3837_v54, %v3835_v62  ;;  %v3873_v62 = vld [vmem:[#allocation10 + $0x198] sm:$0xff] }
 0x6ec   :  { %v6049_v59 = vpop.f32.mrb[24].mxu1 }
 0x6ed   :  { %v6050_v18 = vpop.f32.mrb[25].mxu1 }
 0x6ee   :  { %v6051_v22 = vadd.f32 %v6050_v18, %v6049_v59  ;;  %v7203_v59 = vpack.c.bf16 %v3841_v10, %v3839_v4  ;;  %v3838_v18 = vld [vmem:[#allocation10 + $0x80] sm:$0xff]  ;;  %v3875_v4 = vld [vmem:[#allocation10 + $0x1a8] sm:$0xff]  ;;  %v3877_v10 = vld [vmem:[#allocation10 + $0x1b8] sm:$0xff] }
 0x6f0   :  { %v3250_v51 = vadd.f32 %v6051_v22, %v3180_v41  ;;  %v3834_v41 = vld [vmem:[#allocation10 + $0x60] sm:$0xff]  ;;  %v3840_v22 = vld [vmem:[#allocation10 + $0x90] sm:$0xff] }
 0x6f1   :  { %v7201_v45 = vpack.c.bf16 %v3836_v50, %v3834_v41  ;;  %v3872_v41 = vld [vmem:[#allocation10 + $0x190] sm:$0xff] }
 0x6f2   :  { %v3262_v57 = vsel %vm3253_vm6, %v3250_v51, 0.0  ;;  %v3845_v51 = vld [vmem:[#allocation10 + $0xb8] sm:$0xff] }
 0x6f3   :  { %v3263_v9 = vrot.slane %v3262_v57, 4  ;;  %v7207_v58 = vpack.c.bf16 %v3845_v51, %v3843_v31  ;;  %v3879_v31 = vld [vmem:[#allocation10 + $0x1c8] sm:$0xff]  ;;  %v3881_v51 = vld [vmem:[#allocation10 + $0x1d8] sm:$0xff] }
 0x6f5   :  { %v3264_v53 = vadd.f32 %v3263_v9, %v3262_v57  ;;  %v7205_v57 = vpack.c.bf16 %v3840_v22, %v3838_v18  ;;  %v3842_v9 = vld [vmem:[#allocation10 + $0xa0] sm:$0xff]  ;;  %v3876_v18 = vld [vmem:[#allocation10 + $0x1b0] sm:$0xff] }
 0x6f7   :  { %v3265_v23 = vrot.slane %v3264_v53, 2 }
 0x6f9   :  { %v3266_v46 = vadd.f32 %v3265_v23, %v3264_v53  ;;  %v3844_v53 = vld [vmem:[#allocation10 + $0xb0] sm:$0xff]  ;;  %v3849_v23 = vld [vmem:[#allocation10 + $0xd8] sm:$0xff] }
 0x6fb   :  { %v3267_v38 = vrot.slane %v3266_v46, 1 }
 0x6fd   :  { %v3268_v47 = vadd.f32 %v3267_v38, %v3266_v46  ;;  %v7209_v46 = vpack.c.bf16 %v3844_v53, %v3842_v9  ;;  %v3846_v38 = vld [vmem:[#allocation10 + $0xc0] sm:$0xff]  ;;  %v3880_v9 = vld [vmem:[#allocation10 + $0x1d0] sm:$0xff] }
 0x6ff   :  { %v3269_v21 = vmul.f32 0.0078125, %v3268_v47  ;;  %v3848_v47 = vld [vmem:[#allocation10 + $0xd0] sm:$0xff] }
 0x701   :  { %v3271_v19 = vsub.f32 %v3269_v21, %v3270_v1  ;;  %v3851_v1 = vld [vmem:[#allocation10 + $0xe8] sm:$0xff]  ;;  %v3853_v21 = vld [vmem:[#allocation10 + $0xf8] sm:$0xff] }
 0x703   :  { %v3272_v39 = vmax.f32 %v3271_v19, 0.0  ;;  %v7213_v19 = vpack.c.bf16 %v3848_v47, %v3846_v38  ;;  %v3884_v38 = vld [vmem:[#allocation10 + $0x1f0] sm:$0xff] }
 0x705   :  { %v3274_v36 = vadd.f32 1e-05, %v3272_v39  ;;  %v7215_v39 = vpack.c.bf16 %v3853_v21, %v3851_v1  ;;  %v3887_v1 = vld [vmem:[#allocation10 + $0x208] sm:$0xff]  ;;  %v3889_v21 = vld [vmem:[#allocation10 + $0x218] sm:$0xff] }
 0x707   :  { %7592 = vrsqrt.f32 %v3274_v36  ;;  %v3850_v36 = vld [vmem:[#allocation10 + $0xe0] sm:$0xff] }
 0x711   :  { %v7593_v63 = vpop.eup %7592 }
 0x712   :  { %v3276_v52 = vmul.f32 %v7593_v63, %v3273_v17  ;;  %v3857_v17 = vld [vmem:[#allocation10 + $0x118] sm:$0xff]  ;;  %v7217_v63 = vpack.c.bf16 %v3852_v28, %v3850_v36 }
 0x714   :  { %5592 = vmatmul.mubr.msk.f32.vlgmr.msra.gmra.mrb[16].mxu0 %vm3292_vm7, %v3276_v52  ;;  %5595 = vmatmul.mubr.msk.f32.vlgmr.msra.gmra.mrb[26].mxu1 %vm3292_vm7, %v3276_v52  ;;  %v3278_v24 = vmul.f32 %v3276_v52, %v3261_v49  ;;  %v7211_v49 = vpack.c.bf16 %v3849_v23, %v3847_v3  ;;  %v3883_v3 = vld [vmem:[#allocation10 + $0x1e8] sm:$0xff]  ;;  %v3885_v23 = vld [vmem:[#allocation10 + $0x1f8] sm:$0xff] }
 0x715   :  { %7174 = vmatpush1.bf16.msk.msra.mxu1 %vm8907_vm5, %v7154_v48  ;;  %7168 = vmatpush1.bf16.msk.msra.mxu0 %vm8907_vm5, %v7166_v2  ;;  %v3829_v48 = vld [vmem:[#allocation10 + $0x38] sm:$0xff] }
 0x716   :  { %3521 = vmatprep.mubr.f32.mxu0 %v7996_v30  ;;  %3595 = vmatprep.mubr.f32.mxu1 %v7996_v30  ;;  %v3279_v35 = vsub.f32 %v3277_v16, %v3278_v24  ;;  %v3856_v16 = vld [vmem:[#allocation10 + $0x110] sm:$0xff]  ;;  %v3859_v24 = vld [vmem:[#allocation10 + $0x128] sm:$0xff] }
 0x717   :  { %7177 = vmatprep.subr.msk.bf16.mxu0 %vm8907_vm5, %v8911_v6  ;;  %7183 = vmatprep.subr.msk.bf16.mxu1 %vm8907_vm5, %v7163_v61  ;;  %v7191_v6 = vpack.c.bf16 %v3829_v48, %v3827_v25  ;;  %v7195_v61 = vpack.c.bf16 %v3833_v60, %v3831_v8  ;;  %v3865_v25 = vld [vmem:[#allocation10 + $0x158] sm:$0xff]  ;;  %v7225_v48 = vpack.c.bf16 %v3860_v40, %v3858_v44 }
 0x718   :  { %5598 = vmatmul.mubr.msk.f32.vlgmr.msra.gmra.mrb[18].mxu0 %vm3292_vm7, %v3276_v52  ;;  %5601 = vmatmul.mubr.msk.f32.vlgmr.msra.gmra.mrb[28].mxu1 %vm3292_vm7, %v3279_v35  ;;  %v3854_v52 = vld [vmem:[#allocation10 + $0x100] sm:$0xff]  ;;  %v3869_v8 = vld [vmem:[#allocation10 + $0x178] sm:$0xff] }
 0x719   :  { %7180 = vmatpush1.bf16.msk.msra.mxu0 %vm8907_vm5, %v8916_v20  ;;  %7186 = vmatpush1.bf16.msk.msra.mxu1 %vm8907_vm5, %v7166_v2  ;;  %v7193_v20 = vpack.c.bf16 %v3828_v42, %v3826_v12  ;;  %v7219_v2 = vpack.c.bf16 %v3857_v17, %v3855_v5  ;;  %v7221_v34 = vpack.c.bf16 %v3856_v16, %v3854_v52  ;;  %v3864_v12 = vld [vmem:[#allocation10 + $0x150] sm:$0xff]  ;;  %v3867_v42 = vld [vmem:[#allocation10 + $0x168] sm:$0xff] }
 0x71a   :  { %3666 = vmatprep.mubr.f32.mxu0 %v7996_v30  ;;  %3737 = vmatprep.mubr.f32.mxu1 %v7996_v30 }
 0x71b   :  { %7188 = vmatprep.subr.bf16.mxu0 %v7187_v26  ;;  %v3863_v26 = vld [vmem:[#allocation10 + $0x148] sm:$0xff] }
 0x71c   :  { %5604 = vmatmul.mubr.msk.f32.vlgmr.msra.gmra.mrb[20].mxu0 %vm3292_vm7, %v3279_v35  ;;  %5607 = vmatmul.mubr.msk.f32.vlgmr.msra.gmra.mrb[30].mxu1 %vm3292_vm7, %v3279_v35  ;;  %v7223_v35 = vpack.c.bf16 %v3861_v7, %v3859_v24 }
 0x71d   :  { %7190 = vmatpush1.bf16.msra.mxu0 %v7189_v15  ;;  %v7227_v15 = vpack.c.bf16 %v3865_v25, %v3863_v26 }
 0x71e   :  { %7192 = vmatprep.subr.bf16.mxu0 %v7191_v6  ;;  %v3862_v6 = vld [vmem:[#allocation10 + $0x140] sm:$0xff] }
 0x71f   :  { %v7229_v60 = vpack.c.bf16 %v3864_v12, %v3862_v6 }
 0x721   :  { %7194 = vmatpush1.bf16.msra.mxu0 %v7193_v20  ;;  %v7231_v20 = vpack.c.bf16 %v3869_v8, %v3867_v42  ;;  %v3886_v8 = vld [vmem:[#allocation10 + $0x200] sm:$0xff] }
 0x722   :  { %7196 = vmatprep.subr.bf16.mxu0 %v7195_v61  ;;  %v3866_v61 = vld [vmem:[#allocation10 + $0x160] sm:$0xff] }
 0x723   :  { %v7233_v54 = vpack.c.bf16 %v3868_v37, %v3866_v61 }
 0x725   :  { %7198 = vmatpush1.bf16.msra.mxu0 %v7197_v13  ;;  %v7235_v13 = vpack.c.bf16 %v3873_v62, %v3871_v0 }
 0x726   :  { %7200 = vmatprep.subr.bf16.mxu0 %v7199_v56  ;;  %v3870_v56 = vld [vmem:[#allocation10 + $0x180] sm:$0xff] }
 0x727   :  { %v7237_v50 = vpack.c.bf16 %v3872_v41, %v3870_v56 }
 0x729   :  { %7202 = vmatpush1.bf16.msra.mxu0 %v7201_v45  ;;  %v7239_v45 = vpack.c.bf16 %v3877_v10, %v3875_v4 }
 0x72a   :  { %7204 = vmatprep.subr.bf16.mxu0 %v7203_v59  ;;  %v3874_v59 = vld [vmem:[#allocation10 + $0x1a0] sm:$0xff] }
 0x72b   :  { %v7241_v22 = vpack.c.bf16 %v3876_v18, %v3874_v59 }
 0x72d   :  { %7206 = vmatpush1.bf16.msra.mxu0 %v7205_v57  ;;  %v7243_v57 = vpack.c.bf16 %v3881_v51, %v3879_v31  ;;  %v3892_v31 = vld [vmem:[#allocation10 + $0x230] sm:$0xff] }
 0x72e   :  { %7208 = vmatprep.subr.bf16.mxu0 %v7207_v58  ;;  %v3878_v58 = vld [vmem:[#allocation10 + $0x1c0] sm:$0xff] }
 0x72f   :  { %v7245_v53 = vpack.c.bf16 %v3880_v9, %v3878_v58  ;;  %v3897_v58 = vld [vmem:[#allocation10 + $0x258] sm:$0xff] }
 0x731   :  { %7210 = vmatpush1.bf16.msra.mxu0 %v7209_v46  ;;  %v7247_v46 = vpack.c.bf16 %v3885_v23, %v3883_v3  ;;  %v4227_v3 = vld [vmem:[#allocation12] sm:$0xff]  ;;  %v4228_v23 = vld [vmem:[#allocation12 + $0x8] sm:$0xff] }
 0x732   :  { %7212 = vmatprep.subr.bf16.mxu0 %v7211_v49  ;;  %v3882_v49 = vld [vmem:[#allocation10 + $0x1e0] sm:$0xff] }
 0x733   :  { %v7249_v47 = vpack.c.bf16 %v3884_v38, %v3882_v49 }
 0x735   :  { %7214 = vmatpush1.bf16.msra.mxu0 %v7213_v19  ;;  %v7251_v19 = vpack.c.bf16 %v3889_v21, %v3887_v1  ;;  %v3896_v1 = vld [vmem:[#allocation10 + $0x250] sm:$0xff]  ;;  %v7998_v21 = vmov 0.0|0.0  }
 0x736   :  { %7216 = vmatprep.subr.bf16.mxu0 %v7215_v39  ;;  %7379 = vmatprep.subr.bf16.mxu1 %v7998_v21 }
 0x739   :  { %7218 = vmatpush1.bf16.msra.mxu0 %v7217_v63 }
 0x73a   :  { %7220 = vmatprep.subr.bf16.mxu0 %v7219_v2 }
 0x73d   :  { %7222 = vmatpush1.bf16.msra.mxu0 %v7221_v34 }
 0x73e   :  { %7224 = vmatprep.subr.bf16.mxu0 %v7223_v35 }
 0x741   :  { %7226 = vmatpush1.bf16.msra.mxu0 %v7225_v48 }
 0x742   :  { %7228 = vmatprep.subr.bf16.mxu0 %v7227_v15 }
 0x745   :  { %7230 = vmatpush1.bf16.msra.mxu0 %v7229_v60  ;;  %v3888_v60 = vld [vmem:[#allocation10 + $0x210] sm:$0xff] }
 0x746   :  { %7232 = vmatprep.subr.bf16.mxu0 %v7231_v20  ;;  %v3891_v20 = vld [vmem:[#allocation10 + $0x228] sm:$0xff]  ;;  %v7253_v4 = vpack.c.bf16 %v3888_v60, %v3886_v8  ;;  %v3906_v8 = vld [vmem:[#allocation10 + $0x2a0] sm:$0xff]  ;;  %v3908_v60 = vld [vmem:[#allocation10 + $0x2b0] sm:$0xff] }
 0x749   :  { %7234 = vmatpush1.bf16.msra.mxu0 %v7233_v54 }
 0x74a   :  { %7236 = vmatprep.subr.bf16.mxu0 %v7235_v13  ;;  %v3893_v13 = vld [vmem:[#allocation10 + $0x238] sm:$0xff] }
 0x74b   :  { %v7255_v18 = vpack.c.bf16 %v3893_v13, %v3891_v20  ;;  %v3911_v20 = vld [vmem:[#allocation10 + $0x2c8] sm:$0xff] }
 0x74d   :  { %7238 = vmatpush1.bf16.msra.mxu0 %v7237_v50 }
 0x74e   :  { %7240 = vmatprep.subr.bf16.mxu0 %v7239_v45 }
 0x751   :  { %7242 = vmatpush1.bf16.msra.mxu0 %v7241_v22  ;;  %v3890_v22 = vld [vmem:[#allocation10 + $0x220] sm:$0xff] }
 0x752   :  { %7244 = vmatprep.subr.bf16.mxu0 %v7243_v57  ;;  %v3895_v57 = vld [vmem:[#allocation10 + $0x248] sm:$0xff] }
 0x753   :  { %v7259_v38 = vpack.c.bf16 %v3897_v58, %v3895_v57  ;;  %v3916_v57 = vld [vmem:[#allocation10 + $0x2f0] sm:$0xff]  ;;  %v3919_v58 = vld [vmem:[#allocation10 + $0x308] sm:$0xff] }
 0x755   :  { %7246 = vmatpush1.bf16.msra.mxu0 %v7245_v53  ;;  %v7257_v53 = vpack.c.bf16 %v3892_v31, %v3890_v22  ;;  %v4240_v22 = vld [vmem:[#allocation12 + $0x68] sm:$0xff] }
 0x756   :  { %7248 = vmatprep.subr.bf16.mxu0 %v7247_v46  ;;  %v4229_v46 = vld [vmem:[#allocation12 + $0x10] sm:$0xff] }
 0x759   :  { %7250 = vmatpush1.bf16.msra.mxu0 %v7249_v47  ;;  %v3894_v47 = vld [vmem:[#allocation10 + $0x240] sm:$0xff] }
 0x75a   :  { %7252 = vmatprep.subr.bf16.mxu0 %v7251_v19  ;;  %v8987_v19 = vpack.c.bf16 %v4228_v23, %v4227_v3  ;;  %v4241_v23 = vld [vmem:[#allocation12 + $0x70] sm:$0xff] }
 0x75c   :  { %7381 = vmatpush1.bf16.msra.mxu1 %v8987_v19 }
 0x75d   :  { %7382 = vmatprep.subr.bf16.mxu1 %v7998_v21 }
 0x7e7   :  { %v3381_v39 = vpop.f32.mrb[16].mxu0  ;;  %v3452_v36 = vpop.f32.mrb[26].mxu1 }
 0x7e8   :  { %v3747_v28 = vrot.slane %v3381_v39, %v8617_v43  ;;  %v3755_v5 = vrot.slane %v3452_v36, %v8617_v43  ;;  %v3383_v17 = vpop.f32.mrb[17].mxu0  ;;  %v3454_v63 = vpop.f32.mrb[27].mxu1  ;;  %v4230_v39 = vld [vmem:[#allocation12 + $0x18] sm:$0xff]  ;;  %v3899_v36 = vld [vmem:[#allocation10 + $0x268] sm:$0xff] }
 0x7e9   :  { %v3751_v2 = vrot.slane %v3383_v17, %v8617_v43  ;;  %v3759_v52 = vrot.slane %v3454_v63, %v8617_v43  ;;  %v7261_v17 = vpack.c.bf16 %v3896_v1, %v3894_v47  ;;  %v4231_v63 = vld [vmem:[#allocation12 + $0x20] sm:$0xff]  ;;  %v3920_v47 = vld [vmem:[#allocation10 + $0x310] sm:$0xff]  ;;  %v3923_v1 = vld [vmem:[#allocation10 + $0x328] sm:$0xff] }
 0x7ea   :  { %v3768_v16 = vmul.f32 %v3747_v28, %v8735_v11  ;;  %v3770_v24 = vmul.f32 %v3755_v5, %v8739_v14  ;;  %v3901_v28 = vld [vmem:[#allocation10 + $0x278] sm:$0xff]  ;;  %v8990_v5 = vpack.c.bf16 %v4230_v39, %v4229_v46 }
 0x7eb   :  { %v3769_v7 = vmul.f32 %v3751_v2, %v8741_v32  ;;  %v3771_v34 = vmul.f32 %v3759_v52, %v8745_v55  ;;  %v3523_v35 = vpop.f32.mrb[18].mxu0  ;;  %v3597_v44 = vpop.f32.mrb[28].mxu1  ;;  %v4232_v2 = vld [vmem:[#allocation12 + $0x28] sm:$0xff]  ;;  %v7263_v52 = vpack.c.bf16 %v3901_v28, %v3899_v36  ;;  %v4242_v46 = vld [vmem:[#allocation12 + $0x78] sm:$0xff] }
 0x7ec   :  { %v3763_v40 = vrot.slane %v3523_v35, %v8617_v43  ;;  %v3777_v26 = vrot.slane %v3597_v44, %v8617_v43  ;;  %v3525_v25 = vpop.f32.mrb[19].mxu0  ;;  %v3599_v48 = vpop.f32.mrb[29].mxu1  ;;  %7384 = vmatpush1.bf16.msra.mxu1 %v8990_v5  ;;  %v8994_v35 = vpack.c.bf16 %v4232_v2, %v4231_v63  ;;  %v3925_v39 = vld [vmem:[#allocation10 + $0x338] sm:$0xff]  ;;  %v9014_v36 = vpack.c.bf16 %v4242_v46, %v4241_v23  ;;  %v4244_v63 = vld [vmem:[#allocation12 + $0x88] sm:$0xff] }
 0x7ed   :  { %v3767_v15 = vrot.slane %v3525_v25, %v8617_v43  ;;  %v3781_v6 = vrot.slane %v3599_v48, %v8617_v43  ;;  %7385 = vmatprep.subr.bf16.mxu1 %v7998_v21  ;;  %v3902_v48 = vld [vmem:[#allocation10 + $0x280] sm:$0xff]  ;;  %v7287_v2 = vpack.c.bf16 %v3925_v39, %v3923_v1  ;;  %v3949_v1 = vld [vmem:[#allocation10 + $0x3f8] sm:$0xff] }
 0x7ee   :  { %v3772_v11 = vmul.f32 %v3763_v40, %v8841_v27  ;;  %v3798_v12 = vadd.f32 %v3777_v26, %v3768_v16  ;;  %v3898_v16 = vld [vmem:[#allocation10 + $0x260] sm:$0xff]  ;;  %v4233_v40 = vld [vmem:[#allocation12 + $0x30] sm:$0xff]  ;;  %v4234_v26 = vld [vmem:[#allocation12 + $0x38] sm:$0xff] }
 0x7ef   :  { %v3773_v14 = vmul.f32 %v3767_v15, %v8843_v33  ;;  %v3799_v32 = vadd.f32 %v3781_v6, %v3769_v7  ;;  %v3668_v42 = vpop.f32.mrb[20].mxu0  ;;  %v3739_v55 = vpop.f32.mrb[30].mxu1  ;;  %v3903_v7 = vld [vmem:[#allocation10 + $0x288] sm:$0xff]  ;;  %v3904_v15 = vld [vmem:[#allocation10 + $0x290] sm:$0xff] }
 0x7f0   :  { %v3810_v61 = vmul.f32 0.2, %v3798_v12  ;;  %v3785_v37 = vrot.slane %v3668_v42, %v8617_v43  ;;  %v3793_v0 = vrot.slane %v3739_v55, %v8617_v43  ;;  %v3670_v62 = vpop.f32.mrb[21].mxu0  ;;  %v3741_v54 = vpop.f32.mrb[31].mxu1  ;;  %vm3804_vm8 = vcmp.ge.f32.partialorder %v3798_v12, 0.0  ;;  %v3907_v6 = vld [vmem:[#allocation10 + $0x2a8] sm:$0xff]  ;;  %7387 = vmatpush1.bf16.msra.mxu1 %v8994_v35 }
 0x7f1   :  { %v3789_v27 = vrot.slane %v3670_v62, %v8617_v43  ;;  %v3797_v56 = vrot.slane %v3741_v54, %v8617_v43  ;;  %vm3805_vm9 = vcmp.ge.f32.partialorder %v3799_v32, 0.0  ;;  %v3811_v33 = vmul.f32 0.2, %v3799_v32  ;;  %7388 = vmatprep.subr.bf16.mxu1 %v7998_v21  ;;  %v4236_v42 = vld [vmem:[#allocation12 + $0x48] sm:$0xff]  ;;  %v4237_v62 = vld [vmem:[#allocation12 + $0x50] sm:$0xff]  ;;  %v4238_v54 = vld [vmem:[#allocation12 + $0x58] sm:$0xff] }
 0x7f2   :  { %v8979_v41 = vadd.f32 %v3785_v37, %v3770_v24  ;;  %v8981_v50 = vadd.f32 %v3793_v0, %v3772_v11  ;;  %v3816_v51 = vsel %vm3804_vm8, %v3798_v12, %v3810_v61  ;;  %v3900_v24 = vld [vmem:[#allocation10 + $0x270] sm:$0xff]  ;;  %v3909_v11 = vld [vmem:[#allocation10 + $0x2b8] sm:$0xff]  ;;  %v8998_v12 = vpack.c.bf16 %v4234_v26, %v4233_v40 }
 0x7f3   :  { %v3801_v10 = vadd.f32 %v3789_v27, %v3771_v34  ;;  %v8983_v45 = vadd.f32 %v3797_v56, %v3773_v14  ;;  %v3817_v59 = vsel %vm3805_vm9, %v3799_v32, %v3811_v33  ;;  %v3905_v34 = vld [vmem:[#allocation10 + $0x298] sm:$0xff]  ;;  %v7265_v44 = vpack.c.bf16 %v3900_v24, %v3898_v16  ;;  %v4235_v32 = vld [vmem:[#allocation12 + $0x40] sm:$0xff]  ;;  %v3912_v56 = vld [vmem:[#allocation10 + $0x2d0] sm:$0xff] }
 0x7f4   :  { %4078 = vmatprep.mubr.f32.mxu0 %v3817_v59  ;;  %v7267_v25 = vpack.c.bf16 %v3905_v34, %v3903_v7  ;;  %v7269_v14 = vpack.c.bf16 %v3904_v15, %v3902_v48  ;;  %v7271_v55 = vpack.c.bf16 %v3909_v11, %v3907_v6  ;;  %v3913_v61 = vld [vmem:[#allocation10 + $0x2d8] sm:$0xff]  ;;  %7390 = vmatpush1.bf16.msra.mxu1 %v8998_v12  ;;  %v3910_v27 = vld [vmem:[#allocation10 + $0x2c0] sm:$0xff]  ;;  %v3915_v33 = vld [vmem:[#allocation10 + $0x2e8] sm:$0xff]  ;;  %vm3806_vm11 = vcmp.ge.f32.partialorder %v8979_v41, 0.0 }
 0x7f5   :  { %4079 = vmatmul.mubr.f32.vlgmr.msra.gmra.mrb[22].mxu0 %v3816_v51  ;;  %vm3807_vm10 = vcmp.ge.f32.partialorder %v3801_v10, 0.0  ;;  %v3813_v9 = vmul.f32 0.2, %v3801_v10  ;;  %v9002_v37 = vpack.c.bf16 %v4236_v42, %v4235_v32  ;;  %v7273_v0 = vpack.c.bf16 %v3908_v60, %v3906_v8  ;;  %7391 = vmatprep.subr.bf16.mxu1 %v7998_v21  ;;  %v3914_v51 = vld [vmem:[#allocation10 + $0x2e0] sm:$0xff]  ;;  %v3924_v16 = vld [vmem:[#allocation10 + $0x330] sm:$0xff]  ;;  %v3927_v24 = vld [vmem:[#allocation10 + $0x348] sm:$0xff] }
 0x7f6   :  { %7254 = vmatpush1.bf16.msra.mxu0 %v7253_v4  ;;  %v7275_v13 = vpack.c.bf16 %v3913_v61, %v3911_v20  ;;  %v3917_v4 = vld [vmem:[#allocation10 + $0x2f8] sm:$0xff]  ;;  %v7277_v59 = vpack.c.bf16 %v3912_v56, %v3910_v27  ;;  %v7281_v3 = vpack.c.bf16 %v3916_v57, %v3914_v51  ;;  %v4245_v40 = vld [vmem:[#allocation12 + $0x90] sm:$0xff]  ;;  %v3926_v48 = vld [vmem:[#allocation10 + $0x340] sm:$0xff]  ;;  %vm3809_vm12 = vcmp.ge.f32.partialorder %v8983_v45, 0.0 }
 0x7f7   :  { %7256 = vmatprep.subr.bf16.mxu0 %v7255_v18  ;;  %v3819_v49 = vsel %vm3807_vm10, %v3801_v10, %v3813_v9  ;;  %v9006_v10 = vpack.c.bf16 %v4238_v54, %v4237_v62  ;;  %v4239_v18 = vld [vmem:[#allocation12 + $0x60] sm:$0xff]  ;;  %v7279_v31 = vpack.c.bf16 %v3917_v4, %v3915_v33  ;;  %v3921_v9 = vld [vmem:[#allocation10 + $0x318] sm:$0xff]  ;;  %v3928_v15 = vld [vmem:[#allocation10 + $0x350] sm:$0xff]  ;;  %vm3808_vm13 = vcmp.ge.f32.partialorder %v8981_v50, 0.0 }
 0x7f8   :  { %4149 = vmatprep.mubr.f32.mxu0 %v3819_v49  ;;  %7393 = vmatpush1.bf16.msra.mxu1 %v9002_v37  ;;  %v7283_v49 = vpack.c.bf16 %v3921_v9, %v3919_v58  ;;  %v3929_v7 = vld [vmem:[#allocation10 + $0x358] sm:$0xff]  ;;  %v3931_v6 = vld [vmem:[#allocation10 + $0x368] sm:$0xff]  ;;  %v7293_v32 = vpack.c.bf16 %v3928_v15, %v3926_v48  ;;  %v4247_v42 = vld [vmem:[#allocation12 + $0xa0] sm:$0xff]  ;;  %v3815_v48 = vmul.f32 0.2, %v8983_v45  ;;  %vm5557_vm9 = vcmask 386048  }
 0x7f9   :  { %7394 = vmatprep.subr.bf16.mxu1 %v7998_v21  ;;  %v4246_v26 = vld [vmem:[#allocation12 + $0x98] sm:$0xff]  ;;  %v3930_v60 = vld [vmem:[#allocation10 + $0x360] sm:$0xff]  ;;  %v3932_v20 = vld [vmem:[#allocation10 + $0x370] sm:$0xff] }
 0x7fa   :  { %7258 = vmatpush1.bf16.msra.mxu0 %v7257_v53  ;;  %v9010_v53 = vpack.c.bf16 %v4240_v22, %v4239_v18  ;;  %v3933_v11 = vld [vmem:[#allocation10 + $0x378] sm:$0xff]  ;;  %v3935_v61 = vld [vmem:[#allocation10 + $0x388] sm:$0xff]  ;;  %v7297_v54 = vpack.c.bf16 %v3932_v20, %v3930_v60  ;;  %v3934_v33 = vld [vmem:[#allocation10 + $0x380] sm:$0xff]  ;;  %v3821_v60 = vsel %vm3809_vm12, %v8983_v45, %v3815_v48 }
 0x7fb   :  { %7260 = vmatprep.subr.bf16.mxu0 %v7259_v38  ;;  %v3918_v38 = vld [vmem:[#allocation10 + $0x300] sm:$0xff]  ;;  %v7295_v8 = vpack.c.bf16 %v3933_v11, %v3931_v6  ;;  %v4250_v27 = vld [vmem:[#allocation12 + $0xb8] sm:$0xff]  ;;  %v3936_v4 = vld [vmem:[#allocation10 + $0x390] sm:$0xff] }
 0x7fc   :  { %7396 = vmatpush1.bf16.msra.mxu1 %v9006_v10  ;;  %v7285_v28 = vpack.c.bf16 %v3920_v47, %v3918_v38  ;;  %v3941_v18 = vld [vmem:[#allocation10 + $0x3b8] sm:$0xff]  ;;  %v3938_v57 = vld [vmem:[#allocation10 + $0x3a0] sm:$0xff]  ;;  %v3940_v58 = vld [vmem:[#allocation10 + $0x3b0] sm:$0xff] }
 0x7fd   :  { %7397 = vmatprep.subr.bf16.mxu1 %v7998_v21  ;;  %v3943_v9 = vld [vmem:[#allocation10 + $0x3c8] sm:$0xff]  ;;  %v7305_v23 = vpack.c.bf16 %v3940_v58, %v3938_v57  ;;  %v3944_v38 = vld [vmem:[#allocation10 + $0x3d0] sm:$0xff]  ;;  %v3954_v11 = vld [vmem:[#allocation10 + $0x420] sm:$0xff] }
 0x7fe   :  { %7262 = vmatpush1.bf16.msra.mxu0 %v7261_v17  ;;  %v4243_v17 = vld [vmem:[#allocation12 + $0x80] sm:$0xff]  ;;  %v3947_v47 = vld [vmem:[#allocation10 + $0x3e8] sm:$0xff]  ;;  %v3968_v57 = vld [vmem:[#allocation10 + $0x490] sm:$0xff] }
 0x7ff   :  { %7264 = vmatprep.subr.bf16.mxu0 %v7263_v52  ;;  %v3922_v52 = vld [vmem:[#allocation10 + $0x320] sm:$0xff]  ;;  %v9018_v34 = vpack.c.bf16 %v4244_v63, %v4243_v17  ;;  %v3948_v63 = vld [vmem:[#allocation10 + $0x3f0] sm:$0xff]  ;;  %v3971_v58 = vld [vmem:[#allocation10 + $0x4a8] sm:$0xff] }
 0x800   :  { %7399 = vmatpush1.bf16.msra.mxu1 %v9010_v53  ;;  %v3946_v17 = vld [vmem:[#allocation10 + $0x3e0] sm:$0xff] }
 0x801   :  { %7400 = vmatprep.subr.bf16.mxu1 %v7998_v21  ;;  %v3982_v48 = vld [vmem:[#allocation10 + $0x500] sm:$0xff] }
 0x802   :  { %7266 = vmatpush1.bf16.msra.mxu0 %v7265_v44  ;;  %v7289_v44 = vpack.c.bf16 %v3924_v16, %v3922_v52  ;;  %v3953_v52 = vld [vmem:[#allocation10 + $0x418] sm:$0xff]  ;;  %v7313_v16 = vpack.c.bf16 %v3948_v63, %v3946_v17  ;;  %v3976_v17 = vld [vmem:[#allocation10 + $0x4d0] sm:$0xff]  ;;  %v3979_v63 = vld [vmem:[#allocation10 + $0x4e8] sm:$0xff] }
 0x803   :  { %7268 = vmatprep.subr.bf16.mxu0 %v7267_v25  ;;  %v7291_v25 = vpack.c.bf16 %v3929_v7, %v3927_v24  ;;  %v3950_v7 = vld [vmem:[#allocation10 + $0x400] sm:$0xff] }
 0x804   :  { %7402 = vmatpush1.bf16.msra.mxu1 %v9014_v36 }
 0x805   :  { %7403 = vmatprep.subr.bf16.mxu1 %v7998_v21 }
 0x806   :  { %7270 = vmatpush1.bf16.msra.mxu0 %v7269_v14  ;;  %v9022_v14 = vpack.c.bf16 %v4246_v26, %v4245_v40  ;;  %v3812_v40 = vmul.f32 0.2, %v8979_v41  ;;  %v3955_v26 = vld [vmem:[#allocation10 + $0x428] sm:$0xff] }
 0x807   :  { %7272 = vmatprep.subr.bf16.mxu0 %v7271_v55  ;;  %v4248_v55 = vld [vmem:[#allocation12 + $0xa8] sm:$0xff] }
 0x808   :  { %7405 = vmatpush1.bf16.msra.mxu1 %v9018_v34  ;;  %v9026_v62 = vpack.c.bf16 %v4248_v55, %v4247_v42  ;;  %v3818_v42 = vsel %vm3806_vm11, %v8979_v41, %v3812_v40  ;;  %v3959_v55 = vld [vmem:[#allocation10 + $0x448] sm:$0xff]  ;;  %v3964_v41 = vld [vmem:[#allocation10 + $0x470] sm:$0xff]  ;;  %v3985_v40 = vld [vmem:[#allocation10 + $0x518] sm:$0xff] }
 0x809   :  { %7406 = vmatprep.subr.bf16.mxu1 %v7998_v21 }
 0x80a   :  { %7274 = vmatpush1.bf16.msra.mxu0 %v7273_v0  ;;  %v3937_v0 = vld [vmem:[#allocation10 + $0x398] sm:$0xff] }
 0x80b   :  { %7276 = vmatprep.subr.bf16.mxu0 %v7275_v13  ;;  %v4249_v13 = vld [vmem:[#allocation12 + $0xb0] sm:$0xff]  ;;  %v7299_v56 = vpack.c.bf16 %v3937_v0, %v3935_v61  ;;  %v3958_v0 = vld [vmem:[#allocation10 + $0x440] sm:$0xff] }
 0x80c   :  { %7408 = vmatpush1.bf16.msra.mxu1 %v9022_v14  ;;  %v9030_v22 = vpack.c.bf16 %v4250_v27, %v4249_v13  ;;  %v3963_v13 = vld [vmem:[#allocation10 + $0x468] sm:$0xff]  ;;  %v3965_v27 = vld [vmem:[#allocation10 + $0x478] sm:$0xff] }
 0x80d   :  { %7409 = vmatprep.subr.bf16.mxu1 %v7998_v21 }
 0x80e   :  { %7278 = vmatpush1.bf16.msra.mxu0 %v7277_v59  ;;  %v3939_v59 = vld [vmem:[#allocation10 + $0x3a8] sm:$0xff] }
 0x80f   :  { %7280 = vmatprep.subr.bf16.mxu0 %v7279_v31  ;;  %v7301_v31 = vpack.c.bf16 %v3936_v4, %v3934_v33  ;;  %v7303_v51 = vpack.c.bf16 %v3941_v18, %v3939_v59  ;;  %v7327_v33 = vpack.c.bf16 %v3965_v27, %v3963_v13  ;;  %v3962_v4 = vld [vmem:[#allocation10 + $0x460] sm:$0xff]  ;;  %v3967_v59 = vld [vmem:[#allocation10 + $0x488] sm:$0xff]  ;;  %v3969_v18 = vld [vmem:[#allocation10 + $0x498] sm:$0xff] }
 0x810   :  { %7411 = vmatpush1.bf16.msra.mxu1 %v9026_v62  ;;  %v7331_v45 = vpack.c.bf16 %v3969_v18, %v3967_v59  ;;  %v3992_v13 = vld [vmem:[#allocation10 + $0x550] sm:$0xff]  ;;  %v3995_v27 = vld [vmem:[#allocation10 + $0x568] sm:$0xff] }
 0x811   :  { %7412 = vmatprep.subr.bf16.mxu1 %v7998_v21  ;;  %v3996_v59 = vld [vmem:[#allocation10 + $0x570] sm:$0xff]  ;;  %v3999_v18 = vld [vmem:[#allocation10 + $0x588] sm:$0xff] }
 0x812   :  { %7282 = vmatpush1.bf16.msra.mxu0 %v7281_v3  ;;  %v3945_v3 = vld [vmem:[#allocation10 + $0x3d8] sm:$0xff] }
 0x813   :  { %7284 = vmatprep.subr.bf16.mxu0 %v7283_v49  ;;  %v7307_v46 = vpack.c.bf16 %v3945_v3, %v3943_v9  ;;  %v3942_v49 = vld [vmem:[#allocation10 + $0x3c0] sm:$0xff]  ;;  %v3973_v9 = vld [vmem:[#allocation10 + $0x4b8] sm:$0xff] }
 0x814   :  { %7414 = vmatpush1.bf16.msra.mxu1 %v9030_v22  ;;  %v7309_v39 = vpack.c.bf16 %v3944_v38, %v3942_v49  ;;  %v3972_v49 = vld [vmem:[#allocation10 + $0x4b0] sm:$0xff]  ;;  %v3975_v38 = vld [vmem:[#allocation10 + $0x4c8] sm:$0xff] }
 0x815   :  { %7415 = vmatprep.subr.bf16.mxu1 %v7998_v21 }
 0x816   :  { %7286 = vmatpush1.bf16.msra.mxu0 %v7285_v28  ;;  %v7311_v28 = vpack.c.bf16 %v3949_v1, %v3947_v47  ;;  %v3977_v47 = vld [vmem:[#allocation10 + $0x4d8] sm:$0xff] }
 0x817   :  { %7288 = vmatprep.subr.bf16.mxu0 %v7287_v2  ;;  %v3951_v2 = vld [vmem:[#allocation10 + $0x408] sm:$0xff] }
 0x818   :  { %v7315_v24 = vpack.c.bf16 %v3953_v52, %v3951_v2  ;;  %v3981_v2 = vld [vmem:[#allocation10 + $0x4f8] sm:$0xff] }
 0x81a   :  { %7290 = vmatpush1.bf16.msra.mxu0 %v7289_v44  ;;  %v3952_v44 = vld [vmem:[#allocation10 + $0x410] sm:$0xff] }
 0x81b   :  { %7292 = vmatprep.subr.bf16.mxu0 %v7291_v25  ;;  %v3957_v25 = vld [vmem:[#allocation10 + $0x438] sm:$0xff]  ;;  %v7317_v15 = vpack.c.bf16 %v3952_v44, %v3950_v7  ;;  %v3980_v7 = vld [vmem:[#allocation10 + $0x4f0] sm:$0xff]  ;;  %v3983_v44 = vld [vmem:[#allocation10 + $0x508] sm:$0xff] }
 0x81c   :  { %v7319_v6 = vpack.c.bf16 %v3957_v25, %v3955_v26  ;;  %v7347_v25 = vpack.c.bf16 %v3985_v40, %v3983_v44  ;;  %v4012_v44 = vld [vmem:[#allocation10 + $0x5f0] sm:$0xff] }
 0x81e   :  { %7294 = vmatpush1.bf16.msra.mxu0 %v7293_v32  ;;  %v3956_v32 = vld [vmem:[#allocation10 + $0x430] sm:$0xff] }
 0x81f   :  { %7296 = vmatprep.subr.bf16.mxu0 %v7295_v8  ;;  %v3961_v8 = vld [vmem:[#allocation10 + $0x458] sm:$0xff]  ;;  %v7321_v20 = vpack.c.bf16 %v3956_v32, %v3954_v11 }
 0x820   :  { %v7323_v61 = vpack.c.bf16 %v3961_v8, %v3959_v55  ;;  %v3989_v11 = vld [vmem:[#allocation10 + $0x538] sm:$0xff]  ;;  %v3986_v55 = vld [vmem:[#allocation10 + $0x520] sm:$0xff]  ;;  %v3988_v8 = vld [vmem:[#allocation10 + $0x530] sm:$0xff] }
 0x822   :  { %7298 = vmatpush1.bf16.msra.mxu0 %v7297_v54  ;;  %v3960_v54 = vld [vmem:[#allocation10 + $0x450] sm:$0xff] }
 0x823   :  { %7300 = vmatprep.subr.bf16.mxu0 %v7299_v56  ;;  %v7325_v56 = vpack.c.bf16 %v3960_v54, %v3958_v0  ;;  %v3990_v54 = vld [vmem:[#allocation10 + $0x540] sm:$0xff] }
 0x826   :  { %7302 = vmatpush1.bf16.msra.mxu0 %v7301_v31  ;;  %v7329_v31 = vpack.c.bf16 %v3964_v41, %v3962_v4  ;;  %v3994_v41 = vld [vmem:[#allocation10 + $0x560] sm:$0xff] }
 0x827   :  { %7304 = vmatprep.subr.bf16.mxu0 %v7303_v51  ;;  %v3966_v51 = vld [vmem:[#allocation10 + $0x480] sm:$0xff] }
 0x828   :  { %v7333_v3 = vpack.c.bf16 %v3968_v57, %v3966_v51  ;;  %v3998_v57 = vld [vmem:[#allocation10 + $0x580] sm:$0xff] }
 0x82a   :  { %7306 = vmatpush1.bf16.msra.mxu0 %v7305_v23  ;;  %v7335_v23 = vpack.c.bf16 %v3973_v9, %v3971_v58  ;;  %v4000_v58 = vld [vmem:[#allocation10 + $0x590] sm:$0xff]  ;;  %v4003_v9 = vld [vmem:[#allocation10 + $0x5a8] sm:$0xff] }
 0x82b   :  { %7308 = vmatprep.subr.bf16.mxu0 %v7307_v46  ;;  %v3970_v46 = vld [vmem:[#allocation10 + $0x4a0] sm:$0xff] }
 0x82c   :  { %v7337_v1 = vpack.c.bf16 %v3972_v49, %v3970_v46  ;;  %v4002_v49 = vld [vmem:[#allocation10 + $0x5a0] sm:$0xff] }
 0x82e   :  { %7310 = vmatpush1.bf16.msra.mxu0 %v7309_v39  ;;  %v7339_v39 = vpack.c.bf16 %v3977_v47, %v3975_v38  ;;  %v4004_v38 = vld [vmem:[#allocation10 + $0x5b0] sm:$0xff]  ;;  %v4007_v47 = vld [vmem:[#allocation10 + $0x5c8] sm:$0xff] }
 0x82f   :  { %7312 = vmatprep.subr.bf16.mxu0 %v7311_v28  ;;  %v3974_v28 = vld [vmem:[#allocation10 + $0x4c0] sm:$0xff] }
 0x830   :  { %v7341_v52 = vpack.c.bf16 %v3976_v17, %v3974_v28  ;;  %v4006_v17 = vld [vmem:[#allocation10 + $0x5c0] sm:$0xff] }
 0x832   :  { %7314 = vmatpush1.bf16.msra.mxu0 %v7313_v16  ;;  %v7343_v16 = vpack.c.bf16 %v3981_v2, %v3979_v63  ;;  %v4008_v63 = vld [vmem:[#allocation10 + $0x5d0] sm:$0xff]  ;;  %v4011_v2 = vld [vmem:[#allocation10 + $0x5e8] sm:$0xff] }
 0x833   :  { %7316 = vmatprep.subr.bf16.mxu0 %v7315_v24  ;;  %v3978_v24 = vld [vmem:[#allocation10 + $0x4e0] sm:$0xff] }
 0x834   :  { %v7345_v26 = vpack.c.bf16 %v3980_v7, %v3978_v24  ;;  %v4010_v7 = vld [vmem:[#allocation10 + $0x5e0] sm:$0xff] }
 0x835   :  { %4150 = vmatmul.mubr.f32.vlgmr.msra.gmra.mrb[22].mxu0 %v3818_v42  ;;  %v7377_v40 = vpack.c.bf16 %v4012_v44, %v4010_v7  ;;  %v4620_v7 = vld [vmem:[#allocation15 + $0x50] sm:$0xff]  ;;  %v4621_v44 = vld [vmem:[#allocation15 + $0x58] sm:$0xff] }
 0x836   :  { %7318 = vmatpush1.bf16.msra.mxu0 %v7317_v15  ;;  %4220 = vmatprep.mubr.f32.mxu0 %v3821_v60  ;;  %v3984_v15 = vld [vmem:[#allocation10 + $0x510] sm:$0xff]  ;;  %v3991_v60 = vld [vmem:[#allocation10 + $0x548] sm:$0xff] }
 0x837   :  { %7320 = vmatprep.subr.bf16.mxu0 %v7319_v6  ;;  %v3987_v6 = vld [vmem:[#allocation10 + $0x528] sm:$0xff]  ;;  %v7349_v32 = vpack.c.bf16 %v3984_v15, %v3982_v48 }
 0x838   :  { %v7351_v42 = vpack.c.bf16 %v3989_v11, %v3987_v6 }
 0x83a   :  { %7322 = vmatpush1.bf16.msra.mxu0 %v7321_v20  ;;  %v3993_v20 = vld [vmem:[#allocation10 + $0x558] sm:$0xff] }
 0x83b   :  { %7324 = vmatprep.subr.bf16.mxu0 %v7323_v61  ;;  %v7353_v61 = vpack.c.bf16 %v3988_v8, %v3986_v55  ;;  %v7355_v0 = vpack.c.bf16 %v3993_v20, %v3991_v60 }
 0x83e   :  { %7326 = vmatpush1.bf16.msra.mxu0 %v7325_v56  ;;  %v3997_v56 = vld [vmem:[#allocation10 + $0x578] sm:$0xff] }
 0x83f   :  { %7328 = vmatprep.subr.bf16.mxu0 %v7327_v33  ;;  %v7357_v33 = vpack.c.bf16 %v3992_v13, %v3990_v54  ;;  %v7359_v4 = vpack.c.bf16 %v3997_v56, %v3995_v27 }
 0x842   :  { %7330 = vmatpush1.bf16.msra.mxu0 %v7329_v31  ;;  %v4001_v31 = vld [vmem:[#allocation10 + $0x598] sm:$0xff] }
 0x843   :  { %7332 = vmatprep.subr.bf16.mxu0 %v7331_v45  ;;  %v7361_v45 = vpack.c.bf16 %v3996_v59, %v3994_v41  ;;  %v7363_v51 = vpack.c.bf16 %v4001_v31, %v3999_v18  ;;  %v4419_v31 = vld [vmem:[%s9211_s13] sm:$0x1] }
 0x846   :  { %7334 = vmatpush1.bf16.msra.mxu0 %v7333_v3  ;;  %v4005_v3 = vld [vmem:[#allocation10 + $0x5b8] sm:$0xff] }
 0x847   :  { %7336 = vmatprep.subr.bf16.mxu0 %v7335_v23  ;;  %v7365_v23 = vpack.c.bf16 %v4000_v58, %v3998_v57  ;;  %v7367_v46 = vpack.c.bf16 %v4005_v3, %v4003_v9  ;;  %v4610_v57 = vld [vmem:[#allocation15] sm:$0xff]  ;;  %v4611_v58 = vld [vmem:[#allocation15 + $0x8] sm:$0xff] }
 0x848   :  { %v4423_v9 = vld [vmem:[%s9212_s14] sm:$0x1] }
 0x84a   :  { %7338 = vmatpush1.bf16.msra.mxu0 %v7337_v1  ;;  %v4009_v1 = vld [vmem:[#allocation10 + $0x5d8] sm:$0xff] }
 0x84b   :  { %7340 = vmatprep.subr.bf16.mxu0 %v7339_v39  ;;  %v7369_v39 = vpack.c.bf16 %v4004_v38, %v4002_v49  ;;  %v7371_v28 = vpack.c.bf16 %v4009_v1, %v4007_v47  ;;  %v4612_v49 = vld [vmem:[#allocation15 + $0x10] sm:$0xff]  ;;  %v4613_v38 = vld [vmem:[#allocation15 + $0x18] sm:$0xff]  ;;  %v4614_v1 = vld [vmem:[#allocation15 + $0x20] sm:$0xff] }
 0x84c   :  { %v7467_v47 = vpack.c.bf16 %v4613_v38, %v4612_v49  ;;  %v4887_v38 = vld [vmem:[#allocation18] sm:$0xff] }
 0x84e   :  { %7342 = vmatpush1.bf16.msra.mxu0 %v7341_v52  ;;  %v4013_v52 = vld [vmem:[#allocation10 + $0x5f8] sm:$0xff] }
 0x84f   :  { %7344 = vmatprep.subr.bf16.mxu0 %v7343_v16  ;;  %v7373_v16 = vpack.c.bf16 %v4008_v63, %v4006_v17  ;;  %v7375_v24 = vpack.c.bf16 %v4013_v52, %v4011_v2  ;;  %v4616_v17 = vld [vmem:[#allocation15 + $0x30] sm:$0xff]  ;;  %v4617_v63 = vld [vmem:[#allocation15 + $0x38] sm:$0xff]  ;;  %v4618_v52 = vld [vmem:[#allocation15 + $0x40] sm:$0xff] }
 0x850   :  { %v7473_v2 = vpack.c.bf16 %v4617_v63, %v4616_v17 }
 0x852   :  { %7346 = vmatpush1.bf16.msra.mxu0 %v7345_v26  ;;  %v3814_v26 = vmul.f32 0.2, %v8981_v50 }
 0x853   :  { %7348 = vmatprep.subr.bf16.mxu0 %v7347_v25 }
 0x854   :  { %v3820_v25 = vsel %vm3808_vm13, %v8981_v50, %v3814_v26  ;;  %v4622_v26 = vld [vmem:[#allocation15 + $0x60] sm:$0xff] }
 0x856   :  { %7350 = vmatpush1.bf16.msra.mxu0 %v7349_v32 }
 0x857   :  { %7352 = vmatprep.subr.bf16.mxu0 %v7351_v42 }
 0x85a   :  { %7354 = vmatpush1.bf16.msra.mxu0 %v7353_v61 }
 0x85b   :  { %7356 = vmatprep.subr.bf16.mxu0 %v7355_v0 }
 0x85e   :  { %7358 = vmatpush1.bf16.msra.mxu0 %v7357_v33 }
 0x85f   :  { %7360 = vmatprep.subr.bf16.mxu0 %v7359_v4 }
 0x862   :  { %7362 = vmatpush1.bf16.msra.mxu0 %v7361_v45 }
 0x863   :  { %7364 = vmatprep.subr.bf16.mxu0 %v7363_v51 }
 0x866   :  { %7366 = vmatpush1.bf16.msra.mxu0 %v7365_v23  ;;  %v7464_v23 = vpack.c.bf16 %v4611_v58, %v4610_v57  ;;  %v4711_v58 = vld [vmem:[#allocation16 + $0x20] sm:$0xff] }
 0x867   :  { %7368 = vmatprep.subr.bf16.mxu0 %v7367_v46 }
 0x86a   :  { %7370 = vmatpush1.bf16.msra.mxu0 %v7369_v39  ;;  %v4615_v39 = vld [vmem:[#allocation15 + $0x28] sm:$0xff] }
 0x86b   :  { %7372 = vmatprep.subr.bf16.mxu0 %v7371_v28  ;;  %v7470_v28 = vpack.c.bf16 %v4615_v39, %v4614_v1 }
 0x86e   :  { %7374 = vmatpush1.bf16.msra.mxu0 %v7373_v16  ;;  %v4619_v16 = vld [vmem:[#allocation15 + $0x48] sm:$0xff] }
 0x86f   :  { %7376 = vmatprep.subr.bf16.mxu0 %v7375_v24  ;;  %v7476_v24 = vpack.c.bf16 %v4619_v16, %v4618_v52 }
 0x872   :  { %7378 = vmatpush1.bf16.msra.mxu0 %v7377_v40  ;;  %v7479_v40 = vpack.c.bf16 %v4621_v44, %v4620_v7 }
 0x873   :  { %7534 = vmatprep.subr.bf16.mxu0 %v7998_v21 }
 0x875   :  { %4221 = vmatmul.mubr.f32.vlgmr.msra.gmra.mrb[22].mxu0 %v3820_v25  ;;  %v4623_v25 = vld [vmem:[#allocation15 + $0x68] sm:$0xff] }
 0x876   :  { %6160 = vmatprep.mubr.msk.f32.mxu0 %vm7999_vm1, %v7996_v30 }
 0x948   :  { %v9045_v48 = vpop.f32.mrb[22].mxu0 }
 0x949   :  { %v9047_v15 = vpop.f32.mrb[23].mxu0  ;;  %v4325_v50 = vmul.f32 %v9045_v48, %v9045_v48 }
 0x94a   :  { %v4326_v6 = vmul.f32 %v9047_v15, %v9047_v15  ;;  %5608 = vmatprep.mubr.msk.f32.mxu1 %vm4251_vm14, %v9047_v15 }
 0x94b   :  { %4320 = vmatmul.mubr.f32.vlgmr.msra.gmra.mrb[32].mxu1 %v9045_v48 }
 0x94c   :  { %7417 = vmatpush1.bf16.msra.mxu1 %v8987_v19  ;;  %5609 = vmatprep.mubr.msk.f32.mxu1 %vm4251_vm14, %v4326_v6  ;;  %v4427_v19 = vld [vmem:[#allocation13 + $0x8] sm:$0xff]  ;;  %v7482_v6 = vpack.c.bf16 %v4623_v25, %v4622_v26 }
 0x94d   :  { %7418 = vmatprep.subr.bf16.mxu1 %v7998_v21 }
 0x950   :  { %7420 = vmatpush1.bf16.msra.mxu1 %v8990_v5  ;;  %v4429_v5 = vld [vmem:[#allocation13 + $0x18] sm:$0xf] }
 0x951   :  { %7421 = vmatprep.subr.bf16.mxu1 %v7998_v21 }
 0x954   :  { %7423 = vmatpush1.bf16.msra.mxu1 %v8994_v35  ;;  %v4426_v35 = vld [vmem:[#allocation13] sm:$0xff] }
 0x955   :  { %7424 = vmatprep.subr.bf16.mxu1 %v7998_v21 }
 0x958   :  { %7426 = vmatpush1.bf16.msra.mxu1 %v8998_v12  ;;  %v7451_v12 = vpack.c.bf16 %v4429_v5, %v4427_v19  ;;  %v4625_v19 = vld [vmem:[#allocation15 + $0x78] sm:$0xff] }
 0x959   :  { %7427 = vmatprep.subr.bf16.mxu1 %v7998_v21 }
 0x95c   :  { %7429 = vmatpush1.bf16.msra.mxu1 %v9002_v37  ;;  %v4428_v37 = vld [vmem:[#allocation13 + $0x10] sm:$0xf] }
 0x95d   :  { %7430 = vmatprep.subr.bf16.mxu1 %v7998_v21 }
 0x960   :  { %7432 = vmatpush1.bf16.msra.mxu1 %v9006_v10  ;;  %v7454_v10 = vpack.c.bf16 %v4428_v37, %v4426_v35  ;;  %v4626_v35 = vld [vmem:[#allocation15 + $0x80] sm:$0xff] }
 0x961   :  { %7433 = vmatprep.subr.bf16.mxu1 %v7998_v21 }
 0x964   :  { %7435 = vmatpush1.bf16.msra.mxu1 %v9010_v53 }
 0x965   :  { %7436 = vmatprep.subr.bf16.mxu1 %v7998_v21 }
 0x968   :  { %7438 = vmatpush1.bf16.msra.mxu1 %v9014_v36 }
 0x969   :  { %7439 = vmatprep.subr.bf16.mxu1 %v7998_v21 }
 0x96c   :  { %7441 = vmatpush1.bf16.msra.mxu1 %v9018_v34 }
 0x96d   :  { %7442 = vmatprep.subr.bf16.mxu1 %v7998_v21 }
 0x970   :  { %7444 = vmatpush1.bf16.msra.mxu1 %v9022_v14 }
 0x971   :  { %7445 = vmatprep.subr.bf16.mxu1 %v7998_v21 }
 0x974   :  { %7447 = vmatpush1.bf16.msra.mxu1 %v9026_v62 }
 0x975   :  { %7448 = vmatprep.subr.bf16.mxu1 %v7998_v21 }
 0x978   :  { %7450 = vmatpush1.bf16.msra.mxu1 %v9030_v22 }
 0x979   :  { %7453 = vmatprep.subr.msk.bf16.mxu1 %vm8907_vm5, %v7451_v12 }
 0x97b   :  { %4395 = vmatmul.mubr.f32.vlgmr.msra.gmra.mrb[34].mxu1 %v4325_v50  ;;  %v4624_v50 = vld [vmem:[#allocation15 + $0x70] sm:$0xff] }
 0x97c   :  { %4503 = vmatprep.mubr.f32.mxu1 %v7996_v30  ;;  %7456 = vmatpush1.bf16.msk.msra.mxu1 %vm8907_vm5, %v7454_v10  ;;  %v7485_v5 = vpack.c.bf16 %v4625_v19, %v4624_v50 }
 0x97d   :  { %7459 = vmatprep.subr.msk.bf16.mxu1 %vm8907_vm5, %v7451_v12  ;;  %v4627_v12 = vld [vmem:[#allocation15 + $0x88] sm:$0xff] }
 0x97e   :  { %v7488_v37 = vpack.c.bf16 %v4627_v12, %v4626_v35 }
 0xa1e   :  { %v4321_v53 = vpop.f32.mrb[32].mxu1 }
 0xa1f   :  { %v4323_v36 = vpop.f32.mrb[33].mxu1  ;;  %v4400_v34 = vsel %vm3253_vm6, %v4321_v53, 0.0  ;;  %v4629_v53 = vld [vmem:[#allocation15 + $0x98] sm:$0xff] }
 0xa20   :  { %v4401_v14 = vrot.slane %v4400_v34, 4 }
 0xa22   :  { %v4402_v62 = vadd.f32 %v4401_v14, %v4400_v34  ;;  %v4630_v34 = vld [vmem:[#allocation15 + $0xa0] sm:$0xff]  ;;  %v4631_v14 = vld [vmem:[#allocation15 + $0xa8] sm:$0xff] }
 0xa24   :  { %v4403_v22 = vrot.slane %v4402_v62, 2 }
 0xa26   :  { %v4404_v11 = vadd.f32 %v4403_v22, %v4402_v62  ;;  %v7494_v62 = vpack.c.bf16 %v4631_v14, %v4630_v34  ;;  %v4632_v22 = vld [vmem:[#allocation15 + $0xb0] sm:$0xff]  ;;  %v4880_v14 = vld [vmem:[%s9216_s18] sm:$0x1] }
 0xa28   :  { %v4405_v8 = vrot.slane %v4404_v11, 1 }
 0xa2a   :  { %v4406_v61 = vadd.f32 %v4405_v8, %v4404_v11  ;;  %v4633_v11 = vld [vmem:[#allocation15 + $0xb8] sm:$0xff] }
 0xa2c   :  { %v4407_v13 = vmul.f32 0.03125, %v4406_v61 }
 0xa2e   :  { %v4416_v33 = vmul.f32 %v4407_v13, %v4407_v13 }
 0xa4e   :  { %v4396_v32 = vpop.f32.mrb[34].mxu1 }
 0xa4f   :  { %v4408_v42 = vsel %vm3253_vm6, %v4396_v32, 0.0  ;;  %v4398_v55 = vpop.f32.mrb[35].mxu1  ;;  %v7497_v32 = vpack.c.bf16 %v4633_v11, %v4632_v22  ;;  %v4884_v11 = vld [vmem:[%s9217_s19] sm:$0x1] }
 0xa50   :  { %v4409_v60 = vrot.slane %v4408_v42, 4 }
 0xa52   :  { %v4410_v20 = vadd.f32 %v4409_v60, %v4408_v42 }
 0xa54   :  { %v4411_v0 = vrot.slane %v4410_v20, 2 }
 0xa56   :  { %v4412_v54 = vadd.f32 %v4411_v0, %v4410_v20 }
 0xa58   :  { %v4413_v27 = vrot.slane %v4412_v54, 1 }
 0xa5a   :  { %v4414_v56 = vadd.f32 %v4413_v27, %v4412_v54 }
 0xa5c   :  { %v4415_v4 = vmul.f32 0.03125, %v4414_v56 }
 0xa5e   :  { %v4417_v41 = vsub.f32 %v4415_v4, %v4416_v33  ;;  %v4707_v4 = vld [vmem:[#allocation16] sm:$0xff] }
 0xa60   :  { %v4418_v59 = vmax.f32 %v4417_v41, 0.0  ;;  %v4708_v41 = vld [vmem:[#allocation16 + $0x8] sm:$0xff] }
 0xa62   :  { %v4420_v18 = vadd.f32 1e-05, %v4418_v59 }
 0xa64   :  { %7594 = vrsqrt.f32 %v4420_v18 }
 0xa6e   :  { %v7595_v45 = vpop.eup %7594 }
 0xa6f   :  { %v4422_v51 = vmul.f32 %v7595_v45, %v4419_v31  ;;  %v7500_v31 = vpack.c.bf16 %v4708_v41, %v4707_v4  ;;  %v5132_v4 = vld [vmem:[#allocation21 + $0x10] sm:$0xff] }
 0xa71   :  { %5612 = vmatmul.mubr.msk.f32.vlgmr.msra.gmra.mrb[36].mxu1 %vm3292_vm7, %v4422_v51  ;;  %v4424_v3 = vmul.f32 %v4422_v51, %v4407_v13  ;;  %v4709_v51 = vld [vmem:[#allocation16 + $0x10] sm:$0xff] }
 0xa72   :  { %7462 = vmatpush1.bf16.msk.msra.mxu1 %vm8907_vm5, %v7454_v10  ;;  %4577 = vmatprep.mubr.f32.mxu1 %v7996_v30  ;;  %v4628_v10 = vld [vmem:[#allocation15 + $0x90] sm:$0xff] }
 0xa73   :  { %v4425_v46 = vsub.f32 %v4423_v9, %v4424_v3  ;;  %7463 = vmatprep.subr.bf16.mxu1 %v7998_v21  ;;  %v7491_v36 = vpack.c.bf16 %v4629_v53, %v4628_v10  ;;  %v4712_v9 = vld [vmem:[#allocation16 + $0x28] sm:$0xff] }
 0xa74   :  { %v7506_v3 = vpack.c.bf16 %v4712_v9, %v4711_v58 }
 0xa75   :  { %5615 = vmatmul.mubr.msk.f32.vlgmr.msra.gmra.mrb[38].mxu1 %vm3292_vm7, %v4425_v46 }
 0xa76   :  { %7465 = vmatpush1.bf16.msra.mxu1 %v7464_v23 }
 0xa77   :  { %7466 = vmatprep.subr.bf16.mxu1 %v7998_v21 }
 0xa7a   :  { %7468 = vmatpush1.bf16.msra.mxu1 %v7467_v47  ;;  %v4888_v47 = vld [vmem:[#allocation18 + $0x8] sm:$0xf] }
 0xa7b   :  { %7469 = vmatprep.subr.bf16.mxu1 %v7998_v21  ;;  %v7518_v1 = vpack.c.bf16 %v4888_v47, %v4887_v38 }
 0xa7e   :  { %7471 = vmatpush1.bf16.msra.mxu1 %v7470_v28 }
 0xa7f   :  { %7472 = vmatprep.subr.bf16.mxu1 %v7998_v21 }
 0xa82   :  { %7474 = vmatpush1.bf16.msra.mxu1 %v7473_v2 }
 0xa83   :  { %7475 = vmatprep.subr.bf16.mxu1 %v7998_v21 }
 0xa86   :  { %7477 = vmatpush1.bf16.msra.mxu1 %v7476_v24 }
 0xa87   :  { %7478 = vmatprep.subr.bf16.mxu1 %v7998_v21 }
 0xa8a   :  { %7480 = vmatpush1.bf16.msra.mxu1 %v7479_v40 }
 0xa8b   :  { %7481 = vmatprep.subr.bf16.mxu1 %v7998_v21 }
 0xa8e   :  { %7483 = vmatpush1.bf16.msra.mxu1 %v7482_v6 }
 0xa8f   :  { %7484 = vmatprep.subr.bf16.mxu1 %v7998_v21 }
 0xa92   :  { %7486 = vmatpush1.bf16.msra.mxu1 %v7485_v5 }
 0xa93   :  { %7487 = vmatprep.subr.bf16.mxu1 %v7998_v21 }
 0xa96   :  { %7489 = vmatpush1.bf16.msra.mxu1 %v7488_v37 }
 0xa97   :  { %7490 = vmatprep.subr.bf16.mxu1 %v7998_v21 }
 0xa9a   :  { %7492 = vmatpush1.bf16.msra.mxu1 %v7491_v36 }
 0xa9b   :  { %7493 = vmatprep.subr.bf16.mxu1 %v7998_v21 }
 0xa9e   :  { %7495 = vmatpush1.bf16.msra.mxu1 %v7494_v62 }
 0xa9f   :  { %7496 = vmatprep.subr.bf16.mxu1 %v7998_v21 }
 0xaa2   :  { %7498 = vmatpush1.bf16.msra.mxu1 %v7497_v32 }
 0xaa3   :  { %7499 = vmatprep.subr.bf16.mxu1 %v7998_v21 }
 0xb44   :  { %v4505_v42 = vpop.f32.mrb[36].mxu1 }
 0xb45   :  { %v4587_v55 = vrot.slane %v4505_v42, %v8617_v43  ;;  %v4507_v8 = vpop.f32.mrb[37].mxu1 }
 0xb46   :  { %v4591_v60 = vrot.slane %v4507_v8, %v8617_v43  ;;  %v5052_v8 = vld [vmem:[#allocation19 + $0x8] sm:$0xff] }
 0xb47   :  { %v4592_v20 = vmul.f32 %v4587_v55, %v9045_v48  ;;  %v4710_v48 = vld [vmem:[#allocation16 + $0x18] sm:$0xff]  ;;  %v5051_v55 = vld [vmem:[#allocation19] sm:$0xff] }
 0xb48   :  { %v4593_v61 = vmul.f32 %v4591_v60, %v9047_v15  ;;  %v4579_v0 = vpop.f32.mrb[38].mxu1  ;;  %v7503_v57 = vpack.c.bf16 %v4710_v48, %v4709_v51  ;;  %v7526_v60 = vpack.c.bf16 %v5052_v8, %v5051_v55 }
 0xb49   :  { %v4597_v54 = vrot.slane %v4579_v0, %v8617_v43  ;;  %v4581_v13 = vpop.f32.mrb[39].mxu1  ;;  %v5055_v0 = vld [vmem:[#allocation19 + $0x20] sm:$0xff] }
 0xb4a   :  { %v4601_v27 = vrot.slane %v4581_v13, %v8617_v43 }
 0xb4b   :  { %v4602_v56 = vadd.f32 %v4597_v54, %v4592_v20  ;;  %v5053_v20 = vld [vmem:[#allocation19 + $0x10] sm:$0xff]  ;;  %v5056_v54 = vld [vmem:[#allocation19 + $0x28] sm:$0xff] }
 0xb4c   :  { %v4603_v33 = vadd.f32 %v4601_v27, %v4593_v61  ;;  %v7529_v61 = vpack.c.bf16 %v5054_v29, %v5053_v20  ;;  %v7532_v13 = vpack.c.bf16 %v5056_v54, %v5055_v0  ;;  %v5130_v27 = vld [vmem:[#allocation21] sm:$0xff] }
 0xb4d   :  { %v4606_v59 = vmul.f32 0.2, %v4602_v56  ;;  %vm4604_vm0 = vcmp.ge.f32.partialorder %v4602_v56, 0.0 }
 0xb4e   :  { %v4607_v18 = vmul.f32 0.2, %v4603_v33  ;;  %vm4605_vm15 = vcmp.ge.f32.partialorder %v4603_v33, 0.0 }
 0xb4f   :  { %v4608_v15 = vsel %vm4604_vm0, %v4602_v56, %v4606_v59  ;;  %v5131_v56 = vld [vmem:[#allocation21 + $0x8] sm:$0xff] }
 0xb50   :  { %v4609_v45 = vsel %vm4605_vm15, %v4603_v33, %v4607_v18  ;;  %v7535_v33 = vpack.c.bf16 %v5131_v56, %v5130_v27  ;;  %v5630_v27 = vld [vmem:[#allocation25] ss:$0 sm:$0xff] }
 0xb51   :  { %5616 = vmatprep.mubr.msk.f32.mxu1 %vm4251_vm14, %v4609_v45 }
 0xb52   :  { %4702 = vmatmul.mubr.f32.vlgmr.msra.gmra.mrb[40].mxu1 %v4608_v15  ;;  %7536 = vmatpush3.bf16.msra.mxu0 %v7535_v33 }
 0xb53   :  { %7501 = vmatpush3.bf16.msra.mxu1 %v7500_v31  ;;  %6107 = vmatprep.mubr.msk.f32.mxu1 %vm7999_vm1, %v7996_v30 }
 0xb54   :  { %7502 = vmatprep.subr.bf16.mxu1 %v7998_v21  ;;  %6158 = vmatprep.subr.mxu0 %v7996_v30 }
 0xb56   :  { %6159 = vmatpush3.msra.mxu0 %v5132_v4 }
 0xb57   :  { %7504 = vmatpush3.bf16.msra.mxu1 %v7503_v57  ;;  %6172 = vmatprep.subr.mxu0 %v7996_v30 }
 0xb58   :  { %7505 = vmatprep.subr.bf16.mxu1 %v7998_v21 }
 0xb5b   :  { %7507 = vmatpush3.bf16.msra.mxu1 %v7506_v3 }
 0xb5c   :  { %7508 = vmatprep.subr.bf16.mxu1 %v7998_v21 }
 0xc25   :  { %v9127_v23 = vpop.f32.mrb[40].mxu1 }
 0xc26   :  { %v4705_v46 = vpop.f32.mrb[41].mxu1  ;;  %6108 = vmatmul.mubr.msk.f32.vlgmr.msra.gmra.mrb[42].mxu1 %vm4713_vm2, %v9127_v23  ;;  %v4787_v49 = vmul.f32 %v9127_v23, %v9127_v23 }
 0xc27   :  { %7510 = vmatpush3.bf16.msra.mxu1 %v7500_v31  ;;  %6122 = vmatprep.mubr.msk.f32.mxu1 %vm7999_vm1, %v7996_v30  ;;  %v5308_v46 = vld [vmem:[#allocation22] sm:$0x3f] }
 0xc28   :  { %7511 = vmatprep.subr.bf16.mxu1 %v7998_v21 }
 0xc2b   :  { %7513 = vmatpush3.bf16.msra.mxu1 %v7503_v57 }
 0xc2c   :  { %7514 = vmatprep.subr.bf16.mxu1 %v7998_v21 }
 0xc2f   :  { %7516 = vmatpush3.bf16.msra.mxu1 %v7506_v3 }
 0xc30   :  { %7517 = vmatprep.subr.bf16.mxu1 %v7998_v21 }
 0xc32   :  { %6123 = vmatmul.mubr.msk.f32.vlgmr.msra.gmra.mrb[44].mxu1 %vm4713_vm2, %v4787_v49 }
 0xc33   :  { %6129 = vmatprep.mubr.msk.f32.mxu1 %vm7999_vm1, %v7996_v30  ;;  %7520 = vmatpush3.bf16.msk.msra.mxu1 %vm8907_vm5, %v7518_v1 }
 0xc34   :  { %7521 = vmatprep.subr.bf16.mxu1 %v7998_v21 }
 0xcf9   :  { %v4783_v39 = vpop.f32.mrb[42].mxu1 }
 0xcfa   :  { %v4861_v28 = vsel %vm3253_vm6, %v4783_v39, 0.0  ;;  %v6109_v17 = vpop.f32.mrb[43].mxu1 }
 0xcfb   :  { %v4862_v63 = vrot.slane %v4861_v28, 4 }
 0xcfd   :  { %v4863_v2 = vadd.f32 %v4862_v63, %v4861_v28 }
 0xcff   :  { %v4864_v52 = vrot.slane %v4863_v2, 2 }
 0xd01   :  { %v4865_v16 = vadd.f32 %v4864_v52, %v4863_v2 }
 0xd03   :  { %v4866_v40 = vrot.slane %v4865_v16, 1 }
 0xd05   :  { %v4857_v24 = vpop.f32.mrb[44].mxu1  ;;  %v4867_v6 = vadd.f32 %v4866_v40, %v4865_v16 }
 0xd06   :  { %v4869_v7 = vsel %vm3253_vm6, %v4857_v24, 0.0  ;;  %v6124_v44 = vpop.f32.mrb[45].mxu1  ;;  %vm5281_vm6 = vcmask 41984  }
 0xd07   :  { %v4870_v26 = vrot.slane %v4869_v7, 4  ;;  %v4868_v5 = vmul.f32 0.125, %v4867_v6 }
 0xd09   :  { %v4871_v25 = vadd.f32 %v4870_v26, %v4869_v7  ;;  %v4877_v37 = vmul.f32 %v4868_v5, %v4868_v5 }
 0xd0b   :  { %v4872_v50 = vrot.slane %v4871_v25, 2 }
 0xd0d   :  { %v4873_v19 = vadd.f32 %v4872_v50, %v4871_v25 }
 0xd0f   :  { %v4874_v35 = vrot.slane %v4873_v19, 1 }
 0xd11   :  { %v4875_v12 = vadd.f32 %v4874_v35, %v4873_v19 }
 0xd13   :  { %v4876_v10 = vmul.f32 0.125, %v4875_v12 }
 0xd15   :  { %v4878_v53 = vsub.f32 %v4876_v10, %v4877_v37  ;;  %v5301_v37 = vld [vmem:[%s9221_s23] sm:$0x1] }
 0xd17   :  { %v4879_v36 = vmax.f32 %v4878_v53, 0.0 }
 0xd19   :  { %v4881_v34 = vadd.f32 1e-05, %v4879_v36  ;;  %v5305_v36 = vld [vmem:[%s9268_s7] sm:$0x1] }
 0xd1b   :  { %7596 = vrsqrt.f32 %v4881_v34 }
 0xd25   :  { %v7597_v62 = vpop.eup %7596 }
 0xd26   :  { %v4883_v22 = vmul.f32 %v7597_v62, %v4880_v14  ;;  %v5473_v62 = vld [vmem:[#allocation24] sm:$0xff] }
 0xd28   :  { %6130 = vmatmul.mubr.msk.f32.vlgmr.msra.gmra.mrb[46].mxu1 %vm3292_vm7, %v4883_v22  ;;  %v4885_v32 = vmul.f32 %v4883_v22, %v4868_v5  ;;  %v5474_v22 = vld [vmem:[#allocation24 + $0x8] sm:$0xff] }
 0xd29   :  { %7524 = vmatpush3.bf16.msk.msra.mxu1 %vm8907_vm5, %v7518_v1  ;;  %6136 = vmatprep.mubr.msk.f32.mxu1 %vm7999_vm1, %v7996_v30  ;;  %vm5313_vm5 = vcmask 1045504  }
 0xd2a   :  { %v4886_v42 = vsub.f32 %v4884_v11, %v4885_v32  ;;  %7525 = vmatprep.subr.bf16.mxu1 %v7998_v21  ;;  %v7541_v11 = vpack.c.bf16 %v5474_v22, %v5473_v62  ;;  %v5475_v32 = vld [vmem:[#allocation24 + $0x10] sm:$0xff] }
 0xd2c   :  { %6137 = vmatmul.mubr.msk.f32.vlgmr.msra.gmra.mrb[48].mxu1 %vm3292_vm7, %v4886_v42  ;;  %vm5309_vm7 = vcmask 48128  }
 0xd2d   :  { %6151 = vmatprep.mubr.msk.f32.mxu1 %vm7999_vm1, %v7996_v30  ;;  %7527 = vmatpush3.bf16.msra.mxu1 %v7526_v60 }
 0xd2e   :  { %7528 = vmatprep.subr.bf16.mxu1 %v7998_v21 }
 0xd31   :  { %7530 = vmatpush3.bf16.msra.mxu1 %v7529_v61 }
 0xd32   :  { %7531 = vmatprep.subr.bf16.mxu1 %v7998_v21 }
 0xd35   :  { %7533 = vmatpush3.bf16.msra.mxu1 %v7532_v13 }
 0xd36   :  { %7537 = vmatprep.subr.bf16.mxu1 %v7998_v21 }
 0xdfb   :  { %v4961_v41 = vpop.f32.mrb[46].mxu1 }
 0xdfc   :  { %v5041_v59 = vrot.slane %v4961_v41, %v8617_v43  ;;  %v6131_v18 = vpop.f32.mrb[47].mxu1 }
 0xdfe   :  { %v5042_v31 = vmul.f32 %v5041_v59, %v9127_v23 }
 0xdff   :  { %v5034_v45 = vpop.f32.mrb[48].mxu1 }
 0xe00   :  { %v5046_v51 = vrot.slane %v5034_v45, %v8617_v43  ;;  %v6138_v48 = vpop.f32.mrb[49].mxu1 }
 0xe02   :  { %v5047_v15 = vadd.f32 %v5046_v51, %v5042_v31 }
 0xe04   :  { %vm5048_vm3 = vcmp.ge.f32.partialorder %v5047_v15, 0.0  ;;  %v5049_v57 = vmul.f32 0.2, %v5047_v15 }
 0xe06   :  { %v5050_v58 = vsel %vm5048_vm3, %v5047_v15, %v5049_v57 }
 0xe07   :  { %6152 = vmatmul.mubr.msk.f32.vlgmr.msra.gmra.mrb[50].mxu1 %vm4713_vm2, %v5050_v58 }
 0xe08   :  { %7539 = vmatpush3.bf16.msra.mxu1 %v7535_v33  ;;  %6169 = vmatprep.mubr.msk.f32.mxu1 %vm7999_vm1, %v7996_v30 }
 0xe09   :  { %6167 = vmatprep.subr.mxu1 %v7996_v30 }
 0xe0c   :  { %6168 = vmatpush3.msra.mxu1 %v5132_v4 }
 0xe0d   :  { %7540 = vmatprep.subr.bf16.mxu1 %v7998_v21 }
 0xeda   :  { %v5126_v9 = vpop.f32.mrb[50].mxu1 }
 0xedb   :  { %v5207_v3 = vmul.f32 %v5126_v9, %v5126_v9  ;;  %v6153_v23 = vpop.f32.mrb[51].mxu1  ;;  %6161 = vmatmul.mubr.msk.f32.vlgmr.msra.gmra.mrb[24].mxu0 %vm5133_vm4, %v5126_v9 }
 0xedc   :  { %6174 = vmatprep.mubr.msk.f32.mxu0 %vm7999_vm1, %v7996_v30  ;;  %6173 = vmatpush3.msk.msra.mxu0 %vm5313_vm5, %v5308_v46 }
 0xedd   :  { %6170 = vmatmul.mubr.msk.f32.vlgmr.msra.gmra.mrb[52].mxu1 %vm5133_vm4, %v5207_v3  ;;  %6177 = vmatprep.subr.mxu0 %v7996_v30 }
 0xede   :  { %6188 = vmatprep.mubr.msk.f32.mxu1 %vm7999_vm1, %v7996_v30  ;;  %7542 = vmatpush3.bf16.msra.mxu1 %v7541_v11 }
 0xedf   :  { %6186 = vmatprep.subr.mxu1 %v7996_v30 }
 0xee2   :  { %6187 = vmatpush3.msra.mxu1 %v5475_v32 }
 0xfae   :  { %v5203_v21 = vpop.f32.mrb[24].mxu0 }
 0xfaf   :  { %v5282_v49 = vsel %vm5281_vm6, %v5203_v21, 0.0  ;;  %v6162_v38 = vpop.f32.mrb[25].mxu0 }
 0xfb0   :  { %v5283_v47 = vrot.slane %v5282_v49, 4  ;;  %v5277_v1 = vpop.f32.mrb[52].mxu1 }
 0xfb1   :  { %v5290_v39 = vsel %vm5281_vm6, %v5277_v1, 0.0  ;;  %v6171_v28 = vpop.f32.mrb[53].mxu1 }
 0xfb2   :  { %v5284_v17 = vadd.f32 %v5283_v47, %v5282_v49  ;;  %v5291_v63 = vrot.slane %v5290_v39, 4 }
 0xfb4   :  { %v5285_v2 = vrot.slane %v5284_v17, 2  ;;  %v5292_v52 = vadd.f32 %v5291_v63, %v5290_v39 }
 0xfb6   :  { %v5286_v16 = vadd.f32 %v5285_v2, %v5284_v17  ;;  %v5293_v24 = vrot.slane %v5292_v52, 2 }
 0xfb8   :  { %v5287_v7 = vrot.slane %v5286_v16, 1  ;;  %v5294_v44 = vadd.f32 %v5293_v24, %v5292_v52 }
 0xfba   :  { %v5288_v40 = vadd.f32 %v5287_v7, %v5286_v16  ;;  %v5295_v26 = vrot.slane %v5294_v44, 1 }
 0xfbc   :  { %v5289_v25 = vmul.f32 0.125, %v5288_v40  ;;  %v5296_v6 = vadd.f32 %v5295_v26, %v5294_v44 }
 0xfbe   :  { %v5298_v50 = vmul.f32 %v5289_v25, %v5289_v25  ;;  %v5297_v19 = vmul.f32 0.125, %v5296_v6 }
 0xfc0   :  { %v5299_v5 = vsub.f32 %v5297_v19, %v5298_v50 }
 0xfc2   :  { %v5300_v35 = vmax.f32 %v5299_v5, 0.0 }
 0xfc4   :  { %v5302_v12 = vadd.f32 1e-05, %v5300_v35 }
 0xfc6   :  { %7598 = vrsqrt.f32 %v5302_v12 }
 0xfd0   :  { %v7599_v10 = vpop.eup %7598 }
 0xfd1   :  { %v5304_v53 = vmul.f32 %v7599_v10, %v5301_v37 }
 0xfd3   :  { %6175 = vmatmul.mubr.msk.f32.vlgmr.msra.gmra.mrb[26].mxu0 %vm5309_vm7, %v5304_v53  ;;  %v5306_v34 = vmul.f32 %v5304_v53, %v5289_v25 }
 0xfd4   :  { %6178 = vmatpush3.msk.msra.mxu0 %vm5313_vm5, %v5308_v46  ;;  %6179 = vmatprep.mubr.msk.f32.mxu0 %vm7999_vm1, %v7996_v30 }
 0xfd5   :  { %v5307_v14 = vsub.f32 %v5305_v36, %v5306_v34 }
 0xfd7   :  { %6180 = vmatmul.mubr.msk.f32.vlgmr.msra.gmra.mrb[28].mxu0 %vm5309_vm7, %v5307_v14 }
0x10a6   :  { %v5383_v42 = vpop.f32.mrb[26].mxu0 }
0x10a7   :  { %v5463_v55 = vrot.slane %v5383_v42, %v8617_v43  ;;  %v6176_v8 = vpop.f32.mrb[27].mxu0 }
0x10a9   :  { %v5464_v60 = vmul.f32 %v5463_v55, %v5126_v9 }
0x10aa   :  { %v5456_v20 = vpop.f32.mrb[28].mxu0 }
0x10ab   :  { %v5468_v29 = vrot.slane %v5456_v20, %v8617_v43  ;;  %v6181_v61 = vpop.f32.mrb[29].mxu0 }
0x10ad   :  { %v5469_v0 = vadd.f32 %v5468_v29, %v5464_v60 }
0x10af   :  { %vm5470_vm8 = vcmp.ge.f32.partialorder %v5469_v0, 0.0  ;;  %v5471_v54 = vmul.f32 0.2, %v5469_v0 }
0x10b1   :  { %v5472_v13 = vsel %vm5470_vm8, %v5469_v0, %v5471_v54 }
0x10b2   :  { %6189 = vmatmul.mubr.msk.f32.vlgmr.msra.gmra.mrb[54].mxu1 %vm5133_vm4, %v5472_v13 }
0x1185   :  { %v5552_v56 = vpop.f32.mrb[54].mxu1 }
0x1186   :  { %v5553_v30 = vadd.f32 %v5630_v27, %v5552_v56  ;;  %v6190_v33 = vpop.f32.mrb[55].mxu1 }
0x1188   :  { %7600 = vtanh.f32 %v5553_v30 }
0x1192   :  { %v7601_v4 = vpop.eup %7600 }
0x1193   :  { %5558 = vst.msk [vmem:[%s9269_s24] sm:$0x3] %vm5557_vm9, %v7601_v4 }
0x1194   :  { %5563 = vsyncpa [#allocation3], 1 }
0x1195   :  { %5564 = vsyncpa [#allocation5], 1 }
0x1196   :  { %5565 = vsyncpa [#allocation8], 1 }
0x1197   :  { %5566 = vsyncpa [#allocation11], 1 }
0x1198   :  { %5567 = vsyncpa [#allocation14], 1 }
0x1199   :  { %5568 = vsyncpa [#allocation17], 1 }
0x119a   :  { %5569 = vsyncpa [#allocation20], 1 }
0x119b   :  { %5570 = vsyncpa [#allocation23], 1 }
0x119c   :  { %5571 = vsyncpa [#allocation26], 1 }

</bundles_post_ra>
